<compile_context>
chip_gen: v7x
topology: tpu7x:2x2x1
jax: 0.10.0
libtpu: 0.0.40
codegen_flags: <defaults>
</compile_context>

<pallas_src>
import jax
import jax.numpy as jnp
from jax import lax
from jax.experimental import pallas as pl
from jax.experimental.pallas import tpu as pltpu

NUM_MEMBERS = 4


def _round_up(x, m):
    return ((x + m - 1) // m) * m


def _ensemble_kernel(u_ref, i_ref, w2_ref, b2_ref, w3_ref, b3_ref, out_ref):
    # u_ref : (4, TU, H1) bf16   per-member user projections (users @ W1_u + b1)
    # i_ref : (4, TI, H1) bf16   per-member item projections (items @ W1_i)
    # w2_ref: (4, H1, H2) bf16
    # b2_ref: (4, 1, H2)  bf16
    # w3_ref: (4, 1, H2)  bf16   (w3 transposed; used as a VPU reduction)
    # b3_ref: (4, 1, 1)   f32
    # out_ref:(4, TU, TI) f32
    _, TU, H1 = u_ref.shape
    TI = i_ref.shape[1]
    H2 = w2_ref.shape[2]

    def member(e, carry):
        u_e = u_ref[e]                                   # (TU, H1) bf16
        i_e = i_ref[e]                                   # (TI, H1) bf16
        # ---- layer 1 (factorized, b1 pre-folded; bf16 broadcast + relu) ----
        h1 = jnp.maximum(u_e[:, None, :] + i_e[None, :, :], 0)   # (TU,TI,H1) bf16
        h1 = h1.reshape(TU * TI, H1)
        # ---- layer 2: bf16 MXU matmul, f32 accumulation, bf16 epilogue ----
        h2 = jnp.dot(h1, w2_ref[e], preferred_element_type=jnp.float32)
        h2 = jnp.maximum(h2.astype(jnp.bfloat16) + b2_ref[e], 0)  # (TU*TI,H2) bf16
        # ---- layer 3: N=1 output -> bf16 multiply, f32 lane reduction ----
        h2 = h2.reshape(TU, TI, H2)
        prod = (h2 * w3_ref[e][None]).astype(jnp.float32)
        q = jnp.sum(prod, axis=-1) + b3_ref[e]                    # (TU, TI) f32
        out_ref[e] = jax.nn.sigmoid(q)
        return carry

    lax.fori_loop(0, NUM_MEMBERS, member, None)


def ensemble_critic_forward(users, items, params):
    """users: (U, du) f32, items: (I, di) f32 -> all_qs: (4, U, I) f32."""
    w1, b1, w2, b2, w3, b3 = params
    U, du = users.shape
    I, di = items.shape
    H1 = w1.shape[-1]
    H2 = w2.shape[-1]

    # ---- layer-1 factorization, b1 folded into the user side (all f32) ----
    u_proj = jnp.einsum('ud,edh->euh', users, w1[:, :du, :]) + b1   # (4, U, H1)
    i_proj = jnp.einsum('id,edh->eih', items, w1[:, du:, :])        # (4, I, H1)

    # ---- tiling: lane-dense item tile, ~4K-row batch tiles (v7x-safe) ----
    TI = 128
    I_pad = _round_up(I, TI)
    ROWS_PER_TILE = 4096                      # TU * TI rows of h1 per grid step
    TU = min(_round_up(U, 8), max(8, ROWS_PER_TILE // TI))
    U_pad = _round_up(U, TU)

    u_proj = jnp.pad(u_proj, ((0, 0), (0, U_pad - U), (0, 0))).astype(jnp.bfloat16)
    i_proj = jnp.pad(i_proj, ((0, 0), (0, I_pad - I), (0, 0))).astype(jnp.bfloat16)
    w2_bf = w2.astype(jnp.bfloat16)                              # (4, H1, H2)
    b2_bf = b2.astype(jnp.bfloat16)                              # (4, 1, H2)
    w3_bf = w3.reshape(NUM_MEMBERS, 1, H2).astype(jnp.bfloat16)  # (4, 1, H2)

    # User tile is the inner (fast) grid axis: the larger item tile is only
    # re-DMA'd when the outer index changes.
    grid = (I_pad // TI, U_pad // TU)
    out = pl.pallas_call(
        _ensemble_kernel,
        out_shape=jax.ShapeDtypeStruct((NUM_MEMBERS, U_pad, I_pad), jnp.float32),
        grid_spec=pltpu.PrefetchScalarGridSpec(
            num_scalar_prefetch=0,
            grid=grid,
            in_specs=[
                pl.BlockSpec((NUM_MEMBERS, TU, H1), lambda ii, ui: (0, ui, 0)),
                pl.BlockSpec((NUM_MEMBERS, TI, H1), lambda ii, ui: (0, ii, 0)),
                pl.BlockSpec((NUM_MEMBERS, H1, H2), lambda ii, ui: (0, 0, 0)),
                pl.BlockSpec((NUM_MEMBERS, 1, H2), lambda ii, ui: (0, 0, 0)),
                pl.BlockSpec((NUM_MEMBERS, 1, H2), lambda ii, ui: (0, 0, 0)),
                pl.BlockSpec((NUM_MEMBERS, 1, 1), lambda ii, ui: (0, 0, 0)),
            ],
            out_specs=pl.BlockSpec((NUM_MEMBERS, TU, TI),
                                   lambda ii, ui: (0, ui, ii)),
        ),
        compiler_params=pltpu.CompilerParams(
            dimension_semantics=("parallel", "parallel"),
            vmem_limit_bytes=40 * 1024 * 1024,
        ),
    )(u_proj, i_proj, w2_bf, b2_bf, w3_bf, b3)

    # Slice off padded users / items (padded rows are harmless sigmoid noise).
    return out[:, :U, :I]


def _reference_forward(users, items, params):
    num_users = users.shape[0]
    num_items = items.shape[0]
    u_rep = jnp.broadcast_to(users[:, None, :],
                             (num_users, num_items, users.shape[1]))
    u_rep = u_rep.reshape(num_users * num_items, -1)
    i_rep = jnp.tile(items, (num_users, 1))
    x = jnp.concatenate([u_rep, i_rep], axis=1)
    w1, b1, w2, b2, w3, b3 = params
    outs = []
    for e in range(NUM_MEMBERS):
        h1 = jax.nn.relu(x @ w1[e] + b1[e, 0])
        h2 = jax.nn.relu(h1 @ w2[e] + b2[e, 0])
        q = jax.nn.sigmoid(h2 @ w3[e] + b3[e, 0])
        outs.append(q)
    return jnp.stack(outs, axis=0).reshape(NUM_MEMBERS, num_users, num_items)


def _init_params(key, d_in, h1, h2):
    ks = jax.random.split(key, 6)
    # PyTorch nn.Linear default init: U(-1/sqrt(fan_in), 1/sqrt(fan_in))
    def lin(k, fan_in, shape):
        bound = 1.0 / jnp.sqrt(fan_in)
        return jax.random.uniform(k, shape, jnp.float32, -bound, bound)
    w1 = lin(ks[0], d_in, (NUM_MEMBERS, d_in, h1))
    b1 = lin(ks[1], d_in, (NUM_MEMBERS, 1, h1))
    w2 = lin(ks[2], h1, (NUM_MEMBERS, h1, h2))
    b2 = lin(ks[3], h1, (NUM_MEMBERS, 1, h2))
    w3 = lin(ks[4], h2, (NUM_MEMBERS, h2, 1))
    b3 = lin(ks[5], h2, (NUM_MEMBERS, 1, 1))
    return (w1, b1, w2, b2, w3, b3)


if __name__ == "__main__":
    key = jax.random.PRNGKey(0)
    k_u, k_i, k_p = jax.random.split(key, 3)

    num_users, num_items = 2, 8
    user_rep_dim, item_rep_dim = 32, 32
    hidden1, hidden2 = 256, 128
    d_in = user_rep_dim + item_rep_dim

    users = jax.random.normal(k_u, (num_users, user_rep_dim), jnp.float32)
    items = jax.random.normal(k_i, (num_items, item_rep_dim), jnp.float32)
    params = _init_params(k_p, d_in, hidden1, hidden2)

    all_qs = ensemble_critic_forward(users, items, params)
    all_qs = jax.block_until_ready(all_qs)

    ref = _reference_forward(users, items, params)
    assert all_qs.shape == (NUM_MEMBERS, num_users, num_items)
    # bf16 matmul inputs / bf16 activations with f32 accumulation -> relaxed
    # tolerance vs the f32 reference.
    assert jnp.allclose(all_qs, ref, atol=2e-2, rtol=2e-2)
    print("KERNEL_OK")
</pallas_src>

<mosaic_0001>
module attributes {stable_mosaic.version = 11 : i64} {
  func.func @_ensemble_kernel(%arg0: i32, %arg1: i32, %arg2: memref<4x8x256xbf16, #tpu.memory_space<vmem>>, %arg3: memref<4x128x256xbf16, #tpu.memory_space<vmem>>, %arg4: memref<4x256x128xbf16, #tpu.memory_space<vmem>>, %arg5: memref<4x1x128xbf16, #tpu.memory_space<vmem>>, %arg6: memref<4x1x128xbf16, #tpu.memory_space<vmem>>, %arg7: memref<4x1x1xf32, #tpu.memory_space<vmem>>, %arg8: memref<4x8x128xf32, #tpu.memory_space<vmem>>) attributes {dimension_semantics = [#tpu.dimension_semantics<parallel>, #tpu.dimension_semantics<parallel>], iteration_bounds = array<i64: 1, 1>, scalar_prefetch = 0 : i64, scratch_operands = 0 : i64, tpu.core_type = #tpu.core_type<tc>, window_params = [{transform_indices = @transform_0, window_bounds = array<i64: 4, 8, 256>}, {transform_indices = @transform_1, window_bounds = array<i64: 4, 128, 256>}, {pipeline_mode = #tpu.pipeline_mode<synchronous>, transform_indices = @transform_2, window_bounds = array<i64: 4, 256, 128>}, {pipeline_mode = #tpu.pipeline_mode<synchronous>, transform_indices = @transform_3, window_bounds = array<i64: 4, 1, 128>}, {pipeline_mode = #tpu.pipeline_mode<synchronous>, transform_indices = @transform_4, window_bounds = array<i64: 4, 1, 128>}, {pipeline_mode = #tpu.pipeline_mode<synchronous>, transform_indices = @transform_5, window_bounds = array<i64: 4, 1, 1>}, {transform_indices = @transform_6, window_bounds = array<i64: 4, 8, 128>}]} {
    %c0_i32 = arith.constant 0 : i32
    %c4_i32 = arith.constant 4 : i32
    %0 = arith.addi %c0_i32, %c4_i32 : i32
    %c1_i32 = arith.constant 1 : i32
    scf.for %arg9 = %c0_i32 to %0 step %c1_i32  : i32 {
      %1 = arith.index_cast %arg9 : i32 to index
      %c0 = arith.constant 0 : index
      %c0_1 = arith.constant 0 : index
      %2 = vector.load %arg2[%1, %c0, %c0_1] : memref<4x8x256xbf16, #tpu.memory_space<vmem>>, vector<1x8x256xbf16>
      %3 = vector.shape_cast %2 : vector<1x8x256xbf16> to vector<8x256xbf16>
      %4 = arith.index_cast %arg9 : i32 to index
      %c0_2 = arith.constant 0 : index
      %c0_3 = arith.constant 0 : index
      %5 = vector.load %arg3[%4, %c0_2, %c0_3] : memref<4x128x256xbf16, #tpu.memory_space<vmem>>, vector<1x128x256xbf16>
      %6 = vector.shape_cast %5 : vector<1x128x256xbf16> to vector<128x256xbf16>
      %7 = vector.shape_cast %3 : vector<8x256xbf16> to vector<8x1x256xbf16>
      %8 = vector.shape_cast %6 : vector<128x256xbf16> to vector<1x128x256xbf16>
      %9 = vector.broadcast %7 : vector<8x1x256xbf16> to vector<8x128x256xbf16>
      %10 = vector.broadcast %8 : vector<1x128x256xbf16> to vector<8x128x256xbf16>
      %11 = arith.addf %9, %10 : vector<8x128x256xbf16>
      %cst = arith.constant 0.000000e+00 : bf16
      %12 = vector.broadcast %cst : bf16 to vector<8x128x256xbf16>
      %13 = arith.maximumf %11, %12 : vector<8x128x256xbf16>
      %14 = vector.shape_cast %13 : vector<8x128x256xbf16> to vector<1024x256xbf16>
      %15 = arith.index_cast %arg9 : i32 to index
      %c0_4 = arith.constant 0 : index
      %c0_5 = arith.constant 0 : index
      %16 = vector.load %arg4[%15, %c0_4, %c0_5] : memref<4x256x128xbf16, #tpu.memory_space<vmem>>, vector<1x256x128xbf16>
      %17 = vector.shape_cast %16 : vector<1x256x128xbf16> to vector<256x128xbf16>
      %cst_6 = arith.constant dense<0.000000e+00> : vector<1024x128xf32>
      %18 = tpu.matmul %14, %17, %cst_6 {dimension_numbers = #tpu.dot_dimension_numbers<[1], [0], [0], [1], [0, 0, 1, 1], [], []>} : vector<1024x256xbf16>, vector<256x128xbf16>, vector<1024x128xf32> -> vector<1024x128xf32>
      %19 = arith.truncf %18 : vector<1024x128xf32> to vector<1024x128xbf16>
      %20 = arith.index_cast %arg9 : i32 to index
      %c0_7 = arith.constant 0 : index
      %c0_8 = arith.constant 0 : index
      %21 = vector.load %arg5[%20, %c0_7, %c0_8] : memref<4x1x128xbf16, #tpu.memory_space<vmem>>, vector<1x1x128xbf16>
      %22 = vector.shape_cast %21 : vector<1x1x128xbf16> to vector<1x128xbf16>
      %23 = vector.broadcast %22 : vector<1x128xbf16> to vector<1024x128xbf16>
      %24 = arith.addf %19, %23 : vector<1024x128xbf16>
      %cst_9 = arith.constant 0.000000e+00 : bf16
      %25 = vector.broadcast %cst_9 : bf16 to vector<1024x128xbf16>
      %26 = arith.maximumf %24, %25 : vector<1024x128xbf16>
      %27 = vector.shape_cast %26 : vector<1024x128xbf16> to vector<8x128x128xbf16>
      %28 = arith.index_cast %arg9 : i32 to index
      %c0_10 = arith.constant 0 : index
      %c0_11 = arith.constant 0 : index
      %29 = vector.load %arg6[%28, %c0_10, %c0_11] : memref<4x1x128xbf16, #tpu.memory_space<vmem>>, vector<1x1x128xbf16>
      %30 = vector.shape_cast %29 : vector<1x1x128xbf16> to vector<1x128xbf16>
      %31 = vector.shape_cast %30 : vector<1x128xbf16> to vector<1x1x128xbf16>
      %32 = vector.broadcast %31 : vector<1x1x128xbf16> to vector<8x128x128xbf16>
      %33 = arith.mulf %27, %32 : vector<8x128x128xbf16>
      %34 = arith.extf %33 : vector<8x128x128xbf16> to vector<8x128x128xf32>
      %cst_12 = arith.constant dense<0.000000e+00> : vector<8x128xf32>
      %35 = vector.multi_reduction <add>, %34, %cst_12 [2] : vector<8x128x128xf32> to vector<8x128xf32>
      %36 = arith.index_cast %arg9 : i32 to index
      %c0_13 = arith.constant 0 : index
      %c0_14 = arith.constant 0 : index
      %37 = vector.load %arg7[%36, %c0_13, %c0_14] : memref<4x1x1xf32, #tpu.memory_space<vmem>>, vector<1x1x1xf32>
      %38 = vector.shape_cast %37 : vector<1x1x1xf32> to vector<1x1xf32>
      %39 = vector.broadcast %38 : vector<1x1xf32> to vector<8x128xf32>
      %40 = arith.addf %35, %39 : vector<8x128xf32>
      %41 = arith.negf %40 : vector<8x128xf32>
      %42 = math.exp %41 : vector<8x128xf32>
      %cst_15 = arith.constant 1.000000e+00 : f32
      %43 = vector.broadcast %cst_15 : f32 to vector<8x128xf32>
      %44 = arith.addf %43, %42 : vector<8x128xf32>
      %45 = arith.divf %43, %44 : vector<8x128xf32>
      %46 = arith.index_cast %arg9 : i32 to index
      %c0_16 = arith.constant 0 : index
      %c0_17 = arith.constant 0 : index
      %47 = vector.load %arg8[%46, %c0_16, %c0_17] : memref<4x8x128xf32, #tpu.memory_space<vmem>>, vector<1x8x128xf32>
      %48 = vector.shape_cast %47 : vector<1x8x128xf32> to vector<8x128xf32>
      %49 = vector.shape_cast %45 : vector<8x128xf32> to vector<1x8x128xf32>
      tpu.vector_store %arg8[%46, %c0_16, %c0_17], %49 {strides = array<i32>} : memref<4x8x128xf32, #tpu.memory_space<vmem>>, vector<1x8x128xf32>,
    }
    %c4_i32_0 = arith.constant 4 : i32
    return
  }
  func.func @transform_0(%arg0: i32, %arg1: i32) -> (i32, i32, i32) {
    %c0_i32 = arith.constant 0 : i32
    %c0_i32_0 = arith.constant 0 : i32
    %c0_i32_1 = arith.constant 0 : i32
    return %c0_i32, %arg1, %c0_i32_0 : i32, i32, i32
  }
  func.func @transform_1(%arg0: i32, %arg1: i32) -> (i32, i32, i32) {
    %c0_i32 = arith.constant 0 : i32
    %c0_i32_0 = arith.constant 0 : i32
    %c0_i32_1 = arith.constant 0 : i32
    return %c0_i32, %arg0, %c0_i32_0 : i32, i32, i32
  }
  func.func @transform_2(%arg0: i32, %arg1: i32) -> (i32, i32, i32) {
    %c0_i32 = arith.constant 0 : i32
    %c0_i32_0 = arith.constant 0 : i32
    %c0_i32_1 = arith.constant 0 : i32
    %c0_i32_2 = arith.constant 0 : i32
    return %c0_i32, %c0_i32_0, %c0_i32_1 : i32, i32, i32
  }
  func.func @transform_3(%arg0: i32, %arg1: i32) -> (i32, i32, i32) {
    %c0_i32 = arith.constant 0 : i32
    %c0_i32_0 = arith.constant 0 : i32
    %c0_i32_1 = arith.constant 0 : i32
    %c0_i32_2 = arith.constant 0 : i32
    return %c0_i32, %c0_i32_0, %c0_i32_1 : i32, i32, i32
  }
  func.func @transform_4(%arg0: i32, %arg1: i32) -> (i32, i32, i32) {
    %c0_i32 = arith.constant 0 : i32
    %c0_i32_0 = arith.constant 0 : i32
    %c0_i32_1 = arith.constant 0 : i32
    %c0_i32_2 = arith.constant 0 : i32
    return %c0_i32, %c0_i32_0, %c0_i32_1 : i32, i32, i32
  }
  func.func @transform_5(%arg0: i32, %arg1: i32) -> (i32, i32, i32) {
    %c0_i32 = arith.constant 0 : i32
    %c0_i32_0 = arith.constant 0 : i32
    %c0_i32_1 = arith.constant 0 : i32
    %c0_i32_2 = arith.constant 0 : i32
    return %c0_i32, %c0_i32_0, %c0_i32_1 : i32, i32, i32
  }
  func.func @transform_6(%arg0: i32, %arg1: i32) -> (i32, i32, i32) {
    %c0_i32 = arith.constant 0 : i32
    %c0_i32_0 = arith.constant 0 : i32
    return %c0_i32, %arg1, %arg0 : i32, i32, i32
  }
}

</mosaic_0001>

<bundles_post_ra>
// kernel: tpu_custom_call.1
= control target key start
LH: loop header
LB: loop body
LE: loop exit
PB: predicated region body
PF: predicated region fallthrough
CT: control target
= control target key end

     0   :  { %11 = vsyncpa [#allocation3], 0  ;;  %s6447_s0 = inlined_call_operand.hbm [shape: bf16[4,8,256], index: 0, kind: input, shape index: {}]   ;;  %s6448_s1 = inlined_call_operand.hbm [shape: bf16[4,128,256], index: 1, kind: input, shape index: {}]   ;;  %s6449_s2 = inlined_call_operand.hbm [shape: bf16[4,256,128], index: 2, kind: input, shape index: {}]   ;;  %s6450_s3 = inlined_call_operand.vmem [shape: bf16[4,1,128], index: 3, kind: input, shape index: {}]   ;;  %s6451_s4 = inlined_call_operand.vmem [shape: bf16[4,1,128], index: 4, kind: input, shape index: {}]   ;;  %s6452_s5 = inlined_call_operand.vmem [shape: f32[4,1,1], index: 5, kind: input, shape index: {}]   ;;  %s6453_s6 = inlined_call_operand.hbm [shape: f32[4,8,128], index: 6, kind: output, shape index: {}]  }
   0x1   :  { %12 = vsyncpa [#allocation6], 0 }
   0x2   :  { %13 = vsyncpa [#allocation4], 0  ;;  %s4613_s21 = smov [#allocation5]   ;;  %s4614_s23 = smov [#allocation2]  }
   0x3   :  { %s31_s22 = sshll.u32 %s4613_s21, 4  ;;  %s19_s24 = sshll.u32 %s4614_s23, 4  ;;  %s32_s22 = int_to_ptr.vmem [resolvable:$true] %s31_s22  ;;  %s4658_s24 = int_to_ptr.vmem [resolvable:$true] %s19_s24 }
   0x4   :  { %s4511_s27 = scalar_lea.hbm %s6448_s1, 8192 }
   0x5   :  { %p4512_p0 = scmp.ne.s32.totalorder %s6448_s1, %s4511_s27  ;;  %p4515_p1 = scmp.lt.u32.totalorder %s4511_s27, %s6448_s1 }
   0x7   :  { %p4517_p2 = pnand %p4515_p1, %p4512_p0 }
   0x9   :  { %4520 = shalt.err (!%p4517_p2)
}
   0xa   :  { %s4521_s8 = scalar_lea.vmem %s32_s22, 8192  ;;  %p4526_p4 = scmp.lt.s32.totalorder %s32_s22, %s32_s22 }
   0xb   :  { %p4522_p3 = scmp.ne.s32.totalorder %s32_s22, %s4521_s8  ;;  %p4527_p5 = scmp.lt.s32.totalorder %s4521_s8, %s4521_s8 }
   0xd   :  { %p4528_p6 = por %p4527_p5, %p4526_p4 }
   0xf   :  { %p4529_p7 = pnand %p4528_p6, %p4522_p3 }
  0x11   :  { %4532 = shalt.err (!%p4529_p7)
}
  0x12   :  { %s4615_s9 = smov 128   ;;  %s4616_s10 = smov 8  }
  0x13   :  { %37 = dma.hbm_to_vmem [thread:$0]  %s6448_s1, 8192, %s32_s22, [#allocation6], %s4615_s9, %s4615_s9, %s4616_s10  }
  0x14   :  { %s4533_s15 = scalar_lea.hbm %s6447_s0, 512 }
  0x15   :  { %p4534_p8 = scmp.ne.s32.totalorder %s6447_s0, %s4533_s15  ;;  %p4537_p9 = scmp.lt.u32.totalorder %s4533_s15, %s6447_s0 }
  0x17   :  { %p4539_p10 = pnand %p4537_p9, %p4534_p8 }
  0x19   :  { %4542 = shalt.err (!%p4539_p10)
}
  0x1a   :  { %s4543_s20 = scalar_lea.vmem %s4658_s24, 512  ;;  %p4548_p12 = scmp.lt.s32.totalorder %s4658_s24, %s4658_s24 }
  0x1b   :  { %p4544_p11 = scmp.ne.s32.totalorder %s4658_s24, %s4543_s20  ;;  %p4549_p13 = scmp.lt.s32.totalorder %s4543_s20, %s4543_s20 }
  0x1d   :  { %p4550_p0 = por %p4549_p13, %p4548_p12 }
  0x1f   :  { %p4551_p1 = pnand %p4550_p0, %p4544_p11 }
  0x21   :  { %4554 = shalt.err (!%p4551_p1)
}
  0x22   :  { %25 = dma.hbm_to_vmem [thread:$0]  %s6447_s0, 512, %s4658_s24, [#allocation3], %s4615_s9, %s4615_s9, %s4616_s10  }
  0x23   :  { %s4617_s22 = smov [#allocation7]   ;;  %s4555_s27 = scalar_lea.hbm %s6449_s2, 8192 }
  0x24   :  { %s43_s23 = sshll.u32 %s4617_s22, 4  ;;  %p4556_p2 = scmp.ne.s32.totalorder %s6449_s2, %s4555_s27  ;;  %s44_s23 = int_to_ptr.vmem [resolvable:$true] %s43_s23 }
  0x25   :  { %p4559_p3 = scmp.lt.u32.totalorder %s4555_s27, %s6449_s2 }
  0x27   :  { %p4561_p4 = pnand %p4559_p3, %p4556_p2 }
  0x29   :  { %4564 = shalt.err (!%p4561_p4)
}
  0x2a   :  { %s4565_s8 = scalar_lea.vmem %s44_s23, 8192  ;;  %p4570_p6 = scmp.lt.s32.totalorder %s44_s23, %s44_s23 }
  0x2b   :  { %p4566_p5 = scmp.ne.s32.totalorder %s44_s23, %s4565_s8  ;;  %p4571_p7 = scmp.lt.s32.totalorder %s4565_s8, %s4565_s8 }
  0x2d   :  { %p4572_p8 = por %p4571_p7, %p4570_p6 }
  0x2f   :  { %p4573_p9 = pnand %p4572_p8, %p4566_p5 }
  0x31   :  { %4576 = shalt.err (!%p4573_p9)
}
  0x32   :  { %s4618_s0 = smov 64   ;;  %s4619_s24 = smov 4  }
  0x33   :  { %49 = dma.hbm_to_vmem [thread:$0]  %s6449_s2, 8192, %s44_s23, [#allocation6], %s4618_s0, %s4618_s0, %s4619_s24  }
  0x34   :  { %4603 = dma.done.wait [#allocation3], 512  }
  0x35   :  { %4604 = vsyncadd [#allocation3], 4294966784 }
  0x36   :  { %4605 = dma.done.wait [#allocation6], 16384  }
  0x37   :  { %4606 = vsyncadd [#allocation6], 4294950912  ;;  %s4707_s13 = smov 0  }
  0x38 LB: > { %v4620_v0 = vmov 0   ;;  %s3905_s14 = sshll.u32 %s4611_s13, 7  ;;  %v107_v3 = vlaneseq  ;;  %v4621_v4 = vmov 1966171168   ;;  %s3904_s15 = sshll.u32 %s4611_s13, 3  ;;  %vm3027_vm0 = vcmask 130112   ;;  %s4611_s13 = sphi %s4707_s13, %s71_s13  }
  0x39   : > { %778 = vmatprep.subr.bf16.mxu0 %v4620_v0  ;;  %3907 = vmatprep.subr.bf16.mxu1 %v4620_v0  ;;  %s4719_s2 = scalar_lea.vmem [#allocation7], %s3905_s14  ;;  %v105_v5 = vunpack.c.l.s4 %v4621_v4  ;;  %s74_s16 = scalar_lea.vmem [#allocation2], %s3904_s15  ;;  %vm3034_vm1 = vcmask 195712   ;;  %vm3041_vm2 = vcmask 261312   ;;  %vm3048_vm3 = vcmask 326912  }
  0x3a   : > { %3957 = vset.pattern.permute.xlu1 %v4620_v0  ;;  %3958 = vset.pattern.permute.xlu0 %v4620_v0  ;;  %v3959_v1 = vld [vmem:[%s4719_s2] sm:$0xff]   ;;  %v3960_v2 = vld [vmem:[%s4719_s2 + $0x8] sm:$0xff]   ;;  %v3961_v6 = vld [vmem:[%s4719_s2 + $0x10] sm:$0xff]   ;;  %v4729_v7 = vshrl.u32 %v107_v3, 7  ;;  %s4747_s17 = scalar_lea.vmem [#allocation5], %s3905_s14  ;;  %s1981_s20 = scalar_lea.vmem %s6452_s5, %s4611_s13  ;;  %vm3055_vm4 = vcmask 392512  }
  0x3b   : > { %779 = vmatpush1.bf16.msra.mxu0 %v3959_v1  ;;  %3923 = vmatpush1.bf16.msra.mxu1 %v3959_v1  ;;  %v106_v8 = vunpack.c.0.s8 %v105_v5  ;;  %v3962_v9 = vld [vmem:[%s4719_s2 + $0x18] sm:$0xff]   ;;  %v3963_v11 = vld [vmem:[%s4719_s2 + $0x20] sm:$0xff]   ;;  %v3964_v15 = vld [vmem:[%s4719_s2 + $0x28] sm:$0xff]   ;;  %s1387_s22 = scalar_lea.vmem %s6450_s3, %s4611_s13  ;;  %s1524_s26 = scalar_lea.vmem %s6451_s4, %s4611_s13  ;;  %vm3062_vm5 = vcmask 458112   ;;  %vm3069_vm6 = vcmask 523712   ;;  %vm3076_vm7 = vcmask 589312  }
  0x3c   : > { %780 = vmatprep.subr.bf16.mxu0 %v4620_v0  ;;  %3908 = vmatprep.subr.bf16.mxu1 %v4620_v0  ;;  %v4743_v12 = vld.sshfl [vmem:[%s74_s16] sm:$0xff pattern:$0x75316420]  ;;  %v4754_v14 = vsub.s32 1, %v4729_v7  ;;  %v3965_v20 = vld [vmem:[%s4719_s2 + $0x30] sm:$0xff]   ;;  %v4770_v21 = vsub.s32 0, %v4729_v7 }
  0x3d   : > { %v4736_v10 = vsub.s32 %v106_v8, %v4729_v7  ;;  %v4775_v23 = vld [vmem:[%s4747_s17 + $0x4] ss:$8 sps:$4 sm:$0xff]   ;;  %v3966_v27 = vld [vmem:[%s4719_s2 + $0x38] sm:$0xff]   ;;  %v3969_v35 = vld [vmem:[%s4719_s2 + $0x50] sm:$0xff]   ;;  %v103_v53 = vcombine.high %v4743_v12, %v4743_v12  ;;  %vm3083_vm8 = vcmask 654912   ;;  %vm3090_vm9 = vcmask 720512  }
  0x3e   : > { %v3967_v32 = vld [vmem:[%s4719_s2 + $0x40] sm:$0xff]   ;;  %v3968_v34 = vld [vmem:[%s4719_s2 + $0x48] sm:$0xff]   ;;  %v3970_v36 = vld [vmem:[%s4719_s2 + $0x58] sm:$0xff]   ;;  %vm3097_vm10 = vcmask 786112   ;;  %vm3104_vm11 = vcmask 851712   ;;  %vm3111_vm12 = vcmask 917312  }
  0x3f   : > { %781 = vmatpush1.bf16.msra.mxu0 %v3960_v2  ;;  %3924 = vmatpush1.bf16.msra.mxu1 %v3960_v2  ;;  %v4751_v13 = vrot.slane %v4743_v12, %v4736_v10  ;;  %v3971_v39 = vld [vmem:[%s4719_s2 + $0x60] sm:$0xff]   ;;  %v3972_v42 = vld [vmem:[%s4719_s2 + $0x68] sm:$0xff]   ;;  %v3973_v46 = vld [vmem:[%s4719_s2 + $0x70] sm:$0xff]   ;;  %v4856_v62 = vrot.slane %v103_v53, %v4736_v10  ;;  %vm3118_vm13 = vcmask 982912   ;;  %vm3125_vm14 = vcmask 1048512   ;;  %s3696_s27 = scalar_lea.vmem [#allocation8], %s3904_s15 }
  0x40   : > { %782 = vmatprep.subr.bf16.mxu0 %v4620_v0  ;;  %3909 = vmatprep.subr.bf16.mxu1 %v4620_v0  ;;  %v4814_v43 = vld [vmem:[%s4747_s17] ss:$8 sps:$4 sm:$0xff]   ;;  %v4824_v47 = vld [vmem:[%s4747_s17 + $0x14] ss:$8 sps:$4 sm:$0xff]   ;;  %v4844_v56 = vld [vmem:[%s4747_s17 + $0x10] ss:$8 sps:$4 sm:$0xff]  }
  0x41   : > { %v3737_v16 = vpack.i.b16 %v4751_v13, %v4751_v13  ;;  %v4763_v17 = vcombine.high %v4751_v13, %v4751_v13  ;;  %v3974_v50 = vld [vmem:[%s4719_s2 + $0x78] sm:$0xff]   ;;  %v4849_v59 = vld [vmem:[%s4747_s17 + $0x24] ss:$8 sps:$4 sm:$0xff]   ;;  %v4865_v5 = vld [vmem:[%s4747_s17 + $0x20] ss:$8 sps:$4 sm:$0xff]   ;;  %vm3680_vm15 = vcmask 1041409  }
  0x42   : > { %s71_s13 = sadd.s32 1, %s4611_s13  }
  0x43   : > { %783 = vmatpush1.bf16.msra.mxu0 %v3961_v6  ;;  %3925 = vmatpush1.bf16.msra.mxu1 %v3961_v6  ;;  %v143_v18 = vrot.slane %v3737_v16, %v4754_v14  ;;  %v3739_v19 = vpack.i.b16 %v4763_v17, %v4763_v17  ;;  %v139_v37 = vrot.slane %v3737_v16, %v4770_v21  ;;  %p68_p10 = scmp.ge.s32.totalorder %s71_s13, 4  }
  0x44   : > { %784 = vmatprep.subr.bf16.mxu0 %v4620_v0  ;;  %3910 = vmatprep.subr.bf16.mxu1 %v4620_v0  ;;  %s4622_s28 = smov (%p68_p10), [#allocation8]  }
  0x45   : > { %v208_v22 = vpack.i.b16 %v143_v18, %v143_v18  ;;  %v175_v24 = vrot.slane %v3739_v19, %v4754_v14  ;;  %v171_v38 = vrot.slane %v3739_v19, %v4770_v21  ;;  %v201_v40 = vpack.i.b16 %v139_v37, %v139_v37  ;;  %v4883_v19 = vld [vmem:[%s4747_s17 + $0x30] ss:$8 sps:$4 sm:$0xff]   ;;  %s3703_s29 = sshll.u32 (%p68_p10), %s4622_s28, 4  ;;  %s3704_s29 = int_to_ptr.vmem [resolvable:$true] %s3703_s29 }
  0x46   :  { %s4577_s30 = scalar_lea.vmem (%p68_p10), %s3704_s29, 512  ;;  %p4582_p12 = scmp.lt.s32.totalorder (%p68_p10), %s3704_s29, %s3704_s29 }
  0x47   : > { %785 = vmatpush1.bf16.msra.mxu0 %v3962_v9  ;;  %3926 = vmatpush1.bf16.msra.mxu1 %v3962_v9  ;;  %v4779_v25 = vrot.slane %v208_v22, %v4770_v21  ;;  %v264_v26 = vpack.i.b16 %v175_v24, %v175_v24  ;;  %v257_v41 = vpack.i.b16 %v171_v38, %v171_v38  ;;  %v4870_v9 = vld [vmem:[%s4747_s17 + $0x34] ss:$8 sps:$4 sm:$0xff]   ;;  %v4888_v24 = vld [vmem:[%s4747_s17 + $0x44] ss:$8 sps:$4 sm:$0xff]   ;;  %p4578_p11 = scmp.ne.s32.totalorder (%p68_p10), %s3704_s29, %s4577_s30  ;;  %p4583_p13 = scmp.lt.s32.totalorder (%p68_p10), %s4577_s30, %s4577_s30 }
  0x48   : > { %786 = vmatprep.subr.bf16.mxu0 %v4620_v0  ;;  %3911 = vmatprep.subr.bf16.mxu1 %v4620_v0  ;;  %v4817_v44 = vrot.slane %v201_v40, %v4770_v21 }
  0x49   : > { %v393_v28 = vadd.bf16 %v4775_v23, %v4779_v25  ;;  %v4787_v29 = vrot.slane %v264_v26, %v4770_v21  ;;  %v4820_v45 = vrot.slane %v257_v41, %v4770_v21  ;;  %v395_v51 = vadd.bf16 %v4824_v47, %v4779_v25  ;;  %p4584_p0 = por (%p68_p10), %p4583_p13, %p4582_p12 }
  0x4a   : > { %v392_v48 = vadd.bf16 %v4814_v43, %v4817_v44  ;;  %v394_v60 = vadd.bf16 %v4844_v56, %v4817_v44  ;;  %v397_v63 = vadd.bf16 %v4849_v59, %v4779_v25  ;;  %v396_v10 = vadd.bf16 %v4865_v5, %v4817_v44 }
  0x4b   : > { %787 = vmatpush1.bf16.msra.mxu0 %v3963_v11  ;;  %3927 = vmatpush1.bf16.msra.mxu1 %v3963_v11  ;;  %v521_v30 = vmax.bf16 %v4620_v0, %v393_v28  ;;  %v457_v31 = vadd.bf16 %v4775_v23, %v4787_v29  ;;  %v456_v49 = vadd.bf16 %v4814_v43, %v4820_v45  ;;  %p4585_p1 = pnand (%p68_p10), %p4584_p0, %p4578_p11 }
  0x4c   : > { %788 = vmatprep.subr.bf16.mxu0 %v4620_v0  ;;  %3912 = vmatprep.subr.bf16.mxu1 %v4620_v0  ;;  %v459_v52 = vadd.bf16 %v4824_v47, %v4787_v29  ;;  %v520_v54 = vmax.bf16 %v4620_v0, %v392_v48  ;;  %v523_v57 = vmax.bf16 %v4620_v0, %v395_v51  ;;  %v121_v48 = vunpack.i.h.s16 %v4751_v13 }
  0x4d   : > { %v585_v33 = vmax.bf16 %v4620_v0, %v457_v31  ;;  %810 = vmatprep.mubr.bf16.mxu0 %v521_v30  ;;  %v584_v55 = vmax.bf16 %v4620_v0, %v456_v49  ;;  %v458_v61 = vadd.bf16 %v4844_v56, %v4820_v45  ;;  %v461_v1 = vadd.bf16 %v4849_v59, %v4787_v29 }
  0x4e   : > { %v587_v58 = vmax.bf16 %v4620_v0, %v459_v52  ;;  %v522_v2 = vmax.bf16 %v4620_v0, %v394_v60  ;;  %v525_v6 = vmax.bf16 %v4620_v0, %v397_v63  ;;  %v460_v11 = vadd.bf16 %v4865_v5, %v4820_v45  ;;  %v4926_v52 = vld [vmem:[%s4747_s17 + $0x64] ss:$8 sps:$4 sm:$0xff]  }
  0x4f   : > { %789 = vmatpush1.bf16.msra.mxu0 %v3964_v15  ;;  %3928 = vmatpush1.bf16.msra.mxu1 %v3964_v15  ;;  %v586_v4 = vmax.bf16 %v4620_v0, %v458_v61  ;;  %v589_v8 = vmax.bf16 %v4620_v0, %v461_v1  ;;  %v399_v12 = vadd.bf16 %v4870_v9, %v4779_v25  ;;  %v125_v49 = vunpack.i.h.s16 %v4763_v17  ;;  %v4939_v61 = vld [vmem:[%s4747_s17 + $0x60] ss:$8 sps:$4 sm:$0xff]  }
  0x50   : > { %790 = vmatprep.subr.bf16.mxu0 %v4620_v0  ;;  %3913 = vmatprep.subr.bf16.mxu1 %v4620_v0  ;;  %v463_v15 = vadd.bf16 %v4870_v9, %v4787_v29  ;;  %v524_v16 = vmax.bf16 %v4620_v0, %v396_v10  ;;  %v588_v18 = vmax.bf16 %v4620_v0, %v460_v11 }
  0x51   : > { %1066 = vmatprep.mubr.bf16.mxu1 %v585_v33  ;;  %v398_v26 = vadd.bf16 %v4883_v19, %v4817_v44  ;;  %v401_v28 = vadd.bf16 %v4888_v24, %v4779_v25  ;;  %v465_v30 = vadd.bf16 %v4888_v24, %v4787_v29  ;;  %v4901_v33 = vld [vmem:[%s4747_s17 + $0x40] ss:$8 sps:$4 sm:$0xff]   ;;  %v405_v13 = vadd.bf16 %v4926_v52, %v4779_v25 }
  0x52   : > { %v591_v22 = vmax.bf16 %v4620_v0, %v463_v15  ;;  %v400_v37 = vadd.bf16 %v4901_v33, %v4817_v44  ;;  %v464_v38 = vadd.bf16 %v4901_v33, %v4820_v45  ;;  %v469_v17 = vadd.bf16 %v4926_v52, %v4787_v29 }
  0x53   : > { %791 = vmatpush1.bf16.msra.mxu0 %v3965_v20  ;;  %3929 = vmatpush1.bf16.msra.mxu1 %v3965_v20  ;;  %v527_v20 = vmax.bf16 %v4620_v0, %v399_v12  ;;  %v526_v31 = vmax.bf16 %v4620_v0, %v398_v26  ;;  %v533_v1 = vmax.bf16 %v4620_v0, %v405_v13  ;;  %v4960_v26 = vld [vmem:[%s4747_s17 + $0x70] ss:$8 sps:$4 sm:$0xff]  }
  0x54   : > { %792 = vmatprep.subr.bf16.mxu0 %v4620_v0  ;;  %3914 = vmatprep.subr.bf16.mxu1 %v4620_v0  ;;  %v528_v41 = vmax.bf16 %v4620_v0, %v400_v37  ;;  %v468_v10 = vadd.bf16 %v4939_v61, %v4820_v45 }
  0x57   : > { %793 = vmatpush1.bf16.msra.mxu0 %v3966_v27  ;;  %3930 = vmatpush1.bf16.msra.mxu1 %v3966_v27  ;;  %v462_v27 = vadd.bf16 %v4883_v19, %v4820_v45 }
  0x58   : > { %794 = vmatprep.subr.bf16.mxu0 %v4620_v0  ;;  %3915 = vmatprep.subr.bf16.mxu1 %v4620_v0 }
  0x5b   : > { %795 = vmatpush1.bf16.msra.mxu0 %v3967_v32  ;;  %3931 = vmatpush1.bf16.msra.mxu1 %v3967_v32  ;;  %v590_v32 = vmax.bf16 %v4620_v0, %v462_v27 }
  0x5c   : > { %796 = vmatprep.subr.bf16.mxu0 %v4620_v0  ;;  %3916 = vmatprep.subr.bf16.mxu1 %v4620_v0 }
  0x5f   : > { %797 = vmatpush1.bf16.msra.mxu0 %v3968_v34  ;;  %3932 = vmatpush1.bf16.msra.mxu1 %v3968_v34  ;;  %v529_v34 = vmax.bf16 %v4620_v0, %v401_v28 }
  0x60   : > { %798 = vmatprep.subr.bf16.mxu0 %v4620_v0  ;;  %3917 = vmatprep.subr.bf16.mxu1 %v4620_v0 }
  0x63   : > { %799 = vmatpush1.bf16.msra.mxu0 %v3969_v35  ;;  %3933 = vmatpush1.bf16.msra.mxu1 %v3969_v35  ;;  %v593_v35 = vmax.bf16 %v4620_v0, %v465_v30 }
  0x64   : > { %800 = vmatprep.subr.bf16.mxu0 %v4620_v0  ;;  %3918 = vmatprep.subr.bf16.mxu1 %v4620_v0 }
  0x67   : > { %801 = vmatpush1.bf16.msra.mxu0 %v3970_v36  ;;  %3934 = vmatpush1.bf16.msra.mxu1 %v3970_v36  ;;  %v4906_v36 = vld [vmem:[%s4747_s17 + $0x54] ss:$8 sps:$4 sm:$0xff]  }
  0x68   : > { %802 = vmatprep.subr.bf16.mxu0 %v4620_v0  ;;  %3919 = vmatprep.subr.bf16.mxu1 %v4620_v0  ;;  %v467_v40 = vadd.bf16 %v4906_v36, %v4787_v29 }
  0x6a   : > { %v595_v51 = vmax.bf16 %v4620_v0, %v467_v40 }
  0x6b   : > { %803 = vmatpush1.bf16.msra.mxu0 %v3971_v39  ;;  %3935 = vmatpush1.bf16.msra.mxu1 %v3971_v39  ;;  %v403_v39 = vadd.bf16 %v4906_v36, %v4779_v25 }
  0x6c   : > { %804 = vmatprep.subr.bf16.mxu0 %v4620_v0  ;;  %3920 = vmatprep.subr.bf16.mxu1 %v4620_v0 }
  0x6f   : > { %805 = vmatpush1.bf16.msra.mxu0 %v3972_v42  ;;  %3936 = vmatpush1.bf16.msra.mxu1 %v3972_v42  ;;  %v592_v42 = vmax.bf16 %v4620_v0, %v464_v38 }
  0x70   : > { %806 = vmatprep.subr.bf16.mxu0 %v4620_v0  ;;  %3921 = vmatprep.subr.bf16.mxu1 %v4620_v0 }
  0x73   : > { %807 = vmatpush1.bf16.msra.mxu0 %v3973_v46  ;;  %3937 = vmatpush1.bf16.msra.mxu1 %v3973_v46  ;;  %v4919_v46 = vld [vmem:[%s4747_s17 + $0x50] ss:$8 sps:$4 sm:$0xff]  }
  0x74   : > { %808 = vmatprep.subr.bf16.mxu0 %v4620_v0  ;;  %3922 = vmatprep.subr.bf16.mxu1 %v4620_v0  ;;  %v402_v53 = vadd.bf16 %v4919_v46, %v4817_v44 }
  0x77   : > { %809 = vmatpush1.bf16.msra.mxu0 %v3974_v50  ;;  %3938 = vmatpush1.bf16.msra.mxu1 %v3974_v50  ;;  %v531_v50 = vmax.bf16 %v4620_v0, %v403_v39 }
  0x7a   : > { %811 = vmatmul.mubr.bf16.vlgmr.msra.gmra.mrb[0].mxu0 %v520_v54  ;;  %1067 = vmatmul.mubr.bf16.vlgmr.msra.gmra.mrb[0].mxu1 %v584_v55  ;;  %v466_v54 = vadd.bf16 %v4919_v46, %v4820_v45  ;;  %v129_v55 = vpack.i.b16 %v121_v48, %v121_v48 }
  0x7b   : > { %818 = vmatprep.mubr.bf16.mxu0 %v523_v57  ;;  %1074 = vmatprep.mubr.bf16.mxu1 %v587_v58  ;;  %v133_v57 = vpack.i.b16 %v125_v49, %v125_v49  ;;  %v530_v58 = vmax.bf16 %v4620_v0, %v402_v53  ;;  %v3774_v53 = vld [vmem:[%s1981_s20] ss:$0 sm:$0xff] }
  0x7c   : > { %v594_v60 = vmax.bf16 %v4620_v0, %v466_v54  ;;  %v151_v63 = vrot.slane %v129_v55, %v4754_v14  ;;  %1989 = vperm.xlu1 %3957, %v3774_v53  }
  0x7d   : > { %v179_v27 = vrot.slane %v133_v57, %v4770_v21 }
  0x7e   : > { %v222_v11 = vpack.i.b16 %v151_v63, %v151_v63 }
  0x82   : > { %819 = vmatmul.mubr.bf16.gmra.mrb[4].mxu0 %v522_v2  ;;  %1075 = vmatmul.mubr.bf16.gmra.mrb[4].mxu1 %v586_v4  ;;  %v597_v2 = vmax.bf16 %v4620_v0, %v469_v17  ;;  %v4945_v4 = vld [vmem:[%s4747_s17 + $0x74] ss:$8 sps:$4 sm:$0xff]  }
  0x83   : > { %826 = vmatprep.mubr.bf16.mxu0 %v525_v6  ;;  %1082 = vmatprep.mubr.bf16.mxu1 %v589_v8  ;;  %v183_v6 = vrot.slane %v133_v57, %v4754_v14  ;;  %v404_v8 = vadd.bf16 %v4939_v61, %v4817_v44  ;;  %v407_v12 = vadd.bf16 %v4945_v4, %v4779_v25 }
  0x84   : > { %v471_v15 = vadd.bf16 %v4945_v4, %v4787_v29  ;;  %v4966_v25 = vrot.slane %v222_v11, %v4770_v21 }
  0x85   : > { %v535_v28 = vmax.bf16 %v4620_v0, %v407_v12 }
  0x86   : > { %v599_v30 = vmax.bf16 %v4620_v0, %v471_v15  ;;  %v409_v37 = vadd.bf16 %v4775_v23, %v4966_v25  ;;  %v415_v12 = vadd.bf16 %v4870_v9, %v4966_v25 }
  0x8a   : > { %827 = vmatmul.mubr.bf16.gmra.mrb[8].mxu0 %v524_v16  ;;  %1083 = vmatmul.mubr.bf16.gmra.mrb[8].mxu1 %v588_v18  ;;  %v278_v16 = vpack.i.b16 %v183_v6, %v183_v6  ;;  %v147_v18 = vrot.slane %v129_v55, %v4770_v21 }
  0x8b   : > { %834 = vmatprep.mubr.bf16.mxu0 %v527_v20  ;;  %1090 = vmatprep.mubr.bf16.mxu1 %v591_v22  ;;  %v532_v20 = vmax.bf16 %v4620_v0, %v404_v8  ;;  %v596_v22 = vmax.bf16 %v4620_v0, %v468_v10 }
  0x8c   : > { %v4969_v29 = vrot.slane %v278_v16, %v4770_v21 }
  0x8e   : > { %v473_v38 = vadd.bf16 %v4775_v23, %v4969_v29  ;;  %v477_v63 = vadd.bf16 %v4849_v59, %v4969_v29  ;;  %v479_v15 = vadd.bf16 %v4870_v9, %v4969_v29 }
  0x90   : > { %v605_v8 = vmax.bf16 %v4620_v0, %v477_v63 }
  0x92   : > { %835 = vmatmul.mubr.bf16.gmra.mrb[12].mxu0 %v526_v31  ;;  %1091 = vmatmul.mubr.bf16.gmra.mrb[12].mxu1 %v590_v32  ;;  %v215_v31 = vpack.i.b16 %v147_v18, %v147_v18  ;;  %v406_v32 = vadd.bf16 %v4960_v26, %v4817_v44 }
  0x93   : > { %842 = vmatprep.mubr.bf16.mxu0 %v529_v34  ;;  %1098 = vmatprep.mubr.bf16.mxu1 %v593_v35  ;;  %v470_v34 = vadd.bf16 %v4960_v26, %v4820_v45  ;;  %v271_v35 = vpack.i.b16 %v179_v27, %v179_v27  ;;  %v537_v45 = vmax.bf16 %v4620_v0, %v409_v37 }
  0x94   : > { %v534_v39 = vmax.bf16 %v4620_v0, %v406_v32 }
  0x95   : > { %v598_v40 = vmax.bf16 %v4620_v0, %v470_v34  ;;  %v4985_v44 = vrot.slane %v271_v35, %v4770_v21 }
  0x97   : > { %v472_v49 = vadd.bf16 %v4814_v43, %v4985_v44  ;;  %v476_v11 = vadd.bf16 %v4865_v5, %v4985_v44 }
  0x99   : > { %v600_v55 = vmax.bf16 %v4620_v0, %v472_v49  ;;  %v604_v18 = vmax.bf16 %v4620_v0, %v476_v11  ;;  %v423_v11 = vadd.bf16 %v4945_v4, %v4966_v25 }
  0x9a   : > { %843 = vmatmul.mubr.bf16.gmra.mrb[16].mxu0 %v528_v41  ;;  %1099 = vmatmul.mubr.bf16.gmra.mrb[16].mxu1 %v592_v42  ;;  %v4982_v41 = vrot.slane %v215_v31, %v4770_v21  ;;  %v601_v42 = vmax.bf16 %v4620_v0, %v473_v38  ;;  %v481_v31 = vadd.bf16 %v4888_v24, %v4969_v29 }
  0x9b   : > { %850 = vmatprep.mubr.bf16.mxu0 %v531_v50  ;;  %1106 = vmatprep.mubr.bf16.mxu1 %v595_v51  ;;  %v411_v50 = vadd.bf16 %v4824_v47, %v4966_v25  ;;  %v475_v51 = vadd.bf16 %v4824_v47, %v4969_v29 }
  0x9c   : > { %v408_v48 = vadd.bf16 %v4814_v43, %v4982_v41  ;;  %v410_v57 = vadd.bf16 %v4844_v56, %v4982_v41  ;;  %v412_v10 = vadd.bf16 %v4865_v5, %v4982_v41  ;;  %v414_v27 = vadd.bf16 %v4883_v19, %v4982_v41 }
  0x9d   : > { %v539_v13 = vmax.bf16 %v4620_v0, %v411_v50  ;;  %v603_v17 = vmax.bf16 %v4620_v0, %v475_v51  ;;  %v609_v37 = vmax.bf16 %v4620_v0, %v481_v31  ;;  %v416_v38 = vadd.bf16 %v4901_v33, %v4982_v41 }
  0x9e   : > { %v536_v54 = vmax.bf16 %v4620_v0, %v408_v48  ;;  %v540_v16 = vmax.bf16 %v4620_v0, %v412_v10  ;;  %v542_v32 = vmax.bf16 %v4620_v0, %v414_v27  ;;  %v5055_v51 = vcombine.high %v4856_v62, %v4856_v62 }
  0x9f   : > { %v418_v53 = vadd.bf16 %v4919_v46, %v4982_v41  ;;  %v484_v10 = vadd.bf16 %v4939_v61, %v4985_v44 }
  0xa2   : > { %851 = vmatmul.mubr.bf16.gmra.mrb[20].mxu0 %v530_v58  ;;  %1107 = vmatmul.mubr.bf16.gmra.mrb[20].mxu1 %v594_v60  ;;  %v474_v58 = vadd.bf16 %v4844_v56, %v4985_v44  ;;  %v413_v60 = vadd.bf16 %v4849_v59, %v4966_v25 }
  0xa3   : > { %858 = vmatprep.mubr.bf16.mxu0 %v533_v1  ;;  %1114 = vmatprep.mubr.bf16.mxu1 %v597_v2  ;;  %v538_v1 = vmax.bf16 %v4620_v0, %v410_v57  ;;  %v3740_v57 = vpack.i.b16 %v5055_v51, %v5055_v51 }
  0xa4   : > { %v602_v2 = vmax.bf16 %v4620_v0, %v474_v58  ;;  %v541_v6 = vmax.bf16 %v4620_v0, %v413_v60  ;;  %v546_v58 = vmax.bf16 %v4620_v0, %v418_v53 }
  0xa5   : > { %v187_v27 = vrot.slane %v3740_v57, %v4770_v21 }
  0xaa   : > { %859 = vmatmul.mubr.bf16.gmra.mrb[24].mxu0 %v532_v20  ;;  %1115 = vmatmul.mubr.bf16.gmra.mrb[24].mxu1 %v596_v22  ;;  %v543_v20 = vmax.bf16 %v4620_v0, %v415_v12  ;;  %v607_v22 = vmax.bf16 %v4620_v0, %v479_v15  ;;  %v487_v12 = vadd.bf16 %v4945_v4, %v4969_v29 }
  0xab   : > { %866 = vmatprep.mubr.bf16.mxu0 %v535_v28  ;;  %1122 = vmatprep.mubr.bf16.mxu1 %v599_v30  ;;  %v478_v28 = vadd.bf16 %v4883_v19, %v4985_v44  ;;  %v417_v30 = vadd.bf16 %v4888_v24, %v4966_v25 }
  0xad   : > { %v606_v34 = vmax.bf16 %v4620_v0, %v478_v28  ;;  %v545_v35 = vmax.bf16 %v4620_v0, %v417_v30  ;;  %v551_v28 = vmax.bf16 %v4620_v0, %v423_v11  ;;  %v615_v30 = vmax.bf16 %v4620_v0, %v487_v12 }
  0xb2   : > { %867 = vmatmul.mubr.bf16.gmra.mrb[28].mxu0 %v534_v39  ;;  %1123 = vmatmul.mubr.bf16.gmra.mrb[28].mxu1 %v598_v40  ;;  %v480_v39 = vadd.bf16 %v4901_v33, %v4985_v44  ;;  %v419_v40 = vadd.bf16 %v4906_v36, %v4966_v25 }
  0xb3   : > { %874 = vmatprep.mubr.bf16.mxu0 %v537_v45  ;;  %1130 = vmatprep.mubr.bf16.mxu1 %v601_v42  ;;  %v483_v45 = vadd.bf16 %v4906_v36, %v4969_v29  ;;  %v544_v42 = vmax.bf16 %v4620_v0, %v416_v38 }
  0xb4   : > { %v608_v48 = vmax.bf16 %v4620_v0, %v480_v39  ;;  %v547_v49 = vmax.bf16 %v4620_v0, %v419_v40 }
  0xb5   : > { %v611_v50 = vmax.bf16 %v4620_v0, %v483_v45 }
  0xba   : > { %875 = vmatmul.mubr.bf16.gmra.mrb[32].mxu0 %v536_v54  ;;  %1131 = vmatmul.mubr.bf16.gmra.mrb[32].mxu1 %v600_v55  ;;  %v482_v54 = vadd.bf16 %v4919_v46, %v4985_v44  ;;  %v421_v55 = vadd.bf16 %v4926_v52, %v4966_v25 }
  0xbb   : > { %882 = vmatprep.mubr.bf16.mxu0 %v539_v13  ;;  %1138 = vmatprep.mubr.bf16.mxu1 %v603_v17  ;;  %v485_v13 = vadd.bf16 %v4926_v52, %v4969_v29  ;;  %v3738_v17 = vpack.i.b16 %v4856_v62, %v4856_v62  ;;  %v422_v29 = vadd.bf16 %v4960_v26, %v4982_v41 }
  0xbc   : > { %v610_v60 = vmax.bf16 %v4620_v0, %v482_v54  ;;  %v549_v63 = vmax.bf16 %v4620_v0, %v421_v55 }
  0xbd   : > { %v550_v39 = vmax.bf16 %v4620_v0, %v422_v29 }
  0xc2   : > { %883 = vmatmul.mubr.bf16.gmra.mrb[36].mxu0 %v538_v1  ;;  %1139 = vmatmul.mubr.bf16.gmra.mrb[36].mxu1 %v602_v2  ;;  %v613_v1 = vmax.bf16 %v4620_v0, %v485_v13  ;;  %v159_v2 = vrot.slane %v3738_v17, %v4754_v14 }
  0xc3   : > { %890 = vmatprep.mubr.bf16.mxu0 %v541_v6  ;;  %1146 = vmatprep.mubr.bf16.mxu1 %v605_v8  ;;  %v191_v6 = vrot.slane %v3740_v57, %v4754_v14  ;;  %v420_v8 = vadd.bf16 %v4939_v61, %v4982_v41 }
  0xc4   : > { %v236_v15 = vpack.i.b16 %v159_v2, %v159_v2 }
  0xc6   : > { %v5090_v25 = vrot.slane %v236_v15, %v4770_v21 }
  0xc8   : > { %v431_v12 = vadd.bf16 %v4870_v9, %v5090_v25 }
  0xca   : > { %891 = vmatmul.mubr.bf16.gmra.mrb[40].mxu0 %v540_v16  ;;  %1147 = vmatmul.mubr.bf16.gmra.mrb[40].mxu1 %v604_v18  ;;  %v292_v16 = vpack.i.b16 %v191_v6, %v191_v6  ;;  %v548_v18 = vmax.bf16 %v4620_v0, %v420_v8 }
  0xcb   : > { %898 = vmatprep.mubr.bf16.mxu0 %v543_v20  ;;  %1154 = vmatprep.mubr.bf16.mxu1 %v607_v22  ;;  %v612_v20 = vmax.bf16 %v4620_v0, %v484_v10  ;;  %v155_v22 = vrot.slane %v3738_v17, %v4770_v21 }
  0xcc   : > { %v5093_v31 = vrot.slane %v292_v16, %v4770_v21 }
  0xce   : > { %v489_v38 = vadd.bf16 %v4775_v23, %v5093_v31  ;;  %v491_v53 = vadd.bf16 %v4824_v47, %v5093_v31  ;;  %v495_v15 = vadd.bf16 %v4870_v9, %v5093_v31  ;;  %v497_v29 = vadd.bf16 %v4888_v24, %v5093_v31 }
  0xd0   : > { %v619_v17 = vmax.bf16 %v4620_v0, %v491_v53  ;;  %v123_v53 = vunpack.i.h.s16 %v4856_v62 }
  0xd2   : > { %899 = vmatmul.mubr.bf16.gmra.mrb[44].mxu0 %v542_v32  ;;  %1155 = vmatmul.mubr.bf16.gmra.mrb[44].mxu1 %v606_v34  ;;  %v486_v32 = vadd.bf16 %v4960_v26, %v4985_v44  ;;  %v229_v34 = vpack.i.b16 %v155_v22, %v155_v22  ;;  %v623_v22 = vmax.bf16 %v4620_v0, %v495_v15 }
  0xd3   : > { %906 = vmatprep.mubr.bf16.mxu0 %v545_v35  ;;  %1162 = vmatprep.mubr.bf16.mxu1 %v609_v37  ;;  %v285_v35 = vpack.i.b16 %v187_v27, %v187_v27  ;;  %v425_v37 = vadd.bf16 %v4775_v23, %v5090_v25 }
  0xd4   : > { %v614_v40 = vmax.bf16 %v4620_v0, %v486_v32  ;;  %v5106_v41 = vrot.slane %v229_v34, %v4770_v21 }
  0xd5   : > { %v5109_v45 = vrot.slane %v285_v35, %v4770_v21  ;;  %v553_v44 = vmax.bf16 %v4620_v0, %v425_v37  ;;  %v625_v37 = vmax.bf16 %v4620_v0, %v497_v29 }
  0xd6   : > { %v426_v57 = vadd.bf16 %v4844_v56, %v5106_v41  ;;  %v428_v10 = vadd.bf16 %v4865_v5, %v5106_v41  ;;  %v430_v27 = vadd.bf16 %v4883_v19, %v5106_v41 }
  0xd7   : > { %v492_v11 = vadd.bf16 %v4865_v5, %v5109_v45  ;;  %v502_v29 = vadd.bf16 %v4960_v26, %v5109_v45 }
  0xd8   : > { %v556_v16 = vmax.bf16 %v4620_v0, %v428_v10  ;;  %v558_v32 = vmax.bf16 %v4620_v0, %v430_v27  ;;  %v500_v10 = vadd.bf16 %v4939_v61, %v5109_v45 }
  0xda   : > { %907 = vmatmul.mubr.bf16.gmra.mrb[48].mxu0 %v544_v42  ;;  %1163 = vmatmul.mubr.bf16.gmra.mrb[48].mxu1 %v608_v48  ;;  %v617_v42 = vmax.bf16 %v4620_v0, %v489_v38  ;;  %v424_v48 = vadd.bf16 %v4814_v43, %v5106_v41  ;;  %v432_v38 = vadd.bf16 %v4901_v33, %v5106_v41 }
  0xdb   : > { %914 = vmatprep.mubr.bf16.mxu0 %v547_v49  ;;  %1170 = vmatprep.mubr.bf16.mxu1 %v611_v50  ;;  %v488_v49 = vadd.bf16 %v4814_v43, %v5109_v45  ;;  %v427_v50 = vadd.bf16 %v4824_v47, %v5090_v25 }
  0xdc   : > { %v552_v54 = vmax.bf16 %v4620_v0, %v424_v48 }
  0xdd   : > { %v616_v55 = vmax.bf16 %v4620_v0, %v488_v49  ;;  %v555_v13 = vmax.bf16 %v4620_v0, %v427_v50 }
  0xe2   : > { %915 = vmatmul.mubr.bf16.gmra.mrb[52].mxu0 %v546_v58  ;;  %1171 = vmatmul.mubr.bf16.gmra.mrb[52].mxu1 %v610_v60  ;;  %v490_v58 = vadd.bf16 %v4844_v56, %v5109_v45  ;;  %v429_v60 = vadd.bf16 %v4849_v59, %v5090_v25 }
  0xe3   : > { %922 = vmatprep.mubr.bf16.mxu0 %v549_v63  ;;  %1178 = vmatprep.mubr.bf16.mxu1 %v613_v1  ;;  %v493_v63 = vadd.bf16 %v4849_v59, %v5093_v31  ;;  %v554_v1 = vmax.bf16 %v4620_v0, %v426_v57  ;;  %v501_v57 = vadd.bf16 %v4926_v52, %v5093_v31 }
  0xe4   : > { %v618_v2 = vmax.bf16 %v4620_v0, %v490_v58  ;;  %v557_v6 = vmax.bf16 %v4620_v0, %v429_v60  ;;  %v131_v58 = vpack.i.b16 %v123_v53, %v123_v53 }
  0xe5   : > { %v621_v8 = vmax.bf16 %v4620_v0, %v493_v63 }
  0xea   : > { %923 = vmatmul.mubr.bf16.gmra.mrb[56].mxu0 %v548_v18  ;;  %1179 = vmatmul.mubr.bf16.gmra.mrb[56].mxu1 %v612_v20  ;;  %v620_v18 = vmax.bf16 %v4620_v0, %v492_v11  ;;  %v559_v20 = vmax.bf16 %v4620_v0, %v431_v12  ;;  %v439_v11 = vadd.bf16 %v4945_v4, %v5090_v25 }
  0xeb   : > { %930 = vmatprep.mubr.bf16.mxu0 %v551_v28  ;;  %1186 = vmatprep.mubr.bf16.mxu1 %v615_v30  ;;  %v494_v28 = vadd.bf16 %v4883_v19, %v5109_v45  ;;  %v433_v30 = vadd.bf16 %v4888_v24, %v5090_v25  ;;  %v503_v12 = vadd.bf16 %v4945_v4, %v5093_v31 }
  0xec   : > { %v567_v27 = vmax.bf16 %v4620_v0, %v439_v11  ;;  %v1525_v11 = vld [vmem:[%s1524_s26] sm:$0x1] }
  0xed   : > { %v622_v34 = vmax.bf16 %v4620_v0, %v494_v28  ;;  %v561_v35 = vmax.bf16 %v4620_v0, %v433_v30  ;;  %v631_v28 = vmax.bf16 %v4620_v0, %v503_v12 }
  0xf2   : > { %931 = vmatmul.mubr.bf16.gmra.mrb[60].mxu0 %v550_v39  ;;  %1187 = vmatmul.mubr.bf16.gmra.mrb[60].mxu1 %v614_v40  ;;  %v496_v39 = vadd.bf16 %v4901_v33, %v5109_v45  ;;  %v435_v40 = vadd.bf16 %v4906_v36, %v5090_v25 }
  0xf3   : > { %938 = vmatprep.mubr.bf16.mxu0 %v553_v44  ;;  %1194 = vmatprep.mubr.bf16.mxu1 %v617_v42  ;;  %v499_v44 = vadd.bf16 %v4906_v36, %v5093_v31  ;;  %v560_v42 = vmax.bf16 %v4620_v0, %v432_v38  ;;  %v438_v31 = vadd.bf16 %v4960_v26, %v5106_v41 }
  0xf4   : > { %v624_v48 = vmax.bf16 %v4620_v0, %v496_v39  ;;  %v563_v49 = vmax.bf16 %v4620_v0, %v435_v40  ;;  %v630_v39 = vmax.bf16 %v4620_v0, %v502_v29 }
  0xf5   : > { %v627_v50 = vmax.bf16 %v4620_v0, %v499_v44  ;;  %v566_v38 = vmax.bf16 %v4620_v0, %v438_v31 }
  0xfa   : > { %939 = vmatmul.mubr.bf16.gmra.mrb[64].mxu0 %v552_v54  ;;  %1195 = vmatmul.mubr.bf16.gmra.mrb[64].mxu1 %v616_v55  ;;  %v127_v54 = vunpack.i.h.s16 %v5055_v51  ;;  %v434_v55 = vadd.bf16 %v4919_v46, %v5106_v41 }
  0xfb   : > { %946 = vmatprep.mubr.bf16.mxu0 %v555_v13  ;;  %1202 = vmatprep.mubr.bf16.mxu1 %v619_v17  ;;  %v498_v13 = vadd.bf16 %v4919_v46, %v5109_v45  ;;  %v437_v17 = vadd.bf16 %v4926_v52, %v5090_v25 }
  0xfc   : > { %v135_v62 = vpack.i.b16 %v127_v54, %v127_v54  ;;  %v562_v51 = vmax.bf16 %v4620_v0, %v434_v55 }
  0xfd   : > { %v626_v60 = vmax.bf16 %v4620_v0, %v498_v13  ;;  %v565_v63 = vmax.bf16 %v4620_v0, %v437_v17 }
 0x102   : > { %947 = vmatmul.mubr.bf16.gmra.mrb[68].mxu0 %v554_v1  ;;  %1203 = vmatmul.mubr.bf16.gmra.mrb[68].mxu1 %v618_v2  ;;  %v629_v1 = vmax.bf16 %v4620_v0, %v501_v57  ;;  %v167_v2 = vrot.slane %v131_v58, %v4754_v14 }
 0x103   : > { %954 = vmatprep.mubr.bf16.mxu0 %v557_v6  ;;  %1210 = vmatprep.mubr.bf16.mxu1 %v621_v8  ;;  %v199_v6 = vrot.slane %v135_v62, %v4754_v14  ;;  %v436_v8 = vadd.bf16 %v4939_v61, %v5106_v41 }
 0x104   : > { %v250_v15 = vpack.i.b16 %v167_v2, %v167_v2 }
 0x105   : > { %v564_v14 = vmax.bf16 %v4620_v0, %v436_v8 }
 0x106   : > { %v5204_v25 = vrot.slane %v250_v15, %v4770_v21 }
 0x108   : > { %v449_v15 = vadd.bf16 %v4888_v24, %v5204_v25 }
 0x10a   : > { %955 = vmatmul.mubr.bf16.gmra.mrb[72].mxu0 %v556_v16  ;;  %1211 = vmatmul.mubr.bf16.gmra.mrb[72].mxu1 %v620_v18  ;;  %v306_v16 = vpack.i.b16 %v199_v6, %v199_v6  ;;  %v628_v18 = vmax.bf16 %v4620_v0, %v500_v10  ;;  %v1388_v6 = vld [vmem:[%s1387_s22] sm:$0x1] }
 0x10b   : > { %962 = vmatprep.mubr.bf16.mxu0 %v559_v20  ;;  %1218 = vmatprep.mubr.bf16.mxu1 %v623_v22  ;;  %v163_v20 = vrot.slane %v131_v58, %v4770_v21  ;;  %v195_v22 = vrot.slane %v135_v62, %v4770_v21  ;;  %v1390_v10 = vpack.i.b16 %v1388_v6, %v1388_v6 }
 0x10c   : > { %v5207_v30 = vrot.slane %v306_v16, %v4770_v21 }
 0x10e   : > { %v509_v17 = vadd.bf16 %v4849_v59, %v5207_v30  ;;  %v513_v16 = vadd.bf16 %v4888_v24, %v5207_v30 }
 0x112   : > { %963 = vmatmul.mubr.bf16.gmra.mrb[76].mxu0 %v558_v32  ;;  %1219 = vmatmul.mubr.bf16.gmra.mrb[76].mxu1 %v622_v34  ;;  %v243_v32 = vpack.i.b16 %v163_v20, %v163_v20  ;;  %v299_v34 = vpack.i.b16 %v195_v22, %v195_v22  ;;  %v5280_v22 = vrot.slane %v1390_v10, %v4770_v21 }
 0x113   : > { %970 = vmatprep.mubr.bf16.mxu0 %v561_v35  ;;  %1226 = vmatprep.mubr.bf16.mxu1 %v625_v37  ;;  %v441_v35 = vadd.bf16 %v4775_v23, %v5204_v25  ;;  %v505_v37 = vadd.bf16 %v4775_v23, %v5207_v30 }
 0x114   : > { %v5220_v41 = vrot.slane %v243_v32, %v4770_v21  ;;  %v5223_v40 = vrot.slane %v299_v34, %v4770_v21  ;;  %v577_v34 = vmax.bf16 %v4620_v0, %v449_v15 }
 0x115   : > { %v569_v45 = vmax.bf16 %v4620_v0, %v441_v35  ;;  %v633_v44 = vmax.bf16 %v4620_v0, %v505_v37  ;;  %v641_v35 = vmax.bf16 %v4620_v0, %v513_v16 }
 0x116   : > { %v504_v23 = vadd.bf16 %v4814_v43, %v5223_v40  ;;  %v506_v13 = vadd.bf16 %v4844_v56, %v5223_v40  ;;  %v510_v12 = vadd.bf16 %v4883_v19, %v5223_v40  ;;  %v514_v10 = vadd.bf16 %v4919_v46, %v5223_v40 }
 0x118   : > { %v632_v53 = vmax.bf16 %v4620_v0, %v504_v23  ;;  %v634_v58 = vmax.bf16 %v4620_v0, %v506_v13  ;;  %v448_v23 = vadd.bf16 %v4901_v33, %v5220_v41 }
 0x11a   : > { %971 = vmatmul.mubr.bf16.gmra.mrb[80].mxu0 %v560_v42  ;;  %1227 = vmatmul.mubr.bf16.gmra.mrb[80].mxu1 %v624_v48  ;;  %v440_v42 = vadd.bf16 %v4814_v43, %v5220_v41  ;;  %v443_v48 = vadd.bf16 %v4824_v47, %v5204_v25  ;;  %v442_v43 = vadd.bf16 %v4844_v56, %v5220_v41 }
 0x11b   : > { %978 = vmatprep.mubr.bf16.mxu0 %v563_v49  ;;  %1234 = vmatprep.mubr.bf16.mxu1 %v627_v50  ;;  %v507_v49 = vadd.bf16 %v4824_v47, %v5207_v30  ;;  %v445_v47 = vadd.bf16 %v4849_v59, %v5204_v25  ;;  %v444_v56 = vadd.bf16 %v4865_v5, %v5220_v41 }
 0x11c   : > { %v568_v50 = vmax.bf16 %v4620_v0, %v440_v42  ;;  %v571_v54 = vmax.bf16 %v4620_v0, %v443_v48  ;;  %v570_v57 = vmax.bf16 %v4620_v0, %v442_v43  ;;  %v447_v59 = vadd.bf16 %v4870_v9, %v5204_v25 }
 0x11d   : > { %v635_v55 = vmax.bf16 %v4620_v0, %v507_v49  ;;  %v573_v62 = vmax.bf16 %v4620_v0, %v445_v47  ;;  %v512_v48 = vadd.bf16 %v4901_v33, %v5223_v40  ;;  %v451_v49 = vadd.bf16 %v4906_v36, %v5204_v25 }
 0x122   : > { %979 = vmatmul.mubr.bf16.gmra.mrb[84].mxu0 %v562_v51  ;;  %1235 = vmatmul.mubr.bf16.gmra.mrb[84].mxu1 %v626_v60  ;;  %v637_v51 = vmax.bf16 %v4620_v0, %v509_v17  ;;  %v508_v60 = vadd.bf16 %v4865_v5, %v5223_v40  ;;  %v575_v5 = vmax.bf16 %v4620_v0, %v447_v59 }
 0x123   : > { %986 = vmatprep.mubr.bf16.mxu0 %v565_v63  ;;  %1242 = vmatprep.mubr.bf16.mxu1 %v629_v1  ;;  %v511_v63 = vadd.bf16 %v4870_v9, %v5207_v30  ;;  %v572_v1 = vmax.bf16 %v4620_v0, %v444_v56  ;;  %v446_v9 = vadd.bf16 %v4883_v19, %v5220_v41 }
 0x124   : > { %v636_v2 = vmax.bf16 %v4620_v0, %v508_v60  ;;  %v638_v19 = vmax.bf16 %v4620_v0, %v510_v12 }
 0x125   : > { %v639_v8 = vmax.bf16 %v4620_v0, %v511_v63  ;;  %v574_v31 = vmax.bf16 %v4620_v0, %v446_v9  ;;  %v517_v9 = vadd.bf16 %v4926_v52, %v5207_v30 }
 0x12a   : > { %987 = vmatmul.mubr.bf16.gmra.mrb[88].mxu0 %v564_v14  ;;  %1243 = vmatmul.mubr.bf16.gmra.mrb[88].mxu1 %v628_v18  ;;  %v1527_v14 = vpack.i.b16 %v1525_v11, %v1525_v11  ;;  %v453_v11 = vadd.bf16 %v4926_v52, %v5204_v25  ;;  %v642_v52 = vmax.bf16 %v4620_v0, %v514_v10 }
 0x12b   : > { %994 = vmatprep.mubr.bf16.mxu0 %v567_v27  ;;  %1250 = vmatprep.mubr.bf16.mxu1 %v631_v28 }
 0x132   : > { %995 = vmatmul.mubr.bf16.gmra.mrb[92].mxu0 %v566_v38  ;;  %1251 = vmatmul.mubr.bf16.gmra.mrb[92].mxu1 %v630_v39 }
 0x133   : > { %1002 = vmatprep.mubr.bf16.mxu0 %v569_v45  ;;  %1258 = vmatprep.mubr.bf16.mxu1 %v633_v44  ;;  %v5287_v45 = vrot.slane %v1527_v14, %v4770_v21  ;;  %v515_v21 = vadd.bf16 %v4906_v36, %v5207_v30  ;;  %v579_v36 = vmax.bf16 %v4620_v0, %v451_v49 }
 0x134   : > { %v516_v49 = vadd.bf16 %v4939_v61, %v5223_v40 }
 0x13a   : > { %1003 = vmatmul.mubr.bf16.gmra.mrb[96].mxu0 %v568_v50  ;;  %1259 = vmatmul.mubr.bf16.gmra.mrb[96].mxu1 %v632_v53 }
 0x13b   : > { %1010 = vmatprep.mubr.bf16.mxu0 %v571_v54  ;;  %1266 = vmatprep.mubr.bf16.mxu1 %v635_v55 }
 0x142   : > { %1011 = vmatmul.mubr.bf16.gmra.mrb[100].mxu0 %v570_v57  ;;  %1267 = vmatmul.mubr.bf16.gmra.mrb[100].mxu1 %v634_v58  ;;  %v576_v58 = vmax.bf16 %v4620_v0, %v448_v23 }
 0x143   : > { %1018 = vmatprep.mubr.bf16.mxu0 %v573_v62  ;;  %1274 = vmatprep.mubr.bf16.mxu1 %v637_v51  ;;  %v640_v62 = vmax.bf16 %v4620_v0, %v512_v48  ;;  %v643_v51 = vmax.bf16 %v4620_v0, %v515_v21  ;;  %v452_v48 = vadd.bf16 %v4939_v61, %v5220_v41 }
 0x144   : > { %v455_v21 = vadd.bf16 %v4945_v4, %v5204_v25 }
 0x145   : > { %v580_v25 = vmax.bf16 %v4620_v0, %v452_v48 }
 0x14a   : > { %1019 = vmatmul.mubr.bf16.gmra.mrb[104].mxu0 %v572_v1  ;;  %1275 = vmatmul.mubr.bf16.gmra.mrb[104].mxu1 %v636_v2 }
 0x14b   : > { %1026 = vmatprep.mubr.bf16.mxu0 %v575_v5  ;;  %1282 = vmatprep.mubr.bf16.mxu1 %v639_v8  ;;  %v450_v8 = vadd.bf16 %v4919_v46, %v5220_v41 }
 0x14d   : > { %v812_v18 = vpop.f32.mrb[0].mxu0  ;;  %v1068_v20 = vpop.f32.mrb[0].mxu1 }
 0x14e   : > { %v814_v27 = vpop.f32.mrb[1].mxu0  ;;  %v1070_v28 = vpop.f32.mrb[1].mxu1 }
 0x14f   : > { %v815_v29 = vpop.f32.mrb[2].mxu0  ;;  %v1071_v32 = vpop.f32.mrb[2].mxu1  ;;  %v578_v28 = vmax.bf16 %v4620_v0, %v450_v8  ;;  %v518_v8 = vadd.bf16 %v4960_v26, %v5223_v40 }
 0x150   : > { %v1323_v37 = vpack.c.bf16 %v815_v29, %v812_v18  ;;  %v1355_v24 = vpack.c.bf16 %v1071_v32, %v1068_v20  ;;  %v817_v38 = vpop.f32.mrb[3].mxu0  ;;  %v1073_v39 = vpop.f32.mrb[3].mxu1  ;;  %v581_v32 = vmax.bf16 %v4620_v0, %v453_v11 }
 0x151   : > { %v646_v40 = vmax.bf16 %v4620_v0, %v518_v8 }
 0x152   : > { %v1396_v44 = vadd.bf16 %v5280_v22, %v1323_v37  ;;  %v1428_v42 = vadd.bf16 %v5280_v22, %v1355_v24  ;;  %1027 = vmatmul.mubr.bf16.gmra.mrb[108].mxu0 %v574_v31  ;;  %1283 = vmatmul.mubr.bf16.gmra.mrb[108].mxu1 %v638_v19 }
 0x153   : > { %1034 = vmatprep.mubr.bf16.mxu0 %v577_v34  ;;  %1290 = vmatprep.mubr.bf16.mxu1 %v641_v35  ;;  %v645_v34 = vmax.bf16 %v4620_v0, %v517_v9 }
 0x154   : > { %v1492_v50 = vmax.bf16 %v4620_v0, %v1428_v42  ;;  %v1460_v53 = vmax.bf16 %v4620_v0, %v1396_v44 }
 0x155   : > { %v820_v54 = vpop.f32.mrb[4].mxu0  ;;  %v1076_v55 = vpop.f32.mrb[4].mxu1 }
 0x156   : > { %v822_v43 = vpop.f32.mrb[5].mxu0  ;;  %v1078_v13 = vpop.f32.mrb[5].mxu1  ;;  %v1533_v47 = vmul.bf16 %v5287_v45, %v1460_v53  ;;  %v1565_v17 = vmul.bf16 %v5287_v45, %v1492_v50  ;;  %v519_v50 = vadd.bf16 %v4945_v4, %v5207_v30 }
 0x157   : > { %v823_v57 = vpop.f32.mrb[6].mxu0  ;;  %v1079_v33 = vpop.f32.mrb[6].mxu1 }
 0x158   : > { %v1324_v56 = vpack.c.bf16 %v823_v57, %v820_v54  ;;  %v825_v60 = vpop.f32.mrb[7].mxu0  ;;  %v1356_v59 = vpack.c.bf16 %v1079_v33, %v1076_v55  ;;  %v1081_v63 = vpop.f32.mrb[7].mxu1  ;;  %v1597_v1 = vunpack.c.l.bf16 %v1533_v47  ;;  %v1662_v2 = vunpack.c.h.bf16 %v1565_v17 }
 0x159   : > { %v1598_v16 = vunpack.c.h.bf16 %v1533_v47  ;;  %v1661_v29 = vunpack.c.l.bf16 %v1565_v17 }
 0x15a   : > { %v1397_v6 = vadd.bf16 %v5280_v22, %v1324_v56  ;;  %v1429_v5 = vadd.bf16 %v5280_v22, %v1356_v59  ;;  %1725 = vadd.xlane.f32.xlu0 %v1597_v1  ;;  %1855 = vadd.xlane.f32.xlu1 %v1662_v2 }
 0x15b   : > { %1035 = vmatmul.mubr.bf16.gmra.mrb[112].mxu0 %v576_v58  ;;  %1291 = vmatmul.mubr.bf16.gmra.mrb[112].mxu1 %v640_v62  ;;  %v644_v58 = vmax.bf16 %v4620_v0, %v516_v49  ;;  %v583_v62 = vmax.bf16 %v4620_v0, %v455_v21 }
 0x15c   : > { %v1461_v12 = vmax.bf16 %v4620_v0, %v1397_v6  ;;  %v1493_v15 = vmax.bf16 %v4620_v0, %v1429_v5  ;;  %1042 = vmatprep.mubr.bf16.mxu0 %v579_v36  ;;  %1298 = vmatprep.mubr.bf16.mxu1 %v643_v51  ;;  %v647_v36 = vmax.bf16 %v4620_v0, %v519_v50 }
 0x15d   : > { %v828_v14 = vpop.f32.mrb[8].mxu0  ;;  %v1084_v18 = vpop.f32.mrb[8].mxu1  ;;  %v454_v5 = vadd.bf16 %v4960_v26, %v5220_v41 }
 0x15e   : > { %1727 = vadd.xlane.f32.xlu0 %v1598_v16  ;;  %v830_v20 = vpop.f32.mrb[9].mxu0  ;;  %v1086_v27 = vpop.f32.mrb[9].mxu1  ;;  %v1534_v46 = vmul.bf16 %v5287_v45, %v1461_v12  ;;  %v1566_v44 = vmul.bf16 %v5287_v45, %v1493_v15 }
 0x15f   : > { %v831_v31 = vpop.f32.mrb[10].mxu0  ;;  %v1087_v19 = vpop.f32.mrb[10].mxu1  ;;  %v582_v26 = vmax.bf16 %v4620_v0, %v454_v5 }
 0x160   : > { %v1325_v35 = vpack.c.bf16 %v831_v31, %v828_v14  ;;  %v833_v37 = vpop.f32.mrb[11].mxu0  ;;  %v1357_v24 = vpack.c.bf16 %v1087_v19, %v1084_v18  ;;  %v1089_v38 = vpop.f32.mrb[11].mxu1  ;;  %v1599_v39 = vunpack.c.l.bf16 %v1534_v46  ;;  %v1600_v55 = vunpack.c.h.bf16 %v1534_v46 }
 0x161   : > { %v1663_v43 = vunpack.c.l.bf16 %v1566_v44  ;;  %v1664_v30 = vunpack.c.h.bf16 %v1566_v44 }
 0x162   : > { %v1398_v42 = vadd.bf16 %v5280_v22, %v1325_v35  ;;  %v1430_v23 = vadd.bf16 %v5280_v22, %v1357_v24  ;;  %1729 = vadd.xlane.f32.xlu1 %v1599_v39  ;;  %1853 = vadd.xlane.f32.xlu0 %v1661_v29 }
 0x163   : > { %1043 = vmatmul.mubr.bf16.gmra.mrb[116].mxu0 %v578_v28  ;;  %1299 = vmatmul.mubr.bf16.gmra.mrb[116].mxu1 %v642_v52 }
 0x164   : > { %v1462_v53 = vmax.bf16 %v4620_v0, %v1398_v42  ;;  %v1494_v54 = vmax.bf16 %v4620_v0, %v1430_v23  ;;  %1050 = vmatprep.mubr.bf16.mxu0 %v581_v32  ;;  %1306 = vmatprep.mubr.bf16.mxu1 %v645_v34 }
 0x165   : > { %v836_v13 = vpop.f32.mrb[12].mxu0  ;;  %v1092_v47 = vpop.f32.mrb[12].mxu1 }
 0x166   : > { %v838_v17 = vpop.f32.mrb[13].mxu0  ;;  %1731 = vadd.xlane.f32.xlu1 %v1600_v55  ;;  %1857 = vadd.xlane.f32.xlu0 %v1663_v43  ;;  %v1094_v61 = vpop.f32.mrb[13].mxu1  ;;  %v1535_v57 = vmul.bf16 %v5287_v45, %v1462_v53  ;;  %v1567_v1 = vmul.bf16 %v5287_v45, %v1494_v54 }
 0x167   : > { %v839_v33 = vpop.f32.mrb[14].mxu0  ;;  %v1095_v4 = vpop.f32.mrb[14].mxu1 }
 0x168   : > { %v1326_v51 = vpack.c.bf16 %v839_v33, %v836_v13  ;;  %v841_v56 = vpop.f32.mrb[15].mxu0  ;;  %v1358_v60 = vpack.c.bf16 %v1095_v4, %v1092_v47  ;;  %v1097_v59 = vpop.f32.mrb[15].mxu1  ;;  %v1601_v63 = vunpack.c.l.bf16 %v1535_v57  ;;  %v1602_v9 = vunpack.c.h.bf16 %v1535_v57 }
 0x169   : > { %v1665_v12 = vunpack.c.l.bf16 %v1567_v1  ;;  %v1666_v46 = vunpack.c.h.bf16 %v1567_v1 }
 0x16a   : > { %v1399_v2 = vadd.bf16 %v5280_v22, %v1326_v51  ;;  %v1431_v6 = vadd.bf16 %v5280_v22, %v1358_v60  ;;  %1859 = vadd.xlane.f32.xlu1 %v1664_v30  ;;  %1733 = vadd.xlane.f32.xlu0 %v1601_v63 }
 0x16b   : > { %1051 = vmatmul.mubr.bf16.gmra.mrb[120].mxu0 %v580_v25  ;;  %1307 = vmatmul.mubr.bf16.gmra.mrb[120].mxu1 %v644_v58 }
 0x16c   : > { %v1463_v10 = vmax.bf16 %v4620_v0, %v1399_v2  ;;  %v1495_v11 = vmax.bf16 %v4620_v0, %v1431_v6  ;;  %1058 = vmatprep.mubr.bf16.mxu0 %v583_v62  ;;  %1314 = vmatprep.mubr.bf16.mxu1 %v647_v36 }
 0x16d   : > { %v844_v15 = vpop.f32.mrb[16].mxu0  ;;  %v1100_v16 = vpop.f32.mrb[16].mxu1 }
 0x16e   : > { %v846_v14 = vpop.f32.mrb[17].mxu0  ;;  %1735 = vadd.xlane.f32.xlu1 %v1602_v9  ;;  %1861 = vadd.xlane.f32.xlu0 %v1665_v12  ;;  %v1102_v18 = vpop.f32.mrb[17].mxu1  ;;  %v1536_v20 = vmul.bf16 %v5287_v45, %v1463_v10  ;;  %v1568_v32 = vmul.bf16 %v5287_v45, %v1495_v11 }
 0x16f   : > { %v847_v41 = vpop.f32.mrb[18].mxu0  ;;  %v1103_v27 = vpop.f32.mrb[18].mxu1 }
 0x170   : > { %v1327_v28 = vpack.c.bf16 %v847_v41, %v844_v15  ;;  %v849_v31 = vpop.f32.mrb[19].mxu0  ;;  %v1359_v19 = vpack.c.bf16 %v1103_v27, %v1100_v16  ;;  %v1105_v29 = vpop.f32.mrb[19].mxu1  ;;  %v1603_v52 = vunpack.c.l.bf16 %v1536_v20  ;;  %v1604_v38 = vunpack.c.h.bf16 %v1536_v20 }
 0x171   : > { %v1667_v39 = vunpack.c.l.bf16 %v1568_v32  ;;  %v1668_v53 = vunpack.c.h.bf16 %v1568_v32 }
 0x172   : > { %v1400_v34 = vadd.bf16 %v5280_v22, %v1327_v28  ;;  %v1432_v35 = vadd.bf16 %v5280_v22, %v1359_v19  ;;  %1863 = vadd.xlane.f32.xlu1 %v1666_v46  ;;  %1737 = vadd.xlane.f32.xlu0 %v1603_v52 }
 0x173   : > { %1059 = vmatmul.mubr.bf16.gmra.mrb[124].mxu0 %v582_v26  ;;  %1315 = vmatmul.mubr.bf16.gmra.mrb[124].mxu1 %v646_v40 }
 0x174   : > { %v1464_v37 = vmax.bf16 %v4620_v0, %v1400_v34  ;;  %v1496_v24 = vmax.bf16 %v4620_v0, %v1432_v35 }
 0x175   : > { %v852_v44 = vpop.f32.mrb[20].mxu0  ;;  %v1108_v42 = vpop.f32.mrb[20].mxu1 }
 0x176   : > { %v854_v23 = vpop.f32.mrb[21].mxu0  ;;  %1739 = vadd.xlane.f32.xlu1 %v1604_v38  ;;  %1865 = vadd.xlane.f32.xlu0 %v1667_v39  ;;  %v1110_v48 = vpop.f32.mrb[21].mxu1  ;;  %v1537_v49 = vmul.bf16 %v5287_v45, %v1464_v37  ;;  %v1569_v17 = vmul.bf16 %v5287_v45, %v1496_v24 }
 0x177   : > { %v855_v21 = vpop.f32.mrb[22].mxu0  ;;  %v1111_v50 = vpop.f32.mrb[22].mxu1 }
 0x178   : > { %v1328_v54 = vpack.c.bf16 %v855_v21, %v852_v44  ;;  %v857_v55 = vpop.f32.mrb[23].mxu0  ;;  %v1360_v43 = vpack.c.bf16 %v1111_v50, %v1108_v42  ;;  %v1113_v13 = vpop.f32.mrb[23].mxu1  ;;  %v1605_v47 = vunpack.c.l.bf16 %v1537_v49  ;;  %v1606_v4 = vunpack.c.h.bf16 %v1537_v49 }
 0x179   : > { %v1669_v30 = vunpack.c.l.bf16 %v1569_v17  ;;  %v1670_v63 = vunpack.c.h.bf16 %v1569_v17 }
 0x17a   : > { %v1401_v61 = vadd.bf16 %v5280_v22, %v1328_v54  ;;  %v1433_v57 = vadd.bf16 %v5280_v22, %v1360_v43  ;;  %1867 = vadd.xlane.f32.xlu1 %v1668_v53  ;;  %1741 = vadd.xlane.f32.xlu0 %v1605_v47 }
 0x17c   : > { %v1465_v25 = vmax.bf16 %v4620_v0, %v1401_v61  ;;  %v1497_v33 = vmax.bf16 %v4620_v0, %v1433_v57 }
 0x17d   : > { %v860_v58 = vpop.f32.mrb[24].mxu0  ;;  %v1116_v62 = vpop.f32.mrb[24].mxu1 }
 0x17e   : > { %v862_v36 = vpop.f32.mrb[25].mxu0  ;;  %1743 = vadd.xlane.f32.xlu1 %v1606_v4  ;;  %1869 = vadd.xlane.f32.xlu0 %v1669_v30  ;;  %v1118_v51 = vpop.f32.mrb[25].mxu1  ;;  %v1538_v56 = vmul.bf16 %v5287_v45, %v1465_v25  ;;  %v1570_v10 = vmul.bf16 %v5287_v45, %v1497_v33 }
 0x17f   : > { %v863_v60 = vpop.f32.mrb[26].mxu0  ;;  %v1119_v59 = vpop.f32.mrb[26].mxu1 }
 0x180   : > { %v1329_v1 = vpack.c.bf16 %v863_v60, %v860_v58  ;;  %v865_v2 = vpop.f32.mrb[27].mxu0  ;;  %v1361_v6 = vpack.c.bf16 %v1119_v59, %v1116_v62  ;;  %v1121_v5 = vpop.f32.mrb[27].mxu1  ;;  %v1607_v8 = vunpack.c.l.bf16 %v1538_v56  ;;  %v1608_v16 = vunpack.c.h.bf16 %v1538_v56 }
 0x181   : > { %v1671_v14 = vunpack.c.l.bf16 %v1570_v10  ;;  %v1672_v28 = vunpack.c.h.bf16 %v1570_v10 }
 0x182   : > { %v1402_v11 = vadd.bf16 %v5280_v22, %v1329_v1  ;;  %v1434_v9 = vadd.bf16 %v5280_v22, %v1361_v6  ;;  %1871 = vadd.xlane.f32.xlu1 %v1670_v63  ;;  %1745 = vadd.xlane.f32.xlu0 %v1607_v8 }
 0x184   : > { %v1466_v12 = vmax.bf16 %v4620_v0, %v1402_v11  ;;  %v1498_v15 = vmax.bf16 %v4620_v0, %v1434_v9 }
 0x185   : > { %v868_v18 = vpop.f32.mrb[28].mxu0  ;;  %v1124_v20 = vpop.f32.mrb[28].mxu1 }
 0x186   : > { %v870_v41 = vpop.f32.mrb[29].mxu0  ;;  %1747 = vadd.xlane.f32.xlu1 %v1608_v16  ;;  %1873 = vadd.xlane.f32.xlu0 %v1671_v14  ;;  %v1126_v27 = vpop.f32.mrb[29].mxu1  ;;  %v1539_v46 = vmul.bf16 %v5287_v45, %v1466_v12  ;;  %v1571_v34 = vmul.bf16 %v5287_v45, %v1498_v15 }
 0x187   : > { %v871_v26 = vpop.f32.mrb[30].mxu0  ;;  %v1127_v40 = vpop.f32.mrb[30].mxu1 }
 0x188   : > { %v1330_v31 = vpack.c.bf16 %v871_v26, %v868_v18  ;;  %v873_v19 = vpop.f32.mrb[31].mxu0  ;;  %v1362_v29 = vpack.c.bf16 %v1127_v40, %v1124_v20  ;;  %v1129_v52 = vpop.f32.mrb[31].mxu1  ;;  %v1609_v32 = vunpack.c.l.bf16 %v1539_v46  ;;  %v1610_v39 = vunpack.c.h.bf16 %v1539_v46 }
 0x189   : > { %v1673_v44 = vunpack.c.l.bf16 %v1571_v34  ;;  %v1674_v53 = vunpack.c.h.bf16 %v1571_v34 }
 0x18a   : > { %v1403_v35 = vadd.bf16 %v5280_v22, %v1330_v31  ;;  %v1435_v37 = vadd.bf16 %v5280_v22, %v1362_v29  ;;  %1875 = vadd.xlane.f32.xlu1 %v1672_v28  ;;  %1749 = vadd.xlane.f32.xlu0 %v1609_v32 }
 0x18c   : > { %v1467_v24 = vmax.bf16 %v4620_v0, %v1403_v35  ;;  %v1499_v38 = vmax.bf16 %v4620_v0, %v1435_v37 }
 0x18d   : > { %v876_v42 = vpop.f32.mrb[32].mxu0  ;;  %v1132_v23 = vpop.f32.mrb[32].mxu1 }
 0x18e   : > { %v878_v48 = vpop.f32.mrb[33].mxu0  ;;  %1751 = vadd.xlane.f32.xlu1 %v1610_v39  ;;  %1877 = vadd.xlane.f32.xlu0 %v1673_v44  ;;  %v1540_v49 = vmul.bf16 %v5287_v45, %v1467_v24  ;;  %v1134_v21 = vpop.f32.mrb[33].mxu1  ;;  %v1572_v61 = vmul.bf16 %v5287_v45, %v1499_v38 }
 0x18f   : > { %v879_v50 = vpop.f32.mrb[34].mxu0  ;;  %v1135_v54 = vpop.f32.mrb[34].mxu1 }
 0x190   : > { %v1331_v55 = vpack.c.bf16 %v879_v50, %v876_v42  ;;  %v881_v43 = vpop.f32.mrb[35].mxu0  ;;  %v1611_v13 = vunpack.c.l.bf16 %v1540_v49  ;;  %v1363_v47 = vpack.c.bf16 %v1135_v54, %v1132_v23  ;;  %v1137_v17 = vpop.f32.mrb[35].mxu1  ;;  %v1612_v30 = vunpack.c.h.bf16 %v1540_v49 }
 0x191   : > { %v1675_v58 = vunpack.c.l.bf16 %v1572_v61  ;;  %v1676_v8 = vunpack.c.h.bf16 %v1572_v61 }
 0x192   : > { %v1404_v57 = vadd.bf16 %v5280_v22, %v1331_v55  ;;  %1879 = vadd.xlane.f32.xlu1 %v1674_v53  ;;  %1753 = vadd.xlane.f32.xlu0 %v1611_v13  ;;  %v1436_v25 = vadd.bf16 %v5280_v22, %v1363_v47 }
 0x194   : > { %v1468_v33 = vmax.bf16 %v4620_v0, %v1404_v57  ;;  %v1500_v4 = vmax.bf16 %v4620_v0, %v1436_v25 }
 0x195   : > { %v884_v62 = vpop.f32.mrb[36].mxu0  ;;  %v1140_v36 = vpop.f32.mrb[36].mxu1 }
 0x196   : > { %v886_v51 = vpop.f32.mrb[37].mxu0  ;;  %1755 = vadd.xlane.f32.xlu1 %v1612_v30  ;;  %1881 = vadd.xlane.f32.xlu0 %v1675_v58  ;;  %v1541_v56 = vmul.bf16 %v5287_v45, %v1468_v33  ;;  %v1142_v60 = vpop.f32.mrb[37].mxu1  ;;  %v1573_v59 = vmul.bf16 %v5287_v45, %v1500_v4 }
 0x197   : > { %v887_v63 = vpop.f32.mrb[38].mxu0  ;;  %v1143_v1 = vpop.f32.mrb[38].mxu1 }
 0x198   : > { %v1332_v2 = vpack.c.bf16 %v887_v63, %v884_v62  ;;  %v889_v6 = vpop.f32.mrb[39].mxu0  ;;  %v1614_v5 = vunpack.c.h.bf16 %v1541_v56  ;;  %v1364_v10 = vpack.c.bf16 %v1143_v1, %v1140_v36  ;;  %v1145_v11 = vpop.f32.mrb[39].mxu1  ;;  %v1677_v15 = vunpack.c.l.bf16 %v1573_v59 }
 0x199   : > { %v1613_v18 = vunpack.c.l.bf16 %v1541_v56  ;;  %v1678_v52 = vunpack.c.h.bf16 %v1573_v59 }
 0x19a   : > { %v1405_v9 = vadd.bf16 %v5280_v22, %v1332_v2  ;;  %1759 = vadd.xlane.f32.xlu1 %v1614_v5  ;;  %1883 = vadd.xlane.f32.xlu0 %v1676_v8  ;;  %v1437_v12 = vadd.bf16 %v5280_v22, %v1364_v10 }
 0x19c   : > { %v1469_v16 = vmax.bf16 %v4620_v0, %v1405_v9  ;;  %v1501_v14 = vmax.bf16 %v4620_v0, %v1437_v12 }
 0x19d   : > { %v892_v20 = vpop.f32.mrb[40].mxu0  ;;  %v1148_v41 = vpop.f32.mrb[40].mxu1 }
 0x19e   : > { %v894_v27 = vpop.f32.mrb[41].mxu0  ;;  %1757 = vadd.xlane.f32.xlu0 %v1613_v18  ;;  %1885 = vadd.xlane.f32.xlu1 %v1677_v15  ;;  %v1542_v46 = vmul.bf16 %v5287_v45, %v1469_v16  ;;  %v1150_v26 = vpop.f32.mrb[41].mxu1  ;;  %v1574_v40 = vmul.bf16 %v5287_v45, %v1501_v14 }
 0x19f   : > { %v895_v28 = vpop.f32.mrb[42].mxu0  ;;  %v1151_v31 = vpop.f32.mrb[42].mxu1 }
 0x1a0   : > { %v1333_v19 = vpack.c.bf16 %v895_v28, %v892_v20  ;;  %v897_v29 = vpop.f32.mrb[43].mxu0  ;;  %v1616_v32 = vunpack.c.h.bf16 %v1542_v46  ;;  %v1365_v34 = vpack.c.bf16 %v1151_v31, %v1148_v41  ;;  %v1153_v35 = vpop.f32.mrb[43].mxu1  ;;  %v1679_v24 = vunpack.c.l.bf16 %v1574_v40 }
 0x1a1   : > { %v1615_v44 = vunpack.c.l.bf16 %v1542_v46  ;;  %v1680_v53 = vunpack.c.h.bf16 %v1574_v40 }
 0x1a2   : > { %v1406_v37 = vadd.bf16 %v5280_v22, %v1333_v19  ;;  %1887 = vadd.xlane.f32.xlu0 %v1678_v52  ;;  %1763 = vadd.xlane.f32.xlu1 %v1616_v32  ;;  %v1438_v39 = vadd.bf16 %v5280_v22, %v1365_v34 }
 0x1a4   : > { %v1470_v38 = vmax.bf16 %v4620_v0, %v1406_v37  ;;  %v1502_v55 = vmax.bf16 %v4620_v0, %v1438_v39 }
 0x1a5   : > { %v900_v42 = vpop.f32.mrb[44].mxu0  ;;  %v1156_v23 = vpop.f32.mrb[44].mxu1 }
 0x1a6   : > { %v902_v48 = vpop.f32.mrb[45].mxu0  ;;  %1761 = vadd.xlane.f32.xlu0 %v1615_v44  ;;  %1889 = vadd.xlane.f32.xlu1 %v1679_v24  ;;  %v1543_v49 = vmul.bf16 %v5287_v45, %v1470_v38  ;;  %v1158_v21 = vpop.f32.mrb[45].mxu1  ;;  %v1575_v4 = vmul.bf16 %v5287_v45, %v1502_v55 }
 0x1a7   : > { %v903_v50 = vpop.f32.mrb[46].mxu0  ;;  %v1159_v54 = vpop.f32.mrb[46].mxu1 }
 0x1a8   : > { %v1334_v43 = vpack.c.bf16 %v903_v50, %v900_v42  ;;  %v1618_v13 = vunpack.c.h.bf16 %v1543_v49  ;;  %v905_v47 = vpop.f32.mrb[47].mxu0  ;;  %v1366_v17 = vpack.c.bf16 %v1159_v54, %v1156_v23  ;;  %v1161_v61 = vpop.f32.mrb[47].mxu1  ;;  %v1617_v33 = vunpack.c.l.bf16 %v1543_v49 }
 0x1a9   : > { %v1681_v2 = vunpack.c.l.bf16 %v1575_v4  ;;  %v1682_v12 = vunpack.c.h.bf16 %v1575_v4 }
 0x1aa   : > { %v1407_v57 = vadd.bf16 %v5280_v22, %v1334_v43  ;;  %1891 = vadd.xlane.f32.xlu0 %v1680_v53  ;;  %1767 = vadd.xlane.f32.xlu1 %v1618_v13  ;;  %v1439_v60 = vadd.bf16 %v5280_v22, %v1366_v17 }
 0x1ac   : > { %v1471_v25 = vmax.bf16 %v4620_v0, %v1407_v57  ;;  %v1503_v11 = vmax.bf16 %v4620_v0, %v1439_v60 }
 0x1ad   : > { %v908_v30 = vpop.f32.mrb[48].mxu0  ;;  %v1164_v58 = vpop.f32.mrb[48].mxu1 }
 0x1ae   : > { %v910_v62 = vpop.f32.mrb[49].mxu0  ;;  %1765 = vadd.xlane.f32.xlu0 %v1617_v33  ;;  %v1544_v36 = vmul.bf16 %v5287_v45, %v1471_v25  ;;  %v1166_v51 = vpop.f32.mrb[49].mxu1  ;;  %v1576_v46 = vmul.bf16 %v5287_v45, %v1503_v11 }
 0x1af   : > { %v911_v56 = vpop.f32.mrb[50].mxu0  ;;  %v1167_v59 = vpop.f32.mrb[50].mxu1 }
 0x1b0   : > { %v1335_v63 = vpack.c.bf16 %v911_v56, %v908_v30  ;;  %v1620_v1 = vunpack.c.h.bf16 %v1544_v36  ;;  %v913_v6 = vpop.f32.mrb[51].mxu0  ;;  %v1367_v5 = vpack.c.bf16 %v1167_v59, %v1164_v58  ;;  %v1169_v8 = vpop.f32.mrb[51].mxu1  ;;  %v1619_v28 = vunpack.c.l.bf16 %v1544_v36 }
 0x1b1   : > { %v1683_v24 = vunpack.c.l.bf16 %v1576_v46  ;;  %v1684_v21 = vunpack.c.h.bf16 %v1576_v46 }
 0x1b2   : > { %v1408_v10 = vadd.bf16 %v5280_v22, %v1335_v63  ;;  %1771 = vadd.xlane.f32.xlu1 %v1620_v1  ;;  %1893 = vadd.xlane.f32.xlu0 %v1681_v2  ;;  %v1440_v35 = vadd.bf16 %v5280_v22, %v1367_v5 }
 0x1b4   : > { %v1472_v9 = vmax.bf16 %v4620_v0, %v1408_v10  ;;  %v1504_v53 = vmax.bf16 %v4620_v0, %v1440_v35 }
 0x1b5   : > { %v916_v15 = vpop.f32.mrb[52].mxu0  ;;  %v1172_v16 = vpop.f32.mrb[52].mxu1 }
 0x1b6   : > { %v918_v14 = vpop.f32.mrb[53].mxu0  ;;  %1895 = vadd.xlane.f32.xlu0 %v1682_v12  ;;  %v1545_v18 = vmul.bf16 %v5287_v45, %v1472_v9  ;;  %v1174_v20 = vpop.f32.mrb[53].mxu1  ;;  %v1577_v30 = vmul.bf16 %v5287_v45, %v1504_v53 }
 0x1b7   : > { %v919_v41 = vpop.f32.mrb[54].mxu0  ;;  %v1175_v27 = vpop.f32.mrb[54].mxu1 }
 0x1b8   : > { %v1336_v26 = vpack.c.bf16 %v919_v41, %v916_v15  ;;  %v1622_v40 = vunpack.c.h.bf16 %v1545_v18  ;;  %v1368_v31 = vpack.c.bf16 %v1175_v27, %v1172_v16  ;;  %v921_v19 = vpop.f32.mrb[55].mxu0  ;;  %v1177_v29 = vpop.f32.mrb[55].mxu1  ;;  %v1621_v4 = vunpack.c.l.bf16 %v1545_v18 }
 0x1b9   : > { %v1685_v2 = vunpack.c.l.bf16 %v1577_v30  ;;  %v1686_v14 = vunpack.c.h.bf16 %v1577_v30 }
 0x1ba   : > { %v1409_v52 = vadd.bf16 %v5280_v22, %v1336_v26  ;;  %1775 = vadd.xlane.f32.xlu1 %v1622_v40  ;;  %1769 = vadd.xlane.f32.xlu0 %v1619_v28  ;;  %v1441_v32 = vadd.bf16 %v5280_v22, %v1368_v31 }
 0x1bc   : > { %v1473_v34 = vmax.bf16 %v4620_v0, %v1409_v52  ;;  %v1505_v37 = vmax.bf16 %v4620_v0, %v1441_v32 }
 0x1bd   : > { %v924_v38 = vpop.f32.mrb[56].mxu0  ;;  %v1180_v39 = vpop.f32.mrb[56].mxu1 }
 0x1be   : > { %v926_v44 = vpop.f32.mrb[57].mxu0  ;;  %1897 = vadd.xlane.f32.xlu0 %v1683_v24  ;;  %v1546_v42 = vmul.bf16 %v5287_v45, %v1473_v34  ;;  %v1182_v23 = vpop.f32.mrb[57].mxu1  ;;  %v5413_v48 = vmul.bf16 %v5287_v45, %v1505_v37 }
 0x1bf   : > { %v927_v49 = vpop.f32.mrb[58].mxu0  ;;  %v1183_v50 = vpop.f32.mrb[58].mxu1 }
 0x1c0   : > { %v1337_v54 = vpack.c.bf16 %v927_v49, %v924_v38  ;;  %v1624_v55 = vunpack.c.h.bf16 %v1546_v42  ;;  %v1369_v43 = vpack.c.bf16 %v1183_v50, %v1180_v39  ;;  %v929_v13 = vpop.f32.mrb[59].mxu0  ;;  %v1185_v47 = vpop.f32.mrb[59].mxu1  ;;  %v1688_v57 = vunpack.c.h.bf16 %v5413_v48 }
 0x1c1   : > { %v1623_v19 = vunpack.c.l.bf16 %v1546_v42  ;;  %v1687_v44 = vunpack.c.l.bf16 %v5413_v48 }
 0x1c2   : > { %v1410_v17 = vadd.bf16 %v5280_v22, %v1337_v54  ;;  %1779 = vadd.xlane.f32.xlu1 %v1624_v55  ;;  %1899 = vadd.xlane.f32.xlu0 %v1684_v21  ;;  %v1442_v61 = vadd.bf16 %v5280_v22, %v1369_v43 }
 0x1c4   : > { %v1474_v25 = vmax.bf16 %v4620_v0, %v1410_v17  ;;  %v1506_v33 = vmax.bf16 %v4620_v0, %v1442_v61 }
 0x1c5   : > { %v932_v58 = vpop.f32.mrb[60].mxu0  ;;  %v1188_v62 = vpop.f32.mrb[60].mxu1 }
 0x1c6   : > { %v934_v36 = vpop.f32.mrb[61].mxu0  ;;  %1773 = vadd.xlane.f32.xlu0 %v1621_v4  ;;  %1907 = vadd.xlane.f32.xlu1 %v1688_v57  ;;  %v1547_v51 = vmul.bf16 %v5287_v45, %v1474_v25  ;;  %v1190_v56 = vpop.f32.mrb[61].mxu1  ;;  %v5424_v60 = vmul.bf16 %v5287_v45, %v1506_v33 }
 0x1c7   : > { %v935_v59 = vpop.f32.mrb[62].mxu0  ;;  %v1191_v63 = vpop.f32.mrb[62].mxu1 }
 0x1c8   : > { %v1338_v1 = vpack.c.bf16 %v935_v59, %v932_v58  ;;  %v1626_v6 = vunpack.c.h.bf16 %v1547_v51  ;;  %v1370_v5 = vpack.c.bf16 %v1191_v63, %v1188_v62  ;;  %v937_v8 = vpop.f32.mrb[63].mxu0  ;;  %v1193_v10 = vpop.f32.mrb[63].mxu1  ;;  %v1690_v12 = vunpack.c.h.bf16 %v5424_v60 }
 0x1c9   : > { %v1625_v13 = vunpack.c.l.bf16 %v1547_v51  ;;  %v1689_v58 = vunpack.c.l.bf16 %v5424_v60 }
 0x1ca   : > { %v1411_v11 = vadd.bf16 %v5280_v22, %v1338_v1  ;;  %1901 = vadd.xlane.f32.xlu0 %v1685_v2  ;;  %1783 = vadd.xlane.f32.xlu1 %v1626_v6  ;;  %v1443_v9 = vadd.bf16 %v5280_v22, %v1370_v5 }
 0x1cc   : > { %v1475_v15 = vmax.bf16 %v4620_v0, %v1411_v11  ;;  %v1507_v16 = vmax.bf16 %v4620_v0, %v1443_v9  ;;  %v5459_v9 = vpop.permute.xlu1 %1989 }
 0x1cd   : > { %v940_v18 = vpop.f32.mrb[64].mxu0  ;;  %v1196_v20 = vpop.f32.mrb[64].mxu1 }
 0x1ce   : > { %1903 = vadd.xlane.f32.xlu0 %v1686_v14  ;;  %1911 = vadd.xlane.f32.xlu1 %v1690_v12  ;;  %v942_v41 = vpop.f32.mrb[65].mxu0  ;;  %v1548_v27 = vmul.bf16 %v5287_v45, %v1475_v15  ;;  %v1198_v46 = vpop.f32.mrb[65].mxu1  ;;  %v5433_v26 = vmul.bf16 %v5287_v45, %v1507_v16  ;;  %v5464_v14 = vand.u32 127, %v107_v3 }
 0x1cf   : > { %v943_v40 = vpop.f32.mrb[66].mxu0  ;;  %v1199_v28 = vpop.f32.mrb[66].mxu1 }
 0x1d0   : > { %v1339_v31 = vpack.c.bf16 %v943_v40, %v940_v18  ;;  %v1628_v29 = vunpack.c.h.bf16 %v1548_v27  ;;  %v1371_v52 = vpack.c.bf16 %v1199_v28, %v1196_v20  ;;  %v945_v32 = vpop.f32.mrb[67].mxu0  ;;  %v1201_v34 = vpop.f32.mrb[67].mxu1  ;;  %v1691_v24 = vunpack.c.l.bf16 %v5433_v26 }
 0x1d1   : > { %v1627_v6 = vunpack.c.l.bf16 %v1548_v27  ;;  %v1692_v20 = vunpack.c.h.bf16 %v5433_v26  ;;  %v5474_v3 = vsub.s32 %v5464_v14, %v4729_v7  ;;  %v3029_v32 = vadd.s32 4294967280, %v5464_v14 }
 0x1d2   : > { %v1412_v35 = vadd.bf16 %v5280_v22, %v1339_v31  ;;  %1777 = vadd.xlane.f32.xlu0 %v1623_v19  ;;  %1787 = vadd.xlane.f32.xlu1 %v1628_v29  ;;  %v1444_v37 = vadd.bf16 %v5280_v22, %v1371_v52  ;;  %v3022_v52 = vadd.s32 4294967288, %v5464_v14 }
 0x1d4   : > { %v1476_v38 = vmax.bf16 %v4620_v0, %v1412_v35  ;;  %v1508_v39 = vmax.bf16 %v4620_v0, %v1444_v37 }
 0x1d5   : > { %v948_v23 = vpop.f32.mrb[68].mxu0  ;;  %v1204_v42 = vpop.f32.mrb[68].mxu1 }
 0x1d6   : > { %1905 = vadd.xlane.f32.xlu0 %v1687_v44  ;;  %1913 = vadd.xlane.f32.xlu1 %v1691_v24  ;;  %v950_v49 = vpop.f32.mrb[69].mxu0  ;;  %v5442_v21 = vmul.bf16 %v5287_v45, %v1476_v38  ;;  %v1206_v50 = vpop.f32.mrb[69].mxu1  ;;  %v5445_v53 = vmul.bf16 %v5287_v45, %v1508_v39  ;;  %v3036_v39 = vadd.s32 4294967272, %v5464_v14 }
 0x1d7   : > { %v951_v54 = vpop.f32.mrb[70].mxu0  ;;  %v1207_v55 = vpop.f32.mrb[70].mxu1  ;;  %v3043_v50 = vadd.s32 4294967264, %v5464_v14 }
 0x1d8   : > { %v1340_v43 = vpack.c.bf16 %v951_v54, %v948_v23  ;;  %v1630_v47 = vunpack.c.h.bf16 %v5442_v21  ;;  %v1372_v17 = vpack.c.bf16 %v1207_v55, %v1204_v42  ;;  %v953_v48 = vpop.f32.mrb[71].mxu0  ;;  %v1209_v61 = vpop.f32.mrb[71].mxu1  ;;  %v1694_v33 = vunpack.c.h.bf16 %v5445_v53 }
 0x1d9   : > { %v1629_v37 = vunpack.c.l.bf16 %v5442_v21  ;;  %v3050_v54 = vadd.s32 4294967256, %v5464_v14  ;;  %v5493_v61 = vsub.s32 %v3029_v32, %v4729_v7 }
 0x1da   : > { %v1413_v57 = vadd.bf16 %v5280_v22, %v1340_v43  ;;  %1781 = vadd.xlane.f32.xlu0 %v1625_v13  ;;  %1791 = vadd.xlane.f32.xlu1 %v1630_v47  ;;  %v1445_v25 = vadd.bf16 %v5280_v22, %v1372_v17  ;;  %v5489_v47 = vsub.s32 %v3022_v52, %v4729_v7 }
 0x1dc   : > { %v1477_v4 = vmax.bf16 %v4620_v0, %v1413_v57  ;;  %v1509_v30 = vmax.bf16 %v4620_v0, %v1445_v25  ;;  %v3057_v57 = vadd.s32 4294967248, %v5464_v14 }
 0x1dd   : > { %v956_v62 = vpop.f32.mrb[72].mxu0  ;;  %v1212_v36 = vpop.f32.mrb[72].mxu1 }
 0x1de   : > { %1909 = vadd.xlane.f32.xlu0 %v1689_v58  ;;  %1919 = vadd.xlane.f32.xlu1 %v1694_v33  ;;  %v958_v51 = vpop.f32.mrb[73].mxu0  ;;  %v5455_v56 = vmul.bf16 %v5287_v45, %v1477_v4  ;;  %v1582_v59 = vmul.bf16 %v5287_v45, %v1509_v30  ;;  %v1214_v63 = vpop.f32.mrb[73].mxu1  ;;  %v1693_v33 = vunpack.c.l.bf16 %v5445_v53  ;;  %v5499_v4 = vsub.s32 %v3036_v39, %v4729_v7 }
 0x1df   : > { %v959_v1 = vpop.f32.mrb[74].mxu0  ;;  %v1215_v2 = vpop.f32.mrb[74].mxu1  ;;  %v3064_v51 = vadd.s32 4294967240, %v5464_v14 }
 0x1e0   : > { %v1632_v5 = vunpack.c.h.bf16 %v5455_v56  ;;  %v1341_v8 = vpack.c.bf16 %v959_v1, %v956_v62  ;;  %v1373_v10 = vpack.c.bf16 %v1215_v2, %v1212_v36  ;;  %v961_v11 = vpop.f32.mrb[75].mxu0  ;;  %v1217_v60 = vpop.f32.mrb[75].mxu1  ;;  %v1695_v15 = vunpack.c.l.bf16 %v1582_v59 }
 0x1e1   : > { %v1696_v28 = vunpack.c.h.bf16 %v1582_v59  ;;  %v5503_v36 = vsub.s32 %v3043_v50, %v4729_v7  ;;  %v5515_v11 = vsub.s32 %v3057_v57, %v4729_v7  ;;  %v3071_v60 = vadd.s32 4294967232, %v5464_v14 }
 0x1e2   : > { %1785 = vadd.xlane.f32.xlu0 %v1627_v6  ;;  %1795 = vadd.xlane.f32.xlu1 %v1632_v5  ;;  %v1414_v12 = vadd.bf16 %v5280_v22, %v1341_v8  ;;  %v1446_v16 = vadd.bf16 %v5280_v22, %v1373_v10  ;;  %v5509_v6 = vsub.s32 %v3050_v54, %v4729_v7 }
 0x1e4   : > { %v1478_v18 = vmax.bf16 %v4620_v0, %v1414_v12  ;;  %v1510_v46 = vmax.bf16 %v4620_v0, %v1446_v16  ;;  %v3078_v12 = vadd.s32 4294967224, %v5464_v14 }
 0x1e5   : > { %v964_v41 = vpop.f32.mrb[76].mxu0  ;;  %v1220_v27 = vpop.f32.mrb[76].mxu1 }
 0x1e6   : > { %1915 = vadd.xlane.f32.xlu0 %v1692_v20  ;;  %1921 = vadd.xlane.f32.xlu1 %v1695_v15  ;;  %v966_v40 = vpop.f32.mrb[77].mxu0  ;;  %v5470_v31 = vmul.bf16 %v5287_v45, %v1478_v18  ;;  %v1222_v19 = vpop.f32.mrb[77].mxu1  ;;  %v5486_v21 = vmul.bf16 %v5287_v45, %v1510_v46  ;;  %v1631_v20 = vunpack.c.l.bf16 %v5455_v56  ;;  %v5534_v39 = vsub.s32 %v3078_v12, %v4729_v7 }
 0x1e7   : > { %v1726_v29 = vpop.xlane.xlu0 %1725  ;;  %v1856_v26 = vpop.xlane.xlu1 %1855  ;;  %v5523_v19 = vsub.s32 %v3064_v51, %v4729_v7 }
 0x1e8   : > { %v1992_v34 = vadd.f32 %v5459_v9, %v1726_v29  ;;  %v2057_v35 = vadd.f32 %v5459_v9, %v1856_v26  ;;  %v967_v24 = vpop.f32.mrb[78].mxu0  ;;  %v1223_v38 = vpop.f32.mrb[78].mxu1  ;;  %v1634_v13 = vunpack.c.h.bf16 %v5470_v31  ;;  %v1698_v53 = vunpack.c.h.bf16 %v5486_v21 }
 0x1e9   : > { %v1342_v44 = vpack.c.bf16 %v967_v24, %v964_v41  ;;  %v969_v23 = vpop.f32.mrb[79].mxu0  ;;  %v1374_v42 = vpack.c.bf16 %v1223_v38, %v1220_v27  ;;  %v1225_v49 = vpop.f32.mrb[79].mxu1  ;;  %v3085_v29 = vadd.s32 4294967216, %v5464_v14  ;;  %v5531_v38 = vsub.s32 %v3071_v60, %v4729_v7 }
 0x1ea   : > { %v3775_v55 = vmul.f32 -1.442695, %v1992_v34  ;;  %v3840_v43 = vmul.f32 -1.442695, %v2057_v35  ;;  %1789 = vadd.xlane.f32.xlu0 %v1629_v37  ;;  %1923 = vadd.xlane.f32.xlu1 %v1696_v28  ;;  %v1697_v57 = vunpack.c.l.bf16 %v5486_v21 }
 0x1eb   : > { %v1728_v17 = vpop.xlane.xlu0 %1727  ;;  %v1415_v48 = vadd.bf16 %v5280_v22, %v1342_v44  ;;  %v1447_v1 = vadd.bf16 %v5280_v22, %v1374_v42  ;;  %v1633_v42 = vunpack.c.l.bf16 %v5470_v31 }
 0x1ec   : > { %3999 = vpow2.f32 %v3775_v55  ;;  %v1993_v25 = vadd.f32 %v5459_v9, %v1728_v17 }
 0x1ed   : > { %4001 = vpow2.f32 %v3840_v43  ;;  %v1479_v30 = vmax.bf16 %v4620_v0, %v1415_v48  ;;  %v972_v58 = vpop.f32.mrb[80].mxu0  ;;  %v1228_v62 = vpop.f32.mrb[80].mxu1  ;;  %v1511_v32 = vmax.bf16 %v4620_v0, %v1447_v1  ;;  %v5542_v43 = vsub.s32 %v3085_v29, %v4729_v7 }
 0x1ee   : > { %v3776_v59 = vmul.f32 -1.442695, %v1993_v25  ;;  %v974_v63 = vpop.f32.mrb[81].mxu0  ;;  %1917 = vadd.xlane.f32.xlu0 %v1693_v33  ;;  %1799 = vadd.xlane.f32.xlu1 %v1634_v13  ;;  %v1230_v2 = vpop.f32.mrb[81].mxu1  ;;  %v3092_v33 = vadd.s32 4294967208, %v5464_v14 }
 0x1ef   : > { %v1730_v5 = vpop.xlane.xlu1 %1729  ;;  %v1854_v8 = vpop.xlane.xlu0 %1853  ;;  %v5512_v10 = vmul.bf16 %v5287_v45, %v1479_v30  ;;  %v5546_v31 = vmul.bf16 %v5287_v45, %v1511_v32 }
 0x1f0   : > { %4003 = vpow2.f32 %v3776_v59  ;;  %v1994_v15 = vadd.f32 %v5459_v9, %v1730_v5  ;;  %v2056_v16 = vadd.f32 %v5459_v9, %v1854_v8  ;;  %v975_v18 = vpop.f32.mrb[82].mxu0  ;;  %v1231_v41 = vpop.f32.mrb[82].mxu1 }
 0x1f1   : > { %v1343_v27 = vpack.c.bf16 %v975_v18, %v972_v58  ;;  %v1375_v46 = vpack.c.bf16 %v1231_v41, %v1228_v62  ;;  %v977_v40 = vpop.f32.mrb[83].mxu0  ;;  %v1233_v28 = vpop.f32.mrb[83].mxu1  ;;  %v1636_v34 = vunpack.c.h.bf16 %v5512_v10 }
 0x1f2   : > { %v3777_v52 = vmul.f32 -1.442695, %v1994_v15  ;;  %v3839_v26 = vmul.f32 -1.442695, %v2056_v16  ;;  %1793 = vadd.xlane.f32.xlu0 %v1631_v20  ;;  %1927 = vadd.xlane.f32.xlu1 %v1698_v53 }
 0x1f3   : > { %v1416_v56 = vadd.bf16 %v5280_v22, %v1343_v27  ;;  %v1732_v35 = vpop.xlane.xlu1 %1731  ;;  %v1858_v37 = vpop.xlane.xlu0 %1857  ;;  %v1448_v24 = vadd.bf16 %v5280_v22, %v1375_v46 }
 0x1f4   : > { %4005 = vpow2.f32 %v3777_v52  ;;  %v1995_v44 = vadd.f32 %v5459_v9, %v1732_v35  ;;  %v2058_v23 = vadd.f32 %v5459_v9, %v1858_v37 }
 0x1f5   : > { %4007 = vpow2.f32 %v3839_v26  ;;  %v1480_v49 = vmax.bf16 %v4620_v0, %v1416_v56  ;;  %v1512_v50 = vmax.bf16 %v4620_v0, %v1448_v24  ;;  %v980_v54 = vpop.f32.mrb[84].mxu0  ;;  %v1236_v55 = vpop.f32.mrb[84].mxu1  ;;  %v1635_v56 = vunpack.c.l.bf16 %v5512_v10 }
 0x1f6   : > { %v4000_v13 = vpop.eup %3999  ;;  %v3778_v17 = vmul.f32 -1.442695, %v1995_v44  ;;  %v982_v48 = vpop.f32.mrb[85].mxu0  ;;  %1797 = vadd.xlane.f32.xlu0 %v1633_v42  ;;  %1803 = vadd.xlane.f32.xlu1 %v1636_v34  ;;  %v3841_v62 = vmul.f32 -1.442695, %v2058_v23  ;;  %v3099_v23 = vadd.s32 4294967200, %v5464_v14  ;;  %v5571_v10 = vsub.s32 %v3092_v33, %v4729_v7 }
 0x1f7   : > { %v1238_v25 = vpop.f32.mrb[85].mxu1  ;;  %v4002_v30 = vpop.eup %4001  ;;  %v2504_v58 = vadd.f32 1.0, %v4000_v13  ;;  %v5550_v63 = vmul.bf16 %v5287_v45, %v1480_v49  ;;  %v5553_v1 = vmul.bf16 %v5287_v45, %v1512_v50 }
 0x1f8   : > { %v1860_v51 = vpop.xlane.xlu1 %1859  ;;  %v1734_v59 = vpop.xlane.xlu0 %1733  ;;  %v2569_v53 = vadd.f32 1.0, %v4002_v30  ;;  %4009 = vpow2.f32 %v3778_v17 }
 0x1f9   : > { %v2059_v21 = vadd.f32 %v5459_v9, %v1860_v51  ;;  %v1996_v2 = vadd.f32 %v5459_v9, %v1734_v59  ;;  %v983_v5 = vpop.f32.mrb[86].mxu0  ;;  %v1239_v8 = vpop.f32.mrb[86].mxu1  ;;  %4011 = vrcp.f32 %v2504_v58  ;;  %v1638_v12 = vunpack.c.h.bf16 %v5550_v63 }
 0x1fa   : > { %v1344_v60 = vpack.c.bf16 %v983_v5, %v980_v54  ;;  %v1376_v15 = vpack.c.bf16 %v1239_v8, %v1236_v55  ;;  %v985_v16 = vpop.f32.mrb[87].mxu0  ;;  %v1241_v18 = vpop.f32.mrb[87].mxu1  ;;  %4013 = vrcp.f32 %v2569_v53  ;;  %1925 = vadd.xlane.f32.xlu0 %v1697_v57  ;;  %v1702_v46 = vunpack.c.h.bf16 %v5553_v1 }
 0x1fb   : > { %v4004_v20 = vpop.eup %4003  ;;  %v3842_v41 = vmul.f32 -1.442695, %v2059_v21  ;;  %v3779_v27 = vmul.f32 -1.442695, %v1996_v2  ;;  %4015 = vpow2.f32 %v3841_v62  ;;  %1807 = vadd.xlane.f32.xlu1 %v1638_v12  ;;  %v1699_v54 = vunpack.c.l.bf16 %v5546_v31 }
 0x1fc   : > { %v2505_v40 = vadd.f32 1.0, %v4004_v20  ;;  %v1417_v28 = vadd.bf16 %v5280_v22, %v1344_v60  ;;  %v1736_v29 = vpop.xlane.xlu1 %1735  ;;  %v1862_v52 = vpop.xlane.xlu0 %1861  ;;  %v1449_v26 = vadd.bf16 %v5280_v22, %v1376_v15  ;;  %v5585_v60 = vsub.s32 %v3099_v23, %v4729_v7 }
 0x1fd   : > { %4017 = vpow2.f32 %v3842_v41  ;;  %v1997_v32 = vadd.f32 %v5459_v9, %v1736_v29  ;;  %v2060_v34 = vadd.f32 %v5459_v9, %v1862_v52  ;;  %v988_v24 = vpop.f32.mrb[88].mxu0  ;;  %v5566_v44 = vpop.f32.mrb[88].mxu1  ;;  %v5603_v23 = vadd.s32 4294967184, %v5464_v14 }
 0x1fe   : > { %4019 = vrcp.f32 %v2505_v40  ;;  %v1481_v35 = vmax.bf16 %v4620_v0, %v1417_v28  ;;  %v1513_v37 = vmax.bf16 %v4620_v0, %v1449_v26  ;;  %v4006_v42 = vpop.eup %4005  ;;  %v990_v50 = vpop.f32.mrb[89].mxu0  ;;  %1801 = vadd.xlane.f32.xlu0 %v1635_v56 }
 0x1ff   : > { %4021 = vpow2.f32 %v3779_v27  ;;  %v3780_v49 = vmul.f32 -1.442695, %v1997_v32  ;;  %v1246_v55 = vpop.f32.mrb[89].mxu1  ;;  %v4008_v13 = vpop.eup %4007  ;;  %v2506_v17 = vadd.f32 1.0, %v4006_v42  ;;  %v3843_v48 = vmul.f32 -1.442695, %v2060_v34  ;;  %1935 = vadd.xlane.f32.xlu1 %v1702_v46 }
 0x200   : > { %v1864_v57 = vpop.xlane.xlu1 %1863  ;;  %v1738_v25 = vpop.xlane.xlu0 %1737  ;;  %v5574_v30 = vmul.bf16 %v5287_v45, %v1481_v35  ;;  %v5577_v58 = vmul.bf16 %v5287_v45, %v1513_v37  ;;  %v2568_v62 = vadd.f32 1.0, %v4008_v13  ;;  %v1700_v32 = vunpack.c.h.bf16 %v5546_v31 }
 0x201   : > { %4023 = vpow2.f32 %v3780_v49  ;;  %v2061_v51 = vadd.f32 %v5459_v9, %v1864_v57  ;;  %v1998_v33 = vadd.f32 %v5459_v9, %v1738_v25  ;;  %v991_v59 = vpop.f32.mrb[90].mxu0  ;;  %v5581_v53 = vpop.f32.mrb[90].mxu1  ;;  %v1637_v31 = vunpack.c.l.bf16 %v5550_v63 }
 0x202   : > { %4025 = vrcp.f32 %v2506_v17  ;;  %v1345_v21 = vpack.c.bf16 %v991_v59, %v988_v24  ;;  %v1640_v2 = vunpack.c.h.bf16 %v5574_v30  ;;  %v993_v5 = vpop.f32.mrb[91].mxu0  ;;  %v1249_v8 = vpop.f32.mrb[91].mxu1  ;;  %1929 = vadd.xlane.f32.xlu0 %v1699_v54  ;;  %v1377_v18 = vpack.c.bf16 %v5581_v53, %v5566_v44 }
 0x203   : > { %v4010_v12 = vpop.eup %4009  ;;  %4027 = vrcp.f32 %v2568_v62  ;;  %v3844_v15 = vmul.f32 -1.442695, %v2061_v51  ;;  %v3781_v16 = vmul.f32 -1.442695, %v1998_v33  ;;  %v1704_v28 = vunpack.c.h.bf16 %v5577_v58 }
 0x204   : > { %v4012_v20 = vpop.eup %4011  ;;  %v2507_v41 = vadd.f32 1.0, %v4010_v12  ;;  %4029 = vpow2.f32 %v3843_v48  ;;  %v1418_v27 = vadd.bf16 %v5280_v22, %v1345_v21  ;;  %1811 = vadd.xlane.f32.xlu1 %v1640_v2  ;;  %v1740_v46 = vpop.xlane.xlu1 %1739  ;;  %v5600_v24 = vadd.s32 4294967192, %v5464_v14 }
 0x205   : > { %v1866_v40 = vpop.xlane.xlu0 %1865  ;;  %v5591_v29 = vpop.eup %4013  ;;  %4031 = vpow2.f32 %v3844_v15  ;;  %v1999_v52 = vadd.f32 %v5459_v9, %v1740_v46  ;;  %v3021_v13 = vrot.slane %v4012_v20, %v5474_v3 }
 0x206   : > { %v2062_v26 = vadd.f32 %v5459_v9, %v1866_v40  ;;  %v4016_v34 = vpop.eup %4015  ;;  %4033 = vrcp.f32 %v2507_v41  ;;  %v1482_v56 = vmax.bf16 %v4620_v0, %v1418_v27  ;;  %v996_v35 = vpop.f32.mrb[92].mxu0  ;;  %1931 = vadd.xlane.f32.xlu0 %v1700_v32 }
 0x207   : > { %v5597_v37 = vpop.f32.mrb[92].mxu1  ;;  %v4018_v42 = vpop.eup %4017  ;;  %v2570_v49 = vadd.f32 1.0, %v4016_v34  ;;  %4035 = vpow2.f32 %v3781_v16  ;;  %v3782_v50 = vmul.f32 -1.442695, %v1999_v52 }
 0x208   : > { %v998_v54 = vpop.f32.mrb[93].mxu0  ;;  %v4020_v55 = vpop.eup %4019  ;;  %v2571_v17 = vadd.f32 1.0, %v4018_v42  ;;  %v3845_v48 = vmul.f32 -1.442695, %v2062_v26  ;;  %1939 = vadd.xlane.f32.xlu1 %v1704_v28  ;;  %v5608_v62 = vmul.bf16 %v5287_v45, %v1482_v56 }
 0x209   : > { %v1868_v57 = vpop.xlane.xlu1 %1867  ;;  %v1742_v25 = vpop.xlane.xlu0 %1741  ;;  %v3026_v33 = vrot.slane %v4020_v55, %v5489_v47  ;;  %4037 = vrcp.f32 %v2570_v49 }
 0x20a   : > { %v4022_v51 = vpop.eup %4021  ;;  %v2063_v59 = vadd.f32 %v5459_v9, %v1868_v57  ;;  %v2000_v21 = vadd.f32 %v5459_v9, %v1742_v25  ;;  %v999_v63 = vpop.f32.mrb[94].mxu0  ;;  %4039 = vrcp.f32 %v2571_v17  ;;  %v1642_v12 = vunpack.c.h.bf16 %v5608_v62  ;;  %1805 = vadd.xlane.f32.xlu0 %v1637_v31 }
 0x20b   : > { %v1254_v2 = vpop.f32.mrb[93].mxu1  ;;  %v2508_v5 = vadd.f32 1.0, %v4022_v51  ;;  %v1346_v8 = vpack.c.bf16 %v999_v63, %v996_v35  ;;  %v1001_v16 = vpop.f32.mrb[95].mxu0  ;;  %v5615_v41 = vsel %vm3027_vm0, %v3026_v33, %v3021_v13  ;;  %4041 = vpow2.f32 %v3782_v50 }
 0x20c   : > { %v1255_v15 = vpop.f32.mrb[94].mxu1  ;;  %v4024_v20 = vpop.eup %4023  ;;  %v3846_v27 = vmul.f32 -1.442695, %v2063_v59  ;;  %v3783_v46 = vmul.f32 -1.442695, %v2000_v21  ;;  %1815 = vadd.xlane.f32.xlu1 %v1642_v12  ;;  %v1701_v50 = vunpack.c.l.bf16 %v5553_v1  ;;  %v3371_v31 = vrot.slane %v5591_v29, %v5489_v47 }
 0x20d   : > { %v1257_v40 = vpop.f32.mrb[95].mxu1  ;;  %v5617_v28 = vpop.eup %4025  ;;  %4043 = vrcp.f32 %v2508_v5  ;;  %v2509_v52 = vadd.f32 1.0, %v4024_v20  ;;  %v1419_v26 = vadd.bf16 %v5280_v22, %v1346_v8  ;;  %v1378_v56 = vpack.c.bf16 %v1255_v15, %v5597_v37 }
 0x20e   : > { %v1744_v32 = vpop.xlane.xlu1 %1743  ;;  %v1870_v34 = vpop.xlane.xlu0 %1869  ;;  %4045 = vpow2.f32 %v3845_v48  ;;  %v1639_v37 = vunpack.c.l.bf16 %v5574_v30  ;;  %v1450_v1 = vadd.bf16 %v5280_v22, %v1377_v18  ;;  %1933 = vadd.xlane.f32.xlu0 %v1701_v50  ;;  %v3033_v21 = vrot.slane %v5617_v28, %v5493_v61 }
 0x20f   : > { %v5621_v35 = vpop.eup %4027  ;;  %v2001_v42 = vadd.f32 %v5459_v9, %v1744_v32  ;;  %v2064_v49 = vadd.f32 %v5459_v9, %v1870_v34  ;;  %4047 = vrcp.f32 %v2509_v52  ;;  %v1483_v55 = vmax.bf16 %v4620_v0, %v1419_v26  ;;  %v5629_v13 = vpop.f32.mrb[96].mxu0 }
 0x210   : > { %v4030_v54 = vpop.eup %4029  ;;  %v5632_v17 = vpop.f32.mrb[96].mxu1  ;;  %4049 = vpow2.f32 %v3846_v27  ;;  %v3367_v30 = vrot.slane %v5621_v35, %v5474_v3  ;;  %v1451_v53 = vadd.bf16 %v5280_v22, %v1378_v56  ;;  %v1703_v50 = vunpack.c.l.bf16 %v5577_v58 }
 0x211   : > { %v4032_v48 = vpop.eup %4031  ;;  %v2572_v57 = vadd.f32 1.0, %v4030_v54  ;;  %v3784_v25 = vmul.f32 -1.442695, %v2001_v42  ;;  %v1006_v51 = vpop.f32.mrb[97].mxu0  ;;  %4051 = vpow2.f32 %v3783_v46  ;;  %v3847_v44 = vmul.f32 -1.442695, %v2064_v49 }
 0x212   : > { %v1262_v33 = vpop.f32.mrb[97].mxu1  ;;  %v4034_v59 = vpop.eup %4033  ;;  %v2573_v63 = vadd.f32 1.0, %v4032_v48  ;;  %v5648_v27 = vmul.bf16 %v5287_v45, %v1483_v55  ;;  %1809 = vadd.xlane.f32.xlu0 %v1639_v37  ;;  %v1515_v55 = vmax.bf16 %v4620_v0, %v1451_v53  ;;  %v5666_v51 = vmax.bf16 %v4620_v0, %v1450_v1 }
 0x213   : > { %v1872_v2 = vpop.xlane.xlu1 %1871  ;;  %v1746_v5 = vpop.xlane.xlu0 %1745  ;;  %4053 = vrcp.f32 %v2572_v57  ;;  %v3040_v52 = vrot.slane %v4034_v59, %v5499_v4  ;;  %v3035_v57 = vsel %vm3034_vm1, %v3033_v21, %v5615_v41 }
 0x214   : > { %v4036_v8 = vpop.eup %4035  ;;  %v2065_v18 = vadd.f32 %v5459_v9, %v1872_v2  ;;  %v1007_v12 = vpop.f32.mrb[98].mxu0  ;;  %4055 = vrcp.f32 %v2573_v63  ;;  %v2002_v20 = vadd.f32 %v5459_v9, %v1746_v5  ;;  %v1644_v35 = vunpack.c.h.bf16 %v5648_v27 }
 0x215   : > { %v5644_v15 = vpop.f32.mrb[98].mxu1  ;;  %v2510_v16 = vadd.f32 1.0, %v4036_v8  ;;  %v1009_v46 = vpop.f32.mrb[99].mxu0  ;;  %4057 = vpow2.f32 %v3784_v25  ;;  %v1347_v32 = vpack.c.bf16 %v1007_v12, %v5629_v13  ;;  %v3372_v63 = vsel %vm3027_vm0, %v3371_v31, %v3367_v30 }
 0x216   : > { %v1265_v40 = vpop.f32.mrb[99].mxu1  ;;  %v5650_v28 = vpop.eup %4037  ;;  %v3848_v26 = vmul.f32 -1.442695, %v2065_v18  ;;  %v3785_v56 = vmul.f32 -1.442695, %v2002_v20  ;;  %1819 = vadd.xlane.f32.xlu1 %v1644_v35  ;;  %v3042_v2 = vsel %vm3041_vm2, %v3040_v52, %v3035_v57  ;;  %1937 = vadd.xlane.f32.xlu0 %v1703_v50 }
 0x217   : > { %v5654_v34 = vpop.eup %4039  ;;  %4059 = vrcp.f32 %v2510_v16  ;;  %v1748_v42 = vpop.xlane.xlu1 %1747  ;;  %v3376_v8 = vrot.slane %v5650_v28, %v5493_v61  ;;  %v1420_v30 = vadd.bf16 %v5280_v22, %v1347_v32  ;;  %v1588_v16 = vmul.bf16 %v5287_v45, %v1515_v55 }
 0x218   : > { %v1874_v49 = vpop.xlane.xlu0 %1873  ;;  %v4042_v54 = vpop.eup %4041  ;;  %4061 = vpow2.f32 %v3847_v44  ;;  %v2003_v48 = vadd.f32 %v5459_v9, %v1748_v42  ;;  %v3381_v31 = vrot.slane %v5654_v34, %v5499_v4 }
 0x219   : > { %v2066_v37 = vadd.f32 %v5459_v9, %v1874_v49  ;;  %v5661_v13 = vpop.eup %4043  ;;  %v2511_v25 = vadd.f32 1.0, %v4042_v54  ;;  %4063 = vpow2.f32 %v3848_v26  ;;  %v5668_v58 = vpop.f32.mrb[100].mxu0  ;;  %v1707_v49 = vunpack.c.l.bf16 %v1588_v16 }
 0x21a   : > { %v5670_v33 = vpop.f32.mrb[100].mxu1  ;;  %v4046_v59 = vpop.eup %4045  ;;  %4065 = vpow2.f32 %v3785_v56  ;;  %v3786_v41 = vmul.f32 -1.442695, %v2003_v48  ;;  %v3047_v32 = vrot.slane %v5661_v13, %v5503_v36  ;;  %v3377_v54 = vsel %vm3034_vm1, %v3376_v8, %v3372_v63 }
 0x21b   : > { %v1014_v21 = vpop.f32.mrb[101].mxu0  ;;  %v1270_v1 = vpop.f32.mrb[101].mxu1  ;;  %4067 = vrcp.f32 %v2511_v25  ;;  %v2574_v44 = vadd.f32 1.0, %v4046_v59  ;;  %v3849_v53 = vmul.f32 -1.442695, %v2066_v37  ;;  %1945 = vadd.xlane.f32.xlu1 %v1707_v49  ;;  %v1379_v13 = vpack.c.bf16 %v5644_v15, %v5632_v17 }
 0x21c   : > { %v5677_v5 = vpop.eup %4047  ;;  %v1876_v18 = vpop.xlane.xlu1 %1875  ;;  %4069 = vpow2.f32 %v3786_v41  ;;  %v1641_v41 = vunpack.c.l.bf16 %v5608_v62  ;;  %v3382_v63 = vsel %vm3041_vm2, %v3381_v31, %v3377_v54  ;;  %v1708_v8 = vunpack.c.h.bf16 %v1588_v16 }
 0x21d   : > { %v1750_v12 = vpop.xlane.xlu0 %1749  ;;  %v4050_v29 = vpop.eup %4049  ;;  %4071 = vrcp.f32 %v2574_v44  ;;  %v2067_v52 = vadd.f32 %v5459_v9, %v1876_v18  ;;  %v1484_v17 = vmax.bf16 %v4620_v0, %v1420_v30 }
 0x21e   : > { %v5685_v20 = vpop.f32.mrb[102].mxu0  ;;  %v5687_v46 = vpop.f32.mrb[102].mxu1  ;;  %v2575_v28 = vadd.f32 1.0, %v4050_v29  ;;  %v2004_v26 = vadd.f32 %v5459_v9, %v1750_v12  ;;  %4073 = vpow2.f32 %v3849_v53  ;;  %v3049_v12 = vsel %vm3048_vm3, %v3047_v32, %v3042_v2  ;;  %1813 = vadd.xlane.f32.xlu0 %v1641_v41 }
 0x21f   : > { %v4052_v40 = vpop.eup %4051  ;;  %v1017_v56 = vpop.f32.mrb[103].mxu0  ;;  %v3850_v55 = vmul.f32 -1.442695, %v2067_v52  ;;  %v3054_v29 = vrot.slane %v5677_v5, %v5509_v6  ;;  %1947 = vadd.xlane.f32.xlu1 %v1708_v8  ;;  %v5732_v41 = vmul.bf16 %v5287_v45, %v1484_v17 }
 0x220   : > { %v1273_v35 = vpop.f32.mrb[103].mxu1  ;;  %v4054_v34 = vpop.eup %4053  ;;  %v2512_v42 = vadd.f32 1.0, %v4052_v40  ;;  %4075 = vrcp.f32 %v2575_v28  ;;  %v3787_v48 = vmul.f32 -1.442695, %v2004_v26 }
 0x221   : > { %v5693_v50 = vpop.eup %4055  ;;  %v1752_v37 = vpop.xlane.xlu1 %1751  ;;  %v3386_v59 = vrot.slane %v4054_v34, %v5503_v36  ;;  %v1348_v35 = vpack.c.bf16 %v5685_v20, %v5668_v58  ;;  %v5729_v58 = vmul.bf16 %v5287_v45, %v5666_v51 }
 0x222   : > { %v1878_v57 = vpop.xlane.xlu0 %1877  ;;  %v4058_v25 = vpop.eup %4057  ;;  %4077 = vrcp.f32 %v2512_v42  ;;  %v2005_v16 = vadd.f32 %v5459_v9, %v1752_v37  ;;  %v3391_v5 = vrot.slane %v5693_v50, %v5509_v6  ;;  %v1452_v50 = vadd.bf16 %v5280_v22, %v1379_v13 }
 0x223   : > { %v5700_v21 = vpop.eup %4059  ;;  %v2513_v1 = vadd.f32 1.0, %v4058_v25  ;;  %4079 = vpow2.f32 %v3850_v55  ;;  %v5703_v44 = vpop.f32.mrb[104].mxu0  ;;  %v2068_v28 = vadd.f32 %v5459_v9, %v1878_v57  ;;  %v3387_v2 = vsel %vm3048_vm3, %v3386_v59, %v3382_v63 }
 0x224   : > { %v5705_v53 = vpop.f32.mrb[104].mxu1  ;;  %v4062_v18 = vpop.eup %4061  ;;  %4081 = vpow2.f32 %v3787_v48  ;;  %v3061_v49 = vrot.slane %v5700_v21, %v5515_v11  ;;  %v3788_v55 = vmul.f32 -1.442695, %v2005_v16  ;;  %v3056_v13 = vsel %vm3055_vm4, %v3054_v29, %v3049_v12 }
 0x225   : > { %v1022_v62 = vpop.f32.mrb[105].mxu0  ;;  %v1278_v15 = vpop.f32.mrb[105].mxu1  ;;  %4083 = vrcp.f32 %v2513_v1  ;;  %v2576_v40 = vadd.f32 1.0, %v4062_v18  ;;  %v3851_v57 = vmul.f32 -1.442695, %v2068_v28  ;;  %v3392_v18 = vsel %vm3055_vm4, %v3391_v5, %v3387_v2 }
 0x226   : > { %v4064_v31 = vpop.eup %4063  ;;  %v1880_v52 = vpop.xlane.xlu1 %1879  ;;  %v1421_v51 = vadd.bf16 %v5280_v22, %v1348_v35  ;;  %v1705_v17 = vunpack.c.l.bf16 %v5729_v58  ;;  %v1516_v29 = vmax.bf16 %v4620_v0, %v1452_v50 }
 0x227   : > { %v1754_v26 = vpop.xlane.xlu0 %1753  ;;  %v4066_v56 = vpop.eup %4065  ;;  %v2577_v30 = vadd.f32 1.0, %v4064_v31  ;;  %4085 = vrcp.f32 %v2576_v40  ;;  %v2069_v21 = vadd.f32 %v5459_v9, %v1880_v52  ;;  %v1646_v31 = vunpack.c.h.bf16 %v5732_v41 }
 0x228   : > { %v5718_v34 = vpop.f32.mrb[106].mxu0  ;;  %v5720_v32 = vpop.f32.mrb[106].mxu1  ;;  %v2514_v54 = vadd.f32 1.0, %v4066_v56  ;;  %1941 = vadd.xlane.f32.xlu0 %v1705_v17  ;;  %v2006_v35 = vadd.f32 %v5459_v9, %v1754_v26 }
 0x229   : > { %v5722_v42 = vpop.eup %4067  ;;  %v1025_v48 = vpop.f32.mrb[107].mxu0  ;;  %4087 = vrcp.f32 %v2577_v30  ;;  %v3852_v52 = vmul.f32 -1.442695, %v2069_v21  ;;  %v3063_v30 = vsel %vm3062_vm5, %v3061_v49, %v3056_v13  ;;  %1823 = vadd.xlane.f32.xlu1 %v1646_v31  ;;  %v1485_v49 = vmax.bf16 %v4620_v0, %v1421_v51 }
 0x22a   : > { %v4070_v37 = vpop.eup %4069  ;;  %v1281_v20 = vpop.f32.mrb[107].mxu1  ;;  %4089 = vrcp.f32 %v2514_v54  ;;  %v1349_v54 = vpack.c.bf16 %v5718_v34, %v5703_v44  ;;  %v3068_v50 = vrot.slane %v5722_v42, %v5523_v19  ;;  %v3789_v34 = vmul.f32 -1.442695, %v2006_v35 }
 0x22b   : > { %v4072_v25 = vpop.eup %4071  ;;  %v2515_v59 = vadd.f32 1.0, %v4070_v37  ;;  %v1756_v63 = vpop.xlane.xlu1 %1755  ;;  %4091 = vpow2.f32 %v3788_v55  ;;  %v1706_v21 = vunpack.c.h.bf16 %v5729_v58  ;;  %v5769_v42 = vmul.bf16 %v5287_v45, %v1516_v29 }
 0x22c   : > { %v5735_v1 = vpop.xlane.xlu0 %1881  ;;  %v4074_v8 = vpop.eup %4073  ;;  %v3396_v12 = vrot.slane %v4072_v25, %v5515_v11  ;;  %v2007_v51 = vadd.f32 %v5459_v9, %v1756_v63  ;;  %v1380_v58 = vpack.c.bf16 %v5687_v46, %v5670_v33 }
 0x22d   : > { %v4076_v62 = vpop.eup %4075  ;;  %4093 = vrcp.f32 %v2515_v59  ;;  %v2578_v15 = vadd.f32 1.0, %v4074_v8  ;;  %v5742_v40 = vpop.f32.mrb[108].mxu0  ;;  %1943 = vadd.xlane.f32.xlu0 %v1706_v21  ;;  %v1710_v63 = vunpack.c.h.bf16 %v5769_v42 }
 0x22e   : > { %v5744_v16 = vpop.f32.mrb[108].mxu1  ;;  %v5746_v28 = vpop.eup %4077  ;;  %4095 = vpow2.f32 %v3851_v57  ;;  %v3401_v59 = vrot.slane %v4076_v62, %v5523_v19  ;;  %v1422_v62 = vadd.bf16 %v5280_v22, %v1349_v54  ;;  %v3790_v54 = vmul.f32 -1.442695, %v2007_v51 }
 0x22f   : > { %v1030_v56 = vpop.f32.mrb[109].mxu0  ;;  %v1286_v2 = vpop.f32.mrb[109].mxu1  ;;  %4097 = vrcp.f32 %v2578_v15  ;;  %v3397_v15 = vsel %vm3062_vm5, %v3396_v12, %v3392_v18  ;;  %v3075_v31 = vrot.slane %v5746_v28, %v5531_v38  ;;  %1951 = vadd.xlane.f32.xlu1 %v1710_v63 }
 0x230   : > { %v4080_v5 = vpop.eup %4079  ;;  %v5754_v55 = vpop.xlane.xlu1 %1759  ;;  %4099 = vpow2.f32 %v3852_v52  ;;  %v3070_v2 = vsel %vm3069_vm6, %v3068_v50, %v3063_v30 }
 0x231   : > { %v5756_v48 = vpop.xlane.xlu0 %1883  ;;  %v4082_v37 = vpop.eup %4081  ;;  %v2579_v57 = vadd.f32 1.0, %v4080_v5  ;;  %v3402_v5 = vsel %vm3069_vm6, %v3401_v59, %v3397_v15  ;;  %v3077_v50 = vsel %vm3076_vm7, %v3075_v31, %v3070_v2 }
 0x232   : > { %v5761_v20 = vpop.f32.mrb[110].mxu0  ;;  %v5763_v25 = vpop.f32.mrb[110].mxu1  ;;  %v2516_v44 = vadd.f32 1.0, %v4082_v37 }
 0x233   : > { %v4084_v26 = vpop.eup %4083  ;;  %v1033_v8 = vpop.f32.mrb[111].mxu0  ;;  %4101 = vrcp.f32 %v2579_v57 }
 0x234   : > { %v1289_v13 = vpop.f32.mrb[111].mxu1  ;;  %v4086_v17 = vpop.eup %4085  ;;  %4103 = vrcp.f32 %v2516_v44  ;;  %v3082_v12 = vrot.slane %v4084_v26, %v5534_v39  ;;  %v1643_v44 = vunpack.c.l.bf16 %v5648_v27 }
 0x235   : > { %v5777_v52 = vpop.xlane.xlu0 %1757  ;;  %v4088_v18 = vpop.eup %4087  ;;  %v3406_v29 = vrot.slane %v4086_v17, %v5531_v38  ;;  %4105 = vpow2.f32 %v3789_v34  ;;  %v5791_v34 = vmul.bf16 %v5287_v45, %v1485_v49 }
 0x236   : > { %v5782_v56 = vpop.xlane.xlu1 %1885  ;;  %v4090_v28 = vpop.eup %4089  ;;  %v3411_v35 = vrot.slane %v4088_v18, %v5534_v39  ;;  %4107 = vpow2.f32 %v3790_v54  ;;  %v3084_v27 = vsel %vm3083_vm8, %v3082_v12, %v3077_v50  ;;  %v1486_v18 = vmax.bf16 %v4620_v0, %v1422_v62  ;;  %1817 = vadd.xlane.f32.xlu0 %v1643_v44 }
 0x237   : > { %v4092_v37 = vpop.eup %4091  ;;  %v3407_v57 = vsel %vm3076_vm7, %v3406_v29, %v3402_v5  ;;  %v3089_v26 = vrot.slane %v4090_v28, %v5542_v43  ;;  %v5793_v21 = vpop.f32.mrb[112].mxu0  ;;  %v1648_v29 = vunpack.c.h.bf16 %v5791_v34  ;;  %v2009_v5 = vadd.f32 %v5459_v9, %v5754_v55 }
 0x238   : > { %v5795_v8 = vpop.f32.mrb[112].mxu1  ;;  %v4094_v30 = vpop.eup %4093  ;;  %v3412_v59 = vsel %vm3083_vm8, %v3411_v35, %v3407_v57  ;;  %v2517_v13 = vadd.f32 1.0, %v4092_v37  ;;  %v1350_v57 = vpack.c.bf16 %v5761_v20, %v5742_v40  ;;  %v1381_v44 = vpack.c.bf16 %v5720_v32, %v5705_v53 }
 0x239   : > { %v1038_v15 = vpop.f32.mrb[113].mxu0  ;;  %v5799_v51 = vpop.xlane.xlu0 %1887  ;;  %v3096_v49 = vrot.slane %v4094_v30, %v5571_v10  ;;  %v3091_v28 = vsel %vm3090_vm9, %v3089_v26, %v3084_v27  ;;  %1827 = vadd.xlane.f32.xlu1 %v1648_v29  ;;  %v3792_v50 = vmul.f32 -1.442695, %v2009_v5  ;;  %v5820_v27 = vsub.s32 %v5600_v24, %v4729_v7 }
 0x23a   : > { %v4096_v17 = vpop.eup %4095  ;;  %v5805_v63 = vpop.f32.mrb[114].mxu0  ;;  %4109 = vrcp.f32 %v2517_v13  ;;  %v5824_v40 = vsub.s32 %v5603_v23, %v4729_v7  ;;  %v1423_v20 = vadd.bf16 %v5280_v22, %v1350_v57  ;;  %v5836_v23 = vadd.s32 4294967176, %v5464_v14 }
 0x23b   : > { %v4098_v31 = vpop.eup %4097  ;;  %v2580_v2 = vadd.f32 1.0, %v4096_v17  ;;  %v1294_v35 = vpop.f32.mrb[113].mxu1  ;;  %v3098_v37 = vsel %vm3097_vm10, %v3096_v49, %v3091_v28  ;;  %v1645_v49 = vunpack.c.l.bf16 %v5732_v41  ;;  %v5830_v28 = vmul.bf16 %v5287_v45, %v1486_v18 }
 0x23c   : > { %v1041_v12 = vpop.f32.mrb[115].mxu0  ;;  %v4100_v54 = vpop.eup %4099  ;;  %v3416_v62 = vrot.slane %v4098_v31, %v5542_v43  ;;  %v1453_v41 = vadd.bf16 %v5280_v22, %v1380_v58  ;;  %v1487_v33 = vmax.bf16 %v4620_v0, %v1423_v20  ;;  %v2072_v58 = vadd.f32 %v5459_v9, %v5782_v56 }
 0x23d   : > { %v1764_v26 = vpop.xlane.xlu1 %1763  ;;  %v5816_v30 = vpop.f32.mrb[114].mxu1  ;;  %4111 = vrcp.f32 %v2580_v2  ;;  %v2581_v55 = vadd.f32 1.0, %v4100_v54  ;;  %v2008_v2 = vadd.f32 %v5459_v9, %v5777_v52  ;;  %1821 = vadd.xlane.f32.xlu0 %v1645_v49  ;;  %v1382_v57 = vpack.c.bf16 %v5763_v25, %v5744_v16 }
 0x23e   : > { %v1762_v13 = vpop.xlane.xlu0 %1761  ;;  %v1297_v15 = vpop.f32.mrb[115].mxu1  ;;  %v3417_v5 = vsel %vm3090_vm9, %v3416_v62, %v3412_v59  ;;  %v1650_v59 = vunpack.c.h.bf16 %v5830_v28  ;;  %v2073_v49 = vadd.f32 %v5459_v9, %v5799_v51  ;;  %v2011_v20 = vadd.f32 %v5459_v9, %v1764_v26 }
 0x23f   : > { %v4102_v17 = vpop.eup %4101  ;;  %4113 = vrcp.f32 %v2581_v55  ;;  %v5842_v35 = vpop.f32.mrb[116].mxu0  ;;  %v3791_v46 = vmul.f32 -1.442695, %v2008_v2  ;;  %v3855_v56 = vmul.f32 -1.442695, %v2072_v58  ;;  %v1455_v16 = vadd.bf16 %v5280_v22, %v1382_v57 }
 0x240   : > { %v4104_v29 = vpop.eup %4103  ;;  %v3421_v31 = vrot.slane %v4102_v17, %v5571_v10  ;;  %4115 = vpow2.f32 %v3792_v50  ;;  %v5844_v18 = vpop.f32.mrb[116].mxu1  ;;  %1831 = vadd.xlane.f32.xlu1 %v1650_v59  ;;  %v1709_v17 = vunpack.c.l.bf16 %v5769_v42  ;;  %v3856_v42 = vmul.f32 -1.442695, %v2073_v49 }
 0x241   : > { %v4106_v24 = vpop.eup %4105  ;;  %v3103_v52 = vrot.slane %v4104_v29, %v5585_v60  ;;  %v1046_v14 = vpop.f32.mrb[117].mxu0  ;;  %v1351_v51 = vpack.c.bf16 %v5805_v63, %v5793_v21  ;;  %v5873_v58 = vmul.bf16 %v5287_v45, %v1487_v33  ;;  %v2010_v21 = vadd.f32 %v5459_v9, %v1762_v13 }
 0x242   : > { %v3422_v12 = vsel %vm3097_vm10, %v3421_v31, %v3417_v5  ;;  %v2518_v54 = vadd.f32 1.0, %v4106_v24  ;;  %v5849_v62 = vpop.xlane.xlu0 %1891  ;;  %v1890_v55 = vpop.xlane.xlu1 %1889  ;;  %1949 = vadd.xlane.f32.xlu0 %v1709_v17 }
 0x243   : > { %v5856_v50 = vpop.f32.mrb[118].mxu0  ;;  %v4108_v15 = vpop.eup %4107  ;;  %v3105_v5 = vsel %vm3104_vm11, %v3103_v52, %v3098_v37  ;;  %v1519_v37 = vmax.bf16 %v4620_v0, %v1455_v16  ;;  %v1647_v52 = vunpack.c.l.bf16 %v5791_v34  ;;  %v1652_v17 = vunpack.c.h.bf16 %v5873_v58 }
 0x244   : > { %4117 = vrcp.f32 %v2518_v54  ;;  %v1302_v29 = vpop.f32.mrb[117].mxu1  ;;  %v1049_v31 = vpop.f32.mrb[119].mxu0  ;;  %v2519_v2 = vadd.f32 1.0, %v4108_v15  ;;  %v1517_v54 = vmax.bf16 %v4620_v0, %v1453_v41  ;;  %v1424_v41 = vadd.bf16 %v5280_v22, %v1351_v51 }
 0x245   : > { %4119 = vpow2.f32 %v3791_v46  ;;  %v5863_v25 = vpop.f32.mrb[118].mxu1  ;;  %v4110_v24 = vpop.eup %4109  ;;  %v3794_v46 = vmul.f32 -1.442695, %v2011_v20  ;;  %v3793_v29 = vmul.f32 -1.442695, %v2010_v21  ;;  %v2074_v34 = vadd.f32 %v5459_v9, %v1890_v55  ;;  %1835 = vadd.xlane.f32.xlu1 %v1652_v17 }
 0x246   : > { %v5869_v26 = vpop.xlane.xlu0 %1765  ;;  %v1305_v59 = vpop.f32.mrb[119].mxu1  ;;  %v3110_v14 = vrot.slane %v4110_v24, %v5820_v27  ;;  %4121 = vrcp.f32 %v2519_v2  ;;  %1825 = vadd.xlane.f32.xlu0 %v1647_v52  ;;  %v1383_v24 = vpack.c.bf16 %v5816_v30, %v5795_v8  ;;  %v1590_v55 = vmul.bf16 %v5287_v45, %v1517_v54 }
 0x247   : > { %v4112_v57 = vpop.eup %4111  ;;  %4123 = vpow2.f32 %v3855_v56  ;;  %v5884_v33 = vpop.f32.mrb[120].mxu0  ;;  %v3857_v59 = vmul.f32 -1.442695, %v2074_v34  ;;  %v5904_v8 = vmul.bf16 %v5287_v45, %v1519_v37  ;;  %v2075_v17 = vadd.f32 %v5459_v9, %v5849_v62 }
 0x248   : > { %v5880_v63 = vsel %vm3111_vm12, %v3110_v14, %v3105_v5  ;;  %v3426_v15 = vrot.slane %v4112_v57, %v5585_v60  ;;  %v5886_v49 = vpop.f32.mrb[120].mxu1  ;;  %4125 = vpow2.f32 %v3856_v42  ;;  %v1768_v13 = vpop.xlane.xlu1 %1767  ;;  %v1456_v52 = vadd.bf16 %v5280_v22, %v1383_v24 }
 0x249   : > { %v4114_v20 = vpop.eup %4113  ;;  %v1054_v31 = vpop.f32.mrb[121].mxu0  ;;  %4127 = vpow2.f32 %v3794_v46  ;;  %v1488_v46 = vmax.bf16 %v4620_v0, %v1424_v41  ;;  %v1711_v54 = vunpack.c.l.bf16 %v1590_v55  ;;  %v1454_v37 = vadd.bf16 %v5280_v22, %v1381_v44 }
 0x24a   : > { %v4116_v2 = vpop.eup %4115  ;;  %v3427_v16 = vsel %vm3104_vm11, %v3426_v15, %v3422_v12  ;;  %v3431_v56 = vrot.slane %v4114_v20, %v5820_v27  ;;  %v5893_v5 = vpop.xlane.xlu0 %1893  ;;  %4129 = vpow2.f32 %v3793_v29  ;;  %v5910_v15 = vsub.s32 %v5836_v23, %v4729_v7 }
 0x24b   : > { %v5895_v51 = vpop.f32.mrb[122].mxu0  ;;  %v2521_v42 = vadd.f32 1.0, %v4116_v2  ;;  %v1310_v14 = vpop.f32.mrb[121].mxu1  ;;  %v2013_v20 = vadd.f32 %v5459_v9, %v1768_v13  ;;  %v1716_v31 = vunpack.c.h.bf16 %v5904_v8  ;;  %1953 = vadd.xlane.f32.xlu0 %v1711_v54  ;;  %v3858_v62 = vmul.f32 -1.442695, %v2075_v17 }
 0x24c   : > { %v1057_v57 = vpop.f32.mrb[123].mxu0  ;;  %v5899_v12 = vsel %vm3111_vm12, %v3431_v56, %v3427_v16  ;;  %v5906_v30 = vpop.f32.mrb[122].mxu1  ;;  %v1520_v16 = vmax.bf16 %v4620_v0, %v1456_v52  ;;  %v1352_v56 = vpack.c.bf16 %v5856_v50, %v5842_v35  ;;  %v1712_v24 = vunpack.c.h.bf16 %v1590_v55 }
 0x24d   : > { %v1313_v29 = vpop.f32.mrb[123].mxu1  ;;  %4131 = vrcp.f32 %v2521_v42  ;;  %v3796_v2 = vmul.f32 -1.442695, %v2013_v20  ;;  %1963 = vadd.xlane.f32.xlu1 %v1716_v31  ;;  %v5927_v53 = vmul.bf16 %v5287_v45, %v1488_v46  ;;  %v5929_v32 = vpop.f32.mrb[124].mxu0  ;;  %v1384_v14 = vpack.c.bf16 %v5863_v25, %v5844_v18 }
 0x24e   : > { %v4118_v21 = vpop.eup %4117  ;;  %v5921_v7 = vpop.xlane.xlu0 %1895  ;;  %4133 = vpow2.f32 %v3857_v59  ;;  %v2012_v59 = vadd.f32 %v5459_v9, %v5869_v26  ;;  %v1425_v55 = vadd.bf16 %v5280_v22, %v1352_v56  ;;  %v1649_v56 = vunpack.c.l.bf16 %v5830_v28 }
 0x24f   : > { %v4120_v41 = vpop.eup %4119  ;;  %v3117_v34 = vrot.slane %v4118_v21, %v5824_v40  ;;  %v5931_v44 = vpop.f32.mrb[124].mxu1  ;;  %v1654_v46 = vunpack.c.h.bf16 %v5927_v53  ;;  %1955 = vadd.xlane.f32.xlu0 %v1712_v24  ;;  %v1457_v31 = vadd.bf16 %v5280_v22, %v1384_v14  ;;  %v2076_v28 = vadd.f32 %v5459_v9, %v5893_v5 }
 0x250   : > { %v2520_v23 = vadd.f32 1.0, %v4120_v41  ;;  %v4122_v13 = vpop.eup %4121  ;;  %v1772_v57 = vpop.xlane.xlu1 %1771 }
 0x251   : > { %v3124_v42 = vrot.slane %v4122_v13, %v5910_v15  ;;  %v1062_v52 = vpop.f32.mrb[125].mxu0  ;;  %v4124_v35 = vpop.eup %4123  ;;  %v3119_v50 = vsel %vm3118_vm13, %v3117_v34, %v5880_v63  ;;  %v1518_v63 = vmax.bf16 %v4620_v0, %v1454_v37  ;;  %1839 = vadd.xlane.f32.xlu1 %v1654_v46  ;;  %v3795_v34 = vmul.f32 -1.442695, %v2012_v59 }
 0x252   : > { %4135 = vrcp.f32 %v2520_v23  ;;  %v5942_v21 = vpop.xlane.xlu0 %1769  ;;  %v5944_v54 = vpop.f32.mrb[126].mxu0  ;;  %v2584_v18 = vadd.f32 1.0, %v4124_v35  ;;  %v1489_v37 = vmax.bf16 %v4620_v0, %v1425_v55  ;;  %v2015_v59 = vadd.f32 %v5459_v9, %v1772_v57 }
 0x253   : > { %4137 = vpow2.f32 %v3858_v62  ;;  %v4126_v17 = vpop.eup %4125  ;;  %v5947_v26 = vsel %vm3125_vm14, %v3124_v42, %v3119_v50  ;;  %v1318_v25 = vpop.f32.mrb[125].mxu1  ;;  %1829 = vadd.xlane.f32.xlu0 %v1649_v56  ;;  %v1521_v57 = vmax.bf16 %v4620_v0, %v1457_v31  ;;  %v1385_v56 = vpack.c.bf16 %v5906_v30, %v5886_v49 }
 0x254   : > { %4139 = vpow2.f32 %v3796_v2  ;;  %v1065_v20 = vpop.f32.mrb[127].mxu0  ;;  %v4128_v29 = vpop.eup %4127  ;;  %v2585_v41 = vadd.f32 1.0, %v4126_v17  ;;  %v5955_v2 = vmul.bf16 %v5287_v45, %v1520_v16  ;;  %v1353_v16 = vpack.c.bf16 %v5895_v51, %v5884_v33 }
 0x255   : > { %v5951_v23 = vpop.f32.mrb[126].mxu1  ;;  %v4130_v62 = vpop.eup %4129  ;;  %4141 = vrcp.f32 %v2584_v18  ;;  %v2523_v13 = vadd.f32 1.0, %v4128_v29  ;;  %v3798_v46 = vmul.f32 -1.442695, %v2015_v59  ;;  %v1591_v17 = vmul.bf16 %v5287_v45, %v1518_v63 }
 0x256   : > { %v1776_v24 = vpop.xlane.xlu1 %1775  ;;  %v1321_v42 = vpop.f32.mrb[127].mxu1  ;;  %4143 = vrcp.f32 %v2585_v41  ;;  %v2522_v52 = vadd.f32 1.0, %v4130_v62  ;;  %v1718_v14 = vunpack.c.h.bf16 %v5955_v2  ;;  %v3859_v18 = vmul.f32 -1.442695, %v2076_v28 }
 0x257   : > { %v5959_v35 = vpop.xlane.xlu0 %1897  ;;  %4145 = vrcp.f32 %v2523_v13  ;;  %v4132_v50 = vpop.eup %4131  ;;  %v1426_v25 = vadd.bf16 %v5280_v22, %v1353_v16  ;;  %v1713_v5 = vunpack.c.l.bf16 %v1591_v17  ;;  %v5972_v33 = vmul.bf16 %v5287_v45, %v1489_v37 }
 0x258   : > { %4147 = vrcp.f32 %v2522_v52  ;;  %v4134_v55 = vpop.eup %4133  ;;  %1967 = vadd.xlane.f32.xlu1 %v1718_v14  ;;  %v3134_v63 = vrot.slane %v4132_v50, %v5489_v47  ;;  %v5985_v14 = vmul.bf16 %v5287_v45, %v1521_v57  ;;  %v1458_v16 = vadd.bf16 %v5280_v22, %v1385_v56 }
 0x259   : > { %4149 = vpow2.f32 %v3795_v34  ;;  %v2586_v29 = vadd.f32 1.0, %v4134_v55  ;;  %v2077_v34 = vadd.f32 %v5459_v9, %v5921_v7  ;;  %1957 = vadd.xlane.f32.xlu0 %v1713_v5  ;;  %v1656_v13 = vunpack.c.h.bf16 %v5972_v33 }
 0x25a   : > { %v5969_v20 = vpop.xlane.xlu1 %1779  ;;  %4151 = vpow2.f32 %v3798_v46  ;;  %v1490_v37 = vmax.bf16 %v4620_v0, %v1426_v25  ;;  %v1714_v50 = vunpack.c.h.bf16 %v1591_v17  ;;  %v2017_v46 = vadd.f32 %v5459_v9, %v1776_v24 }
 0x25b   : > { %v5974_v51 = vpop.xlane.xlu0 %1899  ;;  %4153 = vpow2.f32 %v3859_v18  ;;  %v3860_v59 = vmul.f32 -1.442695, %v2077_v34  ;;  %v1720_v30 = vunpack.c.h.bf16 %v5985_v14  ;;  %v2014_v18 = vadd.f32 %v5459_v9, %v5942_v21 }
 0x25c   : > { %v4136_v41 = vpop.eup %4135  ;;  %4155 = vrcp.f32 %v2586_v29  ;;  %1843 = vadd.xlane.f32.xlu1 %v1656_v13  ;;  %v1354_v57 = vpack.c.bf16 %v5944_v54, %v5929_v32  ;;  %v1522_v24 = vmax.bf16 %v4620_v0, %v1458_v16  ;;  %v3800_v21 = vmul.f32 -1.442695, %v2017_v46 }
 0x25d   : > { %v4138_v31 = vpop.eup %4137  ;;  %v3130_v62 = vrot.slane %v4136_v41, %v5474_v3  ;;  %1959 = vadd.xlane.f32.xlu0 %v1714_v50  ;;  %v3797_v41 = vmul.f32 -1.442695, %v2014_v18  ;;  %v1651_v32 = vunpack.c.l.bf16 %v5873_v58  ;;  %v6006_v54 = vmul.bf16 %v5287_v45, %v1490_v37 }
 0x25e   : > { %v4140_v42 = vpop.eup %4139  ;;  %v2587_v52 = vadd.f32 1.0, %v4138_v31  ;;  %v5987_v28 = vpop.xlane.xlu1 %1907  ;;  %v1427_v34 = vadd.bf16 %v5280_v22, %v1354_v57  ;;  %v2078_v58 = vadd.f32 %v5459_v9, %v5959_v35  ;;  %v1386_v37 = vpack.c.bf16 %v5951_v23, %v5931_v44 }
 0x25f   : > { %v2525_v7 = vadd.f32 1.0, %v4140_v42  ;;  %v5991_v55 = vpop.xlane.xlu0 %1773  ;;  %v4142_v49 = vpop.eup %4141  ;;  %v3135_v29 = vsel %vm3027_vm0, %v3134_v63, %v3130_v62  ;;  %v6022_v18 = vmul.bf16 %v5287_v45, %v1522_v24 }
 0x260   : > { %4157 = vrcp.f32 %v2587_v52  ;;  %v4144_v25 = vpop.eup %4143  ;;  %v3446_v5 = vrot.slane %v4142_v49, %v5474_v3  ;;  %1971 = vadd.xlane.f32.xlu1 %v1720_v30  ;;  %v1491_v49 = vmax.bf16 %v4620_v0, %v1427_v34  ;;  %v1715_v30 = vunpack.c.l.bf16 %v5904_v8 }
 0x261   : > { %v4146_v17 = vpop.eup %4145  ;;  %4159 = vpow2.f32 %v3860_v59  ;;  %v3450_v56 = vrot.slane %v4144_v25, %v5489_v47  ;;  %1833 = vadd.xlane.f32.xlu0 %v1651_v32  ;;  %v1721_v8 = vunpack.c.l.bf16 %v6022_v18  ;;  %v2019_v34 = vadd.f32 %v5459_v9, %v5969_v20 }
 0x262   : > { %v6002_v31 = vpop.xlane.xlu1 %1783  ;;  %v4148_v13 = vpop.eup %4147  ;;  %4161 = vrcp.f32 %v2525_v7  ;;  %v3144_v42 = vrot.slane %v4146_v17, %v5499_v4  ;;  %v1658_v7 = vunpack.c.h.bf16 %v6006_v54  ;;  %v2016_v20 = vadd.f32 %v5459_v9, %v5991_v55 }
 0x263   : > { %v6008_v63 = vpop.xlane.xlu0 %1901  ;;  %v4150_v62 = vpop.eup %4149  ;;  %v3139_v52 = vrot.slane %v4148_v13, %v5493_v61  ;;  %4163 = vpow2.f32 %v3797_v41  ;;  %v3861_v41 = vmul.f32 -1.442695, %v2078_v58  ;;  %v3451_v24 = vsel %vm3027_vm0, %v3450_v56, %v3446_v5 }
 0x264   : > { %v4152_v59 = vpop.eup %4151  ;;  %v2524_v16 = vadd.f32 1.0, %v4150_v62  ;;  %1847 = vadd.xlane.f32.xlu1 %v1658_v7  ;;  %v2079_v13 = vadd.f32 %v5459_v9, %v5974_v51  ;;  %v3802_v5 = vmul.f32 -1.442695, %v2019_v34 }
 0x265   : > { %v4154_v50 = vpop.eup %4153  ;;  %v3140_v46 = vsel %vm3034_vm1, %v3139_v52, %v3135_v29  ;;  %v1459_v29 = vadd.bf16 %v5280_v22, %v1386_v37  ;;  %1961 = vadd.xlane.f32.xlu0 %v1715_v30  ;;  %v6038_v22 = vmul.bf16 %v5287_v45, %v1491_v49  ;;  %v1653_v52 = vunpack.c.l.bf16 %v5927_v53 }
 0x266   : > { %v1912_v57 = vpop.xlane.xlu1 %1911  ;;  %v4156_v25 = vpop.eup %4155  ;;  %v6025_v17 = vsel %vm3041_vm2, %v3144_v42, %v3140_v46  ;;  %4165 = vrcp.f32 %v2524_v16  ;;  %v2588_v35 = vadd.f32 1.0, %v4154_v50  ;;  %v3862_v56 = vmul.f32 -1.442695, %v2079_v13 }
 0x267   : > { %v1904_v44 = vpop.xlane.xlu0 %1903  ;;  %v3455_v23 = vrot.slane %v4156_v25, %v5493_v61  ;;  %4167 = vpow2.f32 %v3800_v21  ;;  %v1523_v21 = vmax.bf16 %v4620_v0, %v1459_v29  ;;  %v2527_v7 = vadd.f32 1.0, %v4152_v59 }
 0x268   : > { %4169 = vrcp.f32 %v2588_v35  ;;  %1973 = vadd.xlane.f32.xlu1 %v1721_v8  ;;  %v1660_v58 = vunpack.c.h.bf16 %v6038_v22  ;;  %v2083_v0 = vadd.f32 %v5459_v9, %v5987_v28  ;;  %v1717_v49 = vunpack.c.l.bf16 %v5955_v2 }
 0x269   : > { %v3456_v62 = vsel %vm3034_vm1, %v3455_v23, %v3451_v24  ;;  %4171 = vpow2.f32 %v3861_v41  ;;  %1837 = vadd.xlane.f32.xlu0 %v1653_v52  ;;  %v3799_v30 = vmul.f32 -1.442695, %v2016_v20  ;;  %v6049_v25 = vmul.bf16 %v5287_v45, %v1523_v21 }
 0x26a   : > { %v4158_v32 = vpop.eup %4157  ;;  %v1788_v42 = vpop.xlane.xlu1 %1787  ;;  %4173 = vpow2.f32 %v3802_v5  ;;  %v3866_v55 = vmul.f32 -1.442695, %v2083_v0  ;;  %v2080_v28 = vadd.f32 %v5459_v9, %v6008_v63  ;;  %v2021_v41 = vadd.f32 %v5459_v9, %v6002_v31 }
 0x26b   : > { %v1778_v16 = vpop.xlane.xlu0 %1777  ;;  %v4160_v51 = vpop.eup %4159  ;;  %v3460_v50 = vrot.slane %v4158_v32, %v5499_v4  ;;  %4175 = vpow2.f32 %v3862_v56  ;;  %v1724_v29 = vunpack.c.h.bf16 %v6049_v25  ;;  %v2081_v8 = vadd.f32 %v5459_v9, %v1904_v44 }
 0x26c   : > { %v4162_v37 = vpop.eup %4161  ;;  %v2589_v46 = vadd.f32 1.0, %v4160_v51  ;;  %1851 = vadd.xlane.f32.xlu1 %v1660_v58  ;;  %v3863_v24 = vmul.f32 -1.442695, %v2080_v28  ;;  %v3804_v34 = vmul.f32 -1.442695, %v2021_v41  ;;  %v2085_v13 = vadd.f32 %v5459_v9, %v1912_v57 }
 0x26d   : > { %v4164_v53 = vpop.eup %4163  ;;  %v3154_v2 = vrot.slane %v4162_v37, %v5509_v6  ;;  %1965 = vadd.xlane.f32.xlu0 %v1717_v49  ;;  %v3461_v63 = vsel %vm3041_vm2, %v3460_v50, %v3456_v62  ;;  %v3864_v21 = vmul.f32 -1.442695, %v2081_v8  ;;  %v1655_v44 = vunpack.c.l.bf16 %v5972_v33 }
 0x26e   : > { %v1914_v59 = vpop.xlane.xlu1 %1913  ;;  %4177 = vrcp.f32 %v2589_v46  ;;  %v2526_v35 = vadd.f32 1.0, %v4164_v53  ;;  %v3868_v52 = vmul.f32 -1.442695, %v2085_v13  ;;  %v2018_v20 = vadd.f32 %v5459_v9, %v1778_v16 }
 0x26f   : > { %v1906_v23 = vpop.xlane.xlu0 %1905  ;;  %4179 = vrcp.f32 %v2527_v7  ;;  %v2023_v58 = vadd.f32 %v5459_v9, %v1788_v42 }
 0x270   : > { %v4166_v45 = vpop.eup %4165  ;;  %4181 = vrcp.f32 %v2526_v35  ;;  %1979 = vadd.xlane.f32.xlu1 %v1724_v29  ;;  %v3801_v50 = vmul.f32 -1.442695, %v2018_v20  ;;  %v2082_v53 = vadd.f32 %v5459_v9, %v1906_v23  ;;  %v2086_v35 = vadd.f32 %v5459_v9, %v1914_v59 }
 0x271   : > { %v4168_v32 = vpop.eup %4167  ;;  %v3149_v31 = vrot.slane %v4166_v45, %v5503_v36  ;;  %4183 = vpow2.f32 %v3799_v30  ;;  %1841 = vadd.xlane.f32.xlu0 %v1655_v44  ;;  %v1657_v23 = vunpack.c.l.bf16 %v6006_v54 }
 0x272   : > { %v6061_v5 = vpop.xlane.xlu1 %1791  ;;  %v4170_v56 = vpop.eup %4169  ;;  %4185 = vpow2.f32 %v3866_v55  ;;  %v2529_v46 = vadd.f32 1.0, %v4168_v32  ;;  %v3806_v55 = vmul.f32 -1.442695, %v2023_v58 }
 0x273   : > { %v1782_v51 = vpop.xlane.xlu0 %1781  ;;  %v4172_v7 = vpop.eup %4171  ;;  %v3150_v57 = vsel %vm3048_vm3, %v3149_v31, %v6025_v17  ;;  %v3465_v62 = vrot.slane %v4170_v56, %v5503_v36  ;;  %4187 = vpow2.f32 %v3863_v24  ;;  %v1719_v17 = vunpack.c.l.bf16 %v5985_v14 }
 0x274   : > { %v3155_v0 = vsel %vm3055_vm4, %v3154_v2, %v3150_v57  ;;  %v2590_v37 = vadd.f32 1.0, %v4172_v7  ;;  %4189 = vpow2.f32 %v3804_v34  ;;  %v4174_v49 = vpop.eup %4173  ;;  %v3865_v2 = vmul.f32 -1.442695, %v2082_v53 }
 0x275   : > { %v3466_v33 = vsel %vm3048_vm3, %v3465_v62, %v3461_v63  ;;  %4191 = vpow2.f32 %v3864_v21  ;;  %v4176_v42 = vpop.eup %4175  ;;  %1969 = vadd.xlane.f32.xlu0 %v1719_v17  ;;  %v2531_v45 = vadd.f32 1.0, %v4174_v49  ;;  %v2020_v34 = vadd.f32 %v5459_v9, %v1782_v51 }
 0x276   : > { %v6071_v16 = vpop.xlane.xlu1 %1919  ;;  %4193 = vrcp.f32 %v2590_v37  ;;  %v2591_v41 = vadd.f32 1.0, %v4176_v42  ;;  %v3869_v31 = vmul.f32 -1.442695, %v2086_v35  ;;  %v1722_v51 = vunpack.c.h.bf16 %v6022_v18 }
 0x277   : > { %v1910_v30 = vpop.xlane.xlu0 %1909  ;;  %4195 = vpow2.f32 %v3868_v52  ;;  %v2025_v37 = vadd.f32 %v5459_v9, %v6061_v5  ;;  %v1659_v5 = vunpack.c.l.bf16 %v6038_v22  ;;  %v1723_v22 = vunpack.c.l.bf16 %v6049_v25 }
 0x278   : > { %v4178_v28 = vpop.eup %4177  ;;  %4197 = vpow2.f32 %v3801_v50 }
 0x279   : > { %v4180_v29 = vpop.eup %4179  ;;  %v3470_v8 = vrot.slane %v4178_v28, %v5509_v6  ;;  %4199 = vrcp.f32 %v2529_v46  ;;  %1845 = vadd.xlane.f32.xlu0 %v1657_v23  ;;  %v3803_v46 = vmul.f32 -1.442695, %v2020_v34  ;;  %v3808_v28 = vmul.f32 -1.442695, %v2025_v37 }
 0x27a   : > { %v1796_v24 = vpop.xlane.xlu1 %1795  ;;  %v4182_v14 = vpop.eup %4181  ;;  %4201 = vrcp.f32 %v2591_v41  ;;  %v3164_v56 = vrot.slane %v4180_v29, %v5523_v19  ;;  %v2089_v41 = vadd.f32 %v5459_v9, %v6071_v16 }
 0x27b   : > { %v1786_v13 = vpop.xlane.xlu0 %1785  ;;  %v4184_v32 = vpop.eup %4183  ;;  %v3471_v59 = vsel %vm3055_vm4, %v3470_v8, %v3466_v33  ;;  %v3159_v63 = vrot.slane %v4182_v14, %v5515_v11  ;;  %4203 = vpow2.f32 %v3806_v55  ;;  %v2027_v16 = vadd.f32 %v5459_v9, %v1796_v24 }
 0x27c   : > { %v4186_v21 = vpop.eup %4185  ;;  %v2528_v44 = vadd.f32 1.0, %v4184_v32  ;;  %4205 = vpow2.f32 %v3865_v2  ;;  %v2022_v34 = vadd.f32 %v5459_v9, %v1786_v13 }
 0x27d   : > { %v4188_v52 = vpop.eup %4187  ;;  %v3160_v20 = vsel %vm3062_vm5, %v3159_v63, %v3155_v0  ;;  %4207 = vrcp.f32 %v2531_v45  ;;  %v2595_v54 = vadd.f32 1.0, %v4186_v21  ;;  %v2084_v0 = vadd.f32 %v5459_v9, %v1910_v30  ;;  %1975 = vadd.xlane.f32.xlu0 %v1722_v51 }
 0x27e   : > { %v1922_v7 = vpop.xlane.xlu1 %1921  ;;  %v4190_v57 = vpop.eup %4189  ;;  %v6085_v62 = vsel %vm3069_vm6, %v3164_v56, %v3160_v20  ;;  %4209 = vrcp.f32 %v2528_v44  ;;  %v2592_v58 = vadd.f32 1.0, %v4188_v52  ;;  %v3872_v56 = vmul.f32 -1.442695, %v2089_v41 }
 0x27f   : > { %v1916_v50 = vpop.xlane.xlu0 %1915  ;;  %v4192_v33 = vpop.eup %4191  ;;  %4211 = vpow2.f32 %v3869_v31  ;;  %v2533_v17 = vadd.f32 1.0, %v4190_v57  ;;  %v3867_v45 = vmul.f32 -1.442695, %v2084_v0  ;;  %v2090_v51 = vadd.f32 %v5459_v9, %v1922_v7 }
 0x280   : > { %v4194_v49 = vpop.eup %4193  ;;  %4213 = vrcp.f32 %v2592_v58  ;;  %v2593_v18 = vadd.f32 1.0, %v4192_v33  ;;  %v2087_v44 = vadd.f32 %v5459_v9, %v1916_v50  ;;  %v3805_v25 = vmul.f32 -1.442695, %v2022_v34 }
 0x281   : > { %v4196_v53 = vpop.eup %4195  ;;  %v3475_v42 = vrot.slane %v4194_v49, %v5515_v11  ;;  %4215 = vrcp.f32 %v2595_v54  ;;  %1849 = vadd.xlane.f32.xlu0 %v1659_v5  ;;  %v3810_v50 = vmul.f32 -1.442695, %v2027_v16 }
 0x282   : > { %v1924_v55 = vpop.xlane.xlu1 %1923  ;;  %v4198_v35 = vpop.eup %4197  ;;  %4217 = vrcp.f32 %v2593_v18  ;;  %v2597_v23 = vadd.f32 1.0, %v4196_v53  ;;  %v3870_v49 = vmul.f32 -1.442695, %v2087_v44 }
 0x283   : > { %v1790_v2 = vpop.xlane.xlu0 %1789  ;;  %v4200_v30 = vpop.eup %4199  ;;  %v3476_v29 = vsel %vm3062_vm5, %v3475_v42, %v3471_v59  ;;  %v2530_v8 = vadd.f32 1.0, %v4198_v35  ;;  %4219 = vpow2.f32 %v3803_v46  ;;  %v3873_v35 = vmul.f32 -1.442695, %v2090_v51 }
 0x284   : > { %v4202_v14 = vpop.eup %4201  ;;  %4221 = vrcp.f32 %v2533_v17  ;;  %v2024_v24 = vadd.f32 %v5459_v9, %v1790_v2  ;;  %v3174_v0 = vrot.slane %v4200_v30, %v5534_v39  ;;  %v2091_v17 = vadd.f32 %v5459_v9, %v1924_v55 }
 0x285   : > { %v4204_v32 = vpop.eup %4203  ;;  %v3480_v63 = vrot.slane %v4202_v14, %v5523_v19  ;;  %4223 = vrcp.f32 %v2530_v8  ;;  %1977 = vadd.xlane.f32.xlu0 %v1723_v22 }
 0x286   : > { %v1800_v31 = vpop.xlane.xlu1 %1799  ;;  %v4206_v21 = vpop.eup %4205  ;;  %v2535_v59 = vadd.f32 1.0, %v4204_v32  ;;  %4225 = vpow2.f32 %v3808_v28  ;;  %v3807_v41 = vmul.f32 -1.442695, %v2024_v24  ;;  %v3874_v14 = vmul.f32 -1.442695, %v2091_v17 }
 0x287   : > { %v1918_v52 = vpop.xlane.xlu0 %1917  ;;  %v6100_v20 = vpop.eup %4207  ;;  %v3481_v13 = vsel %vm3069_vm6, %v3480_v63, %v3476_v29  ;;  %v2594_v54 = vadd.f32 1.0, %v4206_v21  ;;  %4227 = vpow2.f32 %v3867_v45 }
 0x288   : > { %v4210_v57 = vpop.eup %4209  ;;  %4229 = vrcp.f32 %v2597_v23  ;;  %v2088_v55 = vadd.f32 %v5459_v9, %v1918_v52  ;;  %v3184_v44 = vrot.slane %v6100_v20, %v5571_v10 }
 0x289   : > { %v4212_v58 = vpop.eup %4211  ;;  %v3169_v37 = vrot.slane %v4210_v57, %v5531_v38  ;;  %4231 = vrcp.f32 %v2594_v54 }
 0x28a   : > { %v1928_v33 = vpop.xlane.xlu1 %1927  ;;  %v4214_v46 = vpop.eup %4213  ;;  %4233 = vrcp.f32 %v2535_v59  ;;  %v2598_v63 = vadd.f32 1.0, %v4212_v58  ;;  %v2029_v59 = vadd.f32 %v5459_v9, %v1800_v31  ;;  %v3871_v52 = vmul.f32 -1.442695, %v2088_v55 }
 0x28b   : > { %v1794_v7 = vpop.xlane.xlu0 %1793  ;;  %v4216_v18 = vpop.eup %4215  ;;  %v3170_v53 = vsel %vm3076_vm7, %v3169_v37, %v6085_v62  ;;  %v3485_v42 = vrot.slane %v4214_v46, %v5531_v38  ;;  %4235 = vpow2.f32 %v3872_v56  ;;  %v2093_v17 = vadd.f32 %v5459_v9, %v1928_v33 }
 0x28c   : > { %v4218_v28 = vpop.eup %4217  ;;  %v3175_v5 = vsel %vm3083_vm8, %v3174_v0, %v3170_v53  ;;  %4237 = vpow2.f32 %v3805_v25  ;;  %v2026_v22 = vadd.f32 %v5459_v9, %v1794_v7  ;;  %v3812_v46 = vmul.f32 -1.442695, %v2029_v59 }
 0x28d   : > { %v4220_v2 = vpop.eup %4219  ;;  %v3486_v30 = vsel %vm3076_vm7, %v3485_v42, %v3481_v13  ;;  %v3490_v29 = vrot.slane %v4218_v28, %v5534_v39  ;;  %4239 = vpow2.f32 %v3810_v50  ;;  %v3876_v55 = vmul.f32 -1.442695, %v2093_v17 }
 0x28e   : > { %v1804_v8 = vpop.xlane.xlu1 %1803  ;;  %v6115_v45 = vpop.eup %4221  ;;  %v2532_v62 = vadd.f32 1.0, %v4220_v2  ;;  %4241 = vpow2.f32 %v3870_v49  ;;  %v3809_v37 = vmul.f32 -1.442695, %v2026_v22  ;;  %v3500_v49 = vrot.slane %v4216_v18, %v5571_v10 }
 0x28f   : > { %v1798_v23 = vpop.xlane.xlu0 %1797  ;;  %v4224_v34 = vpop.eup %4223  ;;  %v3491_v32 = vsel %vm3083_vm8, %v3490_v29, %v3486_v30  ;;  %4243 = vpow2.f32 %v3873_v35  ;;  %v2031_v33 = vadd.f32 %v5459_v9, %v1804_v8 }
 0x290   : > { %v4226_v16 = vpop.eup %4225  ;;  %v3179_v21 = vrot.slane %v4224_v34, %v5542_v43  ;;  %4245 = vrcp.f32 %v2532_v62  ;;  %v2028_v30 = vadd.f32 %v5459_v9, %v1798_v23  ;;  %v3194_v23 = vrot.slane %v6115_v45, %v5820_v27 }
 0x291   : > { %v4228_v56 = vpop.eup %4227  ;;  %4247 = vpow2.f32 %v3807_v41  ;;  %v2537_v51 = vadd.f32 1.0, %v4226_v16 }
 0x292   : > { %v6123_v13 = vpop.eup %4229  ;;  %v3180_v54 = vsel %vm3090_vm9, %v3179_v21, %v3175_v5  ;;  %v2596_v57 = vadd.f32 1.0, %v4228_v56  ;;  %4249 = vpow2.f32 %v3874_v14  ;;  %v6127_v31 = vpop.xlane.xlu1 %1807  ;;  %v3811_v59 = vmul.f32 -1.442695, %v2028_v30 }
 0x293   : > { %v1926_v25 = vpop.xlane.xlu0 %1925  ;;  %v4232_v24 = vpop.eup %4231  ;;  %4251 = vrcp.f32 %v2598_v63  ;;  %v3185_v58 = vsel %vm3097_vm10, %v3184_v44, %v3180_v54 }
 0x294   : > { %v6129_v50 = vpop.eup %4233  ;;  %v3495_v20 = vrot.slane %v4232_v24, %v5542_v43  ;;  %4253 = vrcp.f32 %v2596_v57  ;;  %v2092_v57 = vadd.f32 %v5459_v9, %v1926_v25 }
 0x295   : > { %v4236_v0 = vpop.eup %4235  ;;  %4255 = vpow2.f32 %v3871_v52  ;;  %v3814_v52 = vmul.f32 -1.442695, %v2031_v33 }
 0x296   : > { %v4238_v7 = vpop.eup %4237  ;;  %v3496_v53 = vsel %vm3090_vm9, %v3495_v20, %v3491_v32  ;;  %4257 = vrcp.f32 %v2537_v51  ;;  %v2601_v42 = vadd.f32 1.0, %v4236_v0  ;;  %v6138_v62 = vpop.xlane.xlu1 %1935 }
 0x297   : > { %v1802_v35 = vpop.xlane.xlu0 %1801  ;;  %v4240_v28 = vpop.eup %4239  ;;  %v3501_v5 = vsel %vm3097_vm10, %v3500_v49, %v3496_v53  ;;  %v2534_v41 = vadd.f32 1.0, %v4238_v7  ;;  %4259 = vpow2.f32 %v3809_v37 }
 0x298   : > { %v4242_v2 = vpop.eup %4241  ;;  %4261 = vpow2.f32 %v3812_v46  ;;  %v2539_v45 = vadd.f32 1.0, %v4240_v28  ;;  %v2030_v46 = vadd.f32 %v5459_v9, %v1802_v35 }
 0x299   : > { %v4244_v29 = vpop.eup %4243  ;;  %4263 = vrcp.f32 %v2534_v41  ;;  %v2599_v18 = vadd.f32 1.0, %v4242_v2  ;;  %v3875_v2 = vmul.f32 -1.442695, %v2092_v57 }
 0x29a   : > { %v4246_v14 = vpop.eup %4245  ;;  %4265 = vrcp.f32 %v2601_v42  ;;  %v2602_v34 = vadd.f32 1.0, %v4244_v29  ;;  %v1812_v0 = vpop.xlane.xlu1 %1811 }
 0x29b   : > { %v1930_v32 = vpop.xlane.xlu0 %1929  ;;  %v4248_v63 = vpop.eup %4247  ;;  %v3189_v22 = vrot.slane %v4246_v14, %v5585_v60  ;;  %4267 = vrcp.f32 %v2599_v18  ;;  %v2033_v18 = vadd.f32 %v5459_v9, %v6127_v31 }
 0x29c   : > { %v4250_v16 = vpop.eup %4249  ;;  %4269 = vrcp.f32 %v2602_v34  ;;  %v2536_v21 = vadd.f32 1.0, %v4248_v63  ;;  %v2094_v42 = vadd.f32 %v5459_v9, %v1930_v32  ;;  %v3204_v32 = vrot.slane %v6129_v50, %v5910_v15 }
 0x29d   : > { %v4252_v56 = vpop.eup %4251  ;;  %v3190_v8 = vsel %vm3104_vm11, %v3189_v22, %v3185_v58  ;;  %v2603_v44 = vadd.f32 1.0, %v4250_v16  ;;  %4271 = vpow2.f32 %v3876_v55  ;;  %v3510_v58 = vrot.slane %v6123_v13, %v5820_v27 }
 0x29e   : > { %v4254_v54 = vpop.eup %4253  ;;  %v3195_v51 = vsel %vm3111_vm12, %v3194_v23, %v3190_v8  ;;  %4273 = vrcp.f32 %v2536_v21  ;;  %v3515_v53 = vrot.slane %v4252_v56, %v5824_v40  ;;  %v3813_v55 = vmul.f32 -1.442695, %v2030_v46  ;;  %v1940_v22 = vpop.xlane.xlu1 %1939 }
 0x29f   : > { %v1932_v24 = vpop.xlane.xlu0 %1931  ;;  %v4256_v37 = vpop.eup %4255  ;;  %v3505_v20 = vrot.slane %v4254_v54, %v5585_v60  ;;  %4275 = vrcp.f32 %v2603_v44  ;;  %v3877_v63 = vmul.f32 -1.442695, %v2094_v42  ;;  %v3816_v44 = vmul.f32 -1.442695, %v2033_v18 }
 0x2a0   : > { %v4258_v49 = vpop.eup %4257  ;;  %v2600_v17 = vadd.f32 1.0, %v4256_v37  ;;  %4277 = vpow2.f32 %v3811_v59  ;;  %v2095_v14 = vadd.f32 %v5459_v9, %v1932_v24 }
 0x2a1   : > { %v4260_v7 = vpop.eup %4259  ;;  %v3506_v25 = vsel %vm3104_vm11, %v3505_v20, %v3501_v5  ;;  %4279 = vpow2.f32 %v3814_v52  ;;  %v2097_v52 = vadd.f32 %v5459_v9, %v6138_v62  ;;  %v3213_v20 = vrot.slane %v4258_v49, %v5489_v47 }
 0x2a2   : > { %v4262_v41 = vpop.eup %4261  ;;  %v3511_v28 = vsel %vm3111_vm12, %v3510_v58, %v3506_v25  ;;  %4281 = vrcp.f32 %v2600_v17  ;;  %v2538_v35 = vadd.f32 1.0, %v4260_v7  ;;  %v2035_v62 = vadd.f32 %v5459_v9, %v1812_v0  ;;  %v6177_v25 = vpop.xlane.xlu1 %1815 }
 0x2a3   : > { %v1806_v30 = vpop.xlane.xlu0 %1805  ;;  %v4264_v29 = vpop.eup %4263  ;;  %4283 = vrcp.f32 %v2539_v45  ;;  %v3516_v13 = vsel %vm3118_vm13, %v3515_v53, %v3511_v28  ;;  %v2541_v31 = vadd.f32 1.0, %v4262_v41  ;;  %v3880_v53 = vmul.f32 -1.442695, %v2097_v52 }
 0x2a4   : > { %v4266_v33 = vpop.eup %4265  ;;  %v3199_v5 = vrot.slane %v4264_v29, %v5824_v40  ;;  %4285 = vrcp.f32 %v2538_v35  ;;  %v2032_v24 = vadd.f32 %v5459_v9, %v1806_v30 }
 0x2a5   : > { %v4268_v34 = vpop.eup %4267  ;;  %4287 = vpow2.f32 %v3875_v2  ;;  %v3529_v28 = vrot.slane %v4266_v33, %v5489_v47 }
 0x2a6   : > { %v4270_v16 = vpop.eup %4269  ;;  %v3200_v23 = vsel %vm3118_vm13, %v3199_v5, %v3195_v51  ;;  %v3520_v21 = vrot.slane %v4268_v34, %v5910_v15  ;;  %4289 = vpow2.f32 %v3813_v55  ;;  %v3878_v51 = vmul.f32 -1.442695, %v2095_v14  ;;  %v6186_v34 = vpop.xlane.xlu1 %1819 }
 0x2a7   : > { %v1934_v59 = vpop.xlane.xlu0 %1933  ;;  %v4272_v56 = vpop.eup %4271  ;;  %v3205_v8 = vsel %vm3125_vm14, %v3204_v32, %v3200_v23  ;;  %4291 = vpow2.f32 %v3877_v63  ;;  %v3815_v41 = vmul.f32 -1.442695, %v2032_v24  ;;  %v3534_v30 = vrot.slane %v4270_v16, %v5493_v61 }
 0x2a8   : > { %v4274_v50 = vpop.eup %4273  ;;  %v6167_v54 = vsel %vm3680_vm15, %v3205_v8, %v5947_v26  ;;  %v6170_v57 = vsel %vm3125_vm14, %v3520_v21, %v3516_v13  ;;  %4293 = vrcp.f32 %v2541_v31  ;;  %v2605_v2 = vadd.f32 1.0, %v4272_v56 }
 0x2a9   : > { %v4276_v37 = vpop.eup %4275  ;;  %v3209_v45 = vrot.slane %v4274_v50, %v5474_v3  ;;  %4295 = vpow2.f32 %v3816_v44  ;;  %v3818_v13 = vmul.f32 -1.442695, %v2035_v62  ;;  %v2096_v18 = vadd.f32 %v5459_v9, %v1934_v59 }
 0x2aa   : > { %v4278_v46 = vpop.eup %4277  ;;  %4297 = vpow2.f32 %v3878_v51  ;;  %v3539_v55 = vrot.slane %v4276_v37, %v5499_v4  ;;  %v2099_v16 = vadd.f32 %v5459_v9, %v1940_v22  ;;  %vm3682_vm15 = vcmask 1042434  }
 0x2ab   : > { %v1810_v58 = vpop.xlane.xlu0 %1809  ;;  %v4280_v17 = vpop.eup %4279  ;;  %v3214_v26 = vsel %vm3027_vm0, %v3213_v20, %v3209_v45  ;;  %v2540_v7 = vadd.f32 1.0, %v4278_v46  ;;  %v3879_v51 = vmul.f32 -1.442695, %v2096_v18 }
 0x2ac   : > { %v4282_v42 = vpop.eup %4281  ;;  %v2543_v29 = vadd.f32 1.0, %v4280_v17  ;;  %v2034_v52 = vadd.f32 %v5459_v9, %v1810_v58  ;;  %v3882_v37 = vmul.f32 -1.442695, %v2099_v16  ;;  %v6195_v45 = vpop.xlane.xlu1 %1945 }
 0x2ad   : > { %v4284_v49 = vpop.eup %4283  ;;  %v3525_v35 = vrot.slane %v4282_v42, %v5474_v3  ;;  %4299 = vrcp.f32 %v2540_v7 }
 0x2ae   : > { %v4286_v0 = vpop.eup %4285  ;;  %4301 = vpow2.f32 %v3880_v53  ;;  %v3223_v32 = vrot.slane %v4284_v49, %v5499_v4  ;;  %v3817_v62 = vmul.f32 -1.442695, %v2034_v52 }
 0x2af   : > { %v3530_v5 = vsel %vm3027_vm0, %v3529_v28, %v3525_v35  ;;  %v3218_v14 = vrot.slane %v4286_v0, %v5493_v61  ;;  %v4288_v33 = vpop.eup %4287  ;;  %4303 = vpow2.f32 %v3815_v41  ;;  %v1938_v23 = vpop.xlane.xlu0 %1937 }
 0x2b0   : > { %v3535_v63 = vsel %vm3034_vm1, %v3534_v30, %v3530_v5  ;;  %v4290_v21 = vpop.eup %4289  ;;  %4305 = vrcp.f32 %v2605_v2  ;;  %v2604_v56 = vadd.f32 1.0, %v4288_v33  ;;  %v2098_v58 = vadd.f32 %v5459_v9, %v1938_v23  ;;  %v6203_v18 = vpop.xlane.xlu1 %1947 }
 0x2b1   : > { %v3219_v31 = vsel %vm3034_vm1, %v3218_v14, %v3214_v26  ;;  %v3540_v59 = vsel %vm3041_vm2, %v3539_v55, %v3535_v63  ;;  %4307 = vrcp.f32 %v2543_v29  ;;  %v2542_v44 = vadd.f32 1.0, %v4290_v21  ;;  %v4292_v50 = vpop.eup %4291 }
 0x2b2   : > { %v3224_v8 = vsel %vm3041_vm2, %v3223_v32, %v3219_v31  ;;  %4309 = vrcp.f32 %v2604_v56  ;;  %v4294_v24 = vpop.eup %4293  ;;  %v2606_v22 = vadd.f32 1.0, %v4292_v50  ;;  %v2037_v50 = vadd.f32 %v5459_v9, %v6177_v25 }
 0x2b3   : > { %4311 = vrcp.f32 %v2542_v44  ;;  %v4296_v20 = vpop.eup %4295  ;;  %v1814_v17 = vpop.xlane.xlu0 %1813  ;;  %v3233_v49 = vrot.slane %v4294_v24, %v5509_v6 }
 0x2b4   : > { %4313 = vpow2.f32 %v3818_v13  ;;  %v4298_v46 = vpop.eup %4297  ;;  %v2545_v42 = vadd.f32 1.0, %v4296_v20  ;;  %v2036_v28 = vadd.f32 %v5459_v9, %v1814_v17  ;;  %v3881_v13 = vmul.f32 -1.442695, %v2098_v58 }
 0x2b5   : > { %4315 = vrcp.f32 %v2606_v22  ;;  %v2607_v7 = vadd.f32 1.0, %v4298_v46 }
 0x2b6   : > { %4317 = vpow2.f32 %v3879_v51  ;;  %v3819_v14 = vmul.f32 -1.442695, %v2036_v28  ;;  %v2039_v51 = vadd.f32 %v5459_v9, %v6186_v34  ;;  %v6218_v46 = vpop.xlane.xlu1 %1823 }
 0x2b7   : > { %v4300_v26 = vpop.eup %4299  ;;  %4319 = vpow2.f32 %v3882_v37  ;;  %v1942_v16 = vpop.xlane.xlu0 %1941 }
 0x2b8   : > { %v3228_v53 = vrot.slane %v4300_v26, %v5503_v36  ;;  %v4302_v41 = vpop.eup %4301  ;;  %4321 = vrcp.f32 %v2607_v7  ;;  %v2100_v56 = vadd.f32 %v5459_v9, %v1942_v16 }
 0x2b9   : > { %v4304_v35 = vpop.eup %4303  ;;  %4323 = vpow2.f32 %v3817_v62  ;;  %v2609_v63 = vadd.f32 1.0, %v4302_v41 }
 0x2ba   : > { %v3229_v2 = vsel %vm3048_vm3, %v3228_v53, %v3224_v8  ;;  %v4306_v0 = vpop.eup %4305  ;;  %v2544_v29 = vadd.f32 1.0, %v4304_v35  ;;  %4325 = vrcp.f32 %v2545_v42  ;;  %v3883_v7 = vmul.f32 -1.442695, %v2100_v56 }
 0x2bb   : > { %v3234_v30 = vsel %vm3055_vm4, %v3233_v49, %v3229_v2  ;;  %v4308_v55 = vpop.eup %4307  ;;  %v3549_v21 = vrot.slane %v4306_v0, %v5509_v6  ;;  %v1944_v25 = vpop.xlane.xlu0 %1943  ;;  %v3820_v49 = vmul.f32 -1.442695, %v2037_v50 }
 0x2bc   : > { %v4310_v5 = vpop.eup %4309  ;;  %4327 = vrcp.f32 %v2544_v29  ;;  %v3243_v44 = vrot.slane %v4308_v55, %v5523_v19  ;;  %v2101_v53 = vadd.f32 %v5459_v9, %v1944_v25  ;;  %v1952_v55 = vpop.xlane.xlu1 %1951 }
 0x2bd   : > { %v4312_v33 = vpop.eup %4311  ;;  %v3544_v32 = vrot.slane %v4310_v5, %v5503_v36  ;;  %4329 = vpow2.f32 %v3881_v13 }
 0x2be   : > { %v4314_v23 = vpop.eup %4313  ;;  %v3238_v31 = vrot.slane %v4312_v33, %v5515_v11  ;;  %4331 = vpow2.f32 %v3819_v14  ;;  %v3884_v35 = vmul.f32 -1.442695, %v2101_v53 }
 0x2bf   : > { %v4316_v8 = vpop.eup %4315  ;;  %v3545_v52 = vsel %vm3048_vm3, %v3544_v32, %v3540_v59  ;;  %v2547_v17 = vadd.f32 1.0, %v4314_v23  ;;  %4333 = vrcp.f32 %v2609_v63 }
 0x2c0   : > { %v4318_v24 = vpop.eup %4317  ;;  %v3239_v22 = vsel %vm3062_vm5, %v3238_v31, %v3234_v30  ;;  %v3550_v37 = vsel %vm3055_vm4, %v3549_v21, %v3545_v52  ;;  %v3554_v20 = vrot.slane %v4316_v8, %v5515_v11  ;;  %v3822_v30 = vmul.f32 -1.442695, %v2039_v51 }
 0x2c1   : > { %v4320_v62 = vpop.eup %4319  ;;  %v3244_v59 = vsel %vm3069_vm6, %v3243_v44, %v3239_v22  ;;  %v2608_v26 = vadd.f32 1.0, %v4318_v24  ;;  %v2070_v22 = vadd.f32 %v5459_v9, %v5735_v1 }
 0x2c2   : > { %v4322_v58 = vpop.eup %4321  ;;  %v3555_v34 = vsel %vm3062_vm5, %v3554_v20, %v3550_v37  ;;  %v2611_v13 = vadd.f32 1.0, %v4320_v62 }
 0x2c3   : > { %v4324_v42 = vpop.eup %4323  ;;  %v3559_v41 = vrot.slane %v4322_v58, %v5523_v19  ;;  %4335 = vrcp.f32 %v2608_v26  ;;  %v1818_v5 = vpop.xlane.xlu0 %1817  ;;  %v2071_v26 = vadd.f32 %v5459_v9, %v5756_v48 }
 0x2c4   : > { %v2546_v28 = vadd.f32 1.0, %v4324_v42  ;;  %4337 = vpow2.f32 %v3883_v7  ;;  %v4326_v2 = vpop.eup %4325  ;;  %v2038_v33 = vadd.f32 %v5459_v9, %v1818_v5  ;;  %v3853_v42 = vmul.f32 -1.442695, %v2070_v22 }
 0x2c5   : > { %4339 = vrcp.f32 %v2547_v17  ;;  %v3560_v0 = vsel %vm3069_vm6, %v3559_v41, %v3555_v34  ;;  %v3253_v63 = vrot.slane %v4326_v2, %v5534_v39 }
 0x2c6   : > { %v4328_v29 = vpop.eup %4327  ;;  %4341 = vrcp.f32 %v2546_v28  ;;  %v3821_v8 = vmul.f32 -1.442695, %v2038_v33  ;;  %v1828_v52 = vpop.xlane.xlu1 %1827 }
 0x2c7   : > { %v3248_v14 = vrot.slane %v4328_v29, %v5531_v38  ;;  %4343 = vpow2.f32 %v3820_v49  ;;  %v4330_v32 = vpop.eup %4329  ;;  %v2102_v49 = vadd.f32 %v5459_v9, %v6195_v45 }
 0x2c8   : > { %4345 = vpow2.f32 %v3884_v35  ;;  %v2610_v23 = vadd.f32 1.0, %v4330_v32  ;;  %v4332_v21 = vpop.eup %4331 }
 0x2c9   : > { %v3249_v16 = vsel %vm3076_vm7, %v3248_v14, %v3244_v59  ;;  %4347 = vpow2.f32 %v3822_v30  ;;  %v2548_v56 = vadd.f32 1.0, %v4332_v21  ;;  %v4334_v44 = vpop.eup %4333  ;;  %v3854_v30 = vmul.f32 -1.442695, %v2071_v26 }
 0x2ca   : > { %4349 = vrcp.f32 %v2611_v13  ;;  %v3254_v31 = vsel %vm3083_vm8, %v3253_v63, %v3249_v16  ;;  %v1822_v50 = vpop.xlane.xlu0 %1821  ;;  %v3569_v62 = vrot.slane %v4334_v44, %v5534_v39  ;;  %v2041_v14 = vadd.f32 %v5459_v9, %v6218_v46 }
 0x2cb   : > { %4351 = vrcp.f32 %v2610_v23  ;;  %v3885_v45 = vmul.f32 -1.442695, %v2102_v49  ;;  %v2105_v63 = vadd.f32 %v5459_v9, %v1952_v55  ;;  %v2040_v22 = vadd.f32 %v5459_v9, %v1822_v50 }
 0x2cc   : > { %4353 = vrcp.f32 %v2548_v56  ;;  %v2043_v56 = vadd.f32 %v5459_v9, %v1828_v52 }
 0x2cd   : > { %v4336_v51 = vpop.eup %4335  ;;  %4355 = vpow2.f32 %v3821_v8  ;;  %v1832_v28 = vpop.xlane.xlu1 %1831 }
 0x2ce   : > { %v4338_v24 = vpop.eup %4337  ;;  %v3564_v37 = vrot.slane %v4336_v51, %v5531_v38  ;;  %v3826_v52 = vmul.f32 -1.442695, %v2043_v56 }
 0x2cf   : > { %v4340_v20 = vpop.eup %4339  ;;  %v2612_v17 = vadd.f32 1.0, %v4338_v24  ;;  %v1950_v1 = vpop.xlane.xlu0 %1949  ;;  %v3824_v24 = vmul.f32 -1.442695, %v2041_v14 }
 0x2d0   : > { %v4342_v59 = vpop.eup %4341  ;;  %v3565_v7 = vsel %vm3076_vm7, %v3564_v37, %v3560_v0  ;;  %v3263_v41 = vrot.slane %v4340_v20, %v5571_v10  ;;  %v3888_v37 = vmul.f32 -1.442695, %v2105_v63 }
 0x2d1   : > { %v4344_v25 = vpop.eup %4343  ;;  %v3258_v58 = vrot.slane %v4342_v59, %v5542_v43  ;;  %v3570_v34 = vsel %vm3083_vm8, %v3569_v62, %v3565_v7  ;;  %4357 = vrcp.f32 %v2612_v17  ;;  %v2045_v17 = vadd.f32 %v5459_v9, %v1832_v28 }
 0x2d2   : > { %v4346_v53 = vpop.eup %4345  ;;  %v2549_v5 = vadd.f32 1.0, %v4344_v25  ;;  %v1836_v16 = vpop.xlane.xlu1 %1835  ;;  %v3823_v25 = vmul.f32 -1.442695, %v2040_v22 }
 0x2d3   : > { %v4348_v35 = vpop.eup %4347  ;;  %v3259_v48 = vsel %vm3090_vm9, %v3258_v58, %v3254_v31  ;;  %v2613_v2 = vadd.f32 1.0, %v4346_v53  ;;  %v1826_v33 = vpop.xlane.xlu0 %1825  ;;  %v2104_v58 = vadd.f32 %v5459_v9, %v1950_v1 }
 0x2d4   : > { %v4350_v0 = vpop.eup %4349  ;;  %v3264_v29 = vsel %vm3097_vm10, %v3263_v41, %v3259_v48  ;;  %v2551_v31 = vadd.f32 1.0, %v4348_v35  ;;  %v2047_v35 = vadd.f32 %v5459_v9, %v1836_v16 }
 0x2d5   : > { %v4352_v13 = vpop.eup %4351  ;;  %4359 = vrcp.f32 %v2613_v2  ;;  %v3579_v21 = vrot.slane %v4350_v0, %v5571_v10  ;;  %v3887_v2 = vmul.f32 -1.442695, %v2104_v58 }
 0x2d6   : > { %4361 = vpow2.f32 %v3853_v42  ;;  %v3574_v32 = vrot.slane %v4352_v13, %v5542_v43  ;;  %v4354_v23 = vpop.eup %4353  ;;  %v3828_v42 = vmul.f32 -1.442695, %v2045_v17  ;;  %v3830_v63 = vmul.f32 -1.442695, %v2047_v35 }
 0x2d7   : > { %4363 = vpow2.f32 %v3854_v30  ;;  %v3268_v46 = vrot.slane %v4354_v23, %v5585_v60  ;;  %v4356_v44 = vpop.eup %4355 }
 0x2d8   : > { %v3575_v8 = vsel %vm3090_vm9, %v3574_v32, %v3570_v34  ;;  %4365 = vrcp.f32 %v2549_v5  ;;  %v2550_v20 = vadd.f32 1.0, %v4356_v44  ;;  %v1954_v59 = vpop.xlane.xlu0 %1953  ;;  %v2042_v34 = vadd.f32 %v5459_v9, %v1826_v33 }
 0x2d9   : > { %v3580_v51 = vsel %vm3097_vm10, %v3579_v21, %v3575_v8  ;;  %4367 = vpow2.f32 %v3885_v45  ;;  %v3269_v55 = vsel %vm3104_vm11, %v3268_v46, %v3264_v29  ;;  %v2106_v29 = vadd.f32 %v5459_v9, %v1954_v59 }
 0x2da   : > { %4369 = vrcp.f32 %v2551_v31  ;;  %v1964_v7 = vpop.xlane.xlu1 %1963  ;;  %v3825_v30 = vmul.f32 -1.442695, %v2042_v34  ;;  %v2103_v45 = vadd.f32 %v5459_v9, %v6203_v18 }
 0x2db   : > { %v4358_v62 = vpop.eup %4357  ;;  %4371 = vrcp.f32 %v2550_v20  ;;  %v2111_v14 = vadd.f32 %v5459_v9, %v1964_v7  ;;  %v3889_v8 = vmul.f32 -1.442695, %v2106_v29 }
 0x2dc   : > { %v3584_v26 = vrot.slane %v4358_v62, %v5585_v60  ;;  %4373 = vpow2.f32 %v3824_v24  ;;  %v1956_v41 = vpop.xlane.xlu0 %1955  ;;  %v3886_v18 = vmul.f32 -1.442695, %v2103_v45 }
 0x2dd   : > { %4375 = vpow2.f32 %v3888_v37  ;;  %v2107_v59 = vadd.f32 %v5459_v9, %v1956_v41 }
 0x2de   : > { %v3585_v50 = vsel %vm3104_vm11, %v3584_v26, %v3580_v51  ;;  %4377 = vpow2.f32 %v3826_v52  ;;  %v1840_v48 = vpop.xlane.xlu1 %1839  ;;  %v3894_v51 = vmul.f32 -1.442695, %v2111_v14 }
 0x2df   : > { %v4360_v53 = vpop.eup %4359  ;;  %4379 = vpow2.f32 %v3823_v25  ;;  %v3890_v41 = vmul.f32 -1.442695, %v2107_v59 }
 0x2e0   : > { %v4362_v49 = vpop.eup %4361  ;;  %v3589_v28 = vrot.slane %v4360_v53, %v5820_v27  ;;  %4381 = vpow2.f32 %v3828_v42  ;;  %v1830_v33 = vpop.xlane.xlu0 %1829 }
 0x2e1   : > { %v4364_v0 = vpop.eup %4363  ;;  %v2582_v5 = vadd.f32 1.0, %v4362_v49  ;;  %4383 = vpow2.f32 %v3887_v2 }
 0x2e2   : > { %v6263_v1 = vsel %vm3111_vm12, %v3589_v28, %v3585_v50  ;;  %v4366_v13 = vpop.eup %4365  ;;  %v2583_v23 = vadd.f32 1.0, %v4364_v0  ;;  %4385 = vpow2.f32 %v3825_v30  ;;  %v2044_v28 = vadd.f32 %v5459_v9, %v1830_v33 }
 0x2e3   : > { %v4368_v32 = vpop.eup %4367  ;;  %v3273_v56 = vrot.slane %v4366_v13, %v5820_v27  ;;  %4387 = vrcp.f32 %v2582_v5 }
 0x2e4   : > { %v4370_v16 = vpop.eup %4369  ;;  %4389 = vpow2.f32 %v3830_v63  ;;  %v2614_v52 = vadd.f32 1.0, %v4368_v32  ;;  %v3827_v14 = vmul.f32 -1.442695, %v2044_v28 }
 0x2e5   : > { %v1968_v21 = vpop.xlane.xlu1 %1967  ;;  %v4372_v31 = vpop.eup %4371  ;;  %v3283_v22 = vrot.slane %v4370_v16, %v5910_v15  ;;  %v3274_v37 = vsel %vm3111_vm12, %v3273_v56, %v3269_v55  ;;  %4391 = vrcp.f32 %v2583_v23  ;;  %v2049_v55 = vadd.f32 %v5459_v9, %v1840_v48 }
 0x2e6   : > { %v4374_v46 = vpop.eup %4373  ;;  %v3278_v44 = vrot.slane %v4372_v31, %v5824_v40  ;;  %v1958_v20 = vpop.xlane.xlu0 %1957  ;;  %4393 = vpow2.f32 %v3889_v8  ;;  %v2113_v33 = vadd.f32 %v5459_v9, %v1968_v21 }
 0x2e7   : > { %v4376_v24 = vpop.eup %4375  ;;  %v2553_v26 = vadd.f32 1.0, %v4374_v46  ;;  %4395 = vpow2.f32 %v3894_v51  ;;  %v3832_v0 = vmul.f32 -1.442695, %v2049_v55  ;;  %v2108_v13 = vadd.f32 %v5459_v9, %v1958_v20 }
 0x2e8   : > { %v4378_v62 = vpop.eup %4377  ;;  %v3279_v17 = vsel %vm3118_vm13, %v3278_v44, %v3274_v37  ;;  %v2617_v50 = vadd.f32 1.0, %v4376_v24  ;;  %4397 = vpow2.f32 %v3886_v18 }
 0x2e9   : > { %v3284_v7 = vsel %vm3125_vm14, %v3283_v22, %v3279_v17  ;;  %v1844_v25 = vpop.xlane.xlu1 %1843  ;;  %v4380_v58 = vpop.eup %4379  ;;  %v2555_v53 = vadd.f32 1.0, %v4378_v62  ;;  %4399 = vrcp.f32 %v2614_v52  ;;  %v3891_v31 = vmul.f32 -1.442695, %v2108_v13 }
 0x2ea   : > { %v6278_v34 = vsel %vm3682_vm15, %v3284_v7, %v6167_v54  ;;  %v1960_v42 = vpop.xlane.xlu0 %1959  ;;  %v4382_v49 = vpop.eup %4381  ;;  %4401 = vrcp.f32 %v2553_v26  ;;  %v2552_v35 = vadd.f32 1.0, %v4380_v58  ;;  %v3896_v22 = vmul.f32 -1.442695, %v2113_v33 }
 0x2eb   : > { %v4384_v2 = vpop.eup %4383  ;;  %4403 = vrcp.f32 %v2617_v50  ;;  %v2557_v54 = vadd.f32 1.0, %v4382_v49  ;;  %v2109_v21 = vadd.f32 %v5459_v9, %v1960_v42  ;;  %v2051_v26 = vadd.f32 %v5459_v9, %v1844_v25 }
 0x2ec   : > { %v4386_v29 = vpop.eup %4385  ;;  %4405 = vrcp.f32 %v2555_v53  ;;  %v2616_v45 = vadd.f32 1.0, %v4384_v2 }
 0x2ed   : > { %v1972_v30 = vpop.xlane.xlu1 %1971  ;;  %v6283_v5 = vpop.eup %4387  ;;  %4407 = vpow2.f32 %v3890_v41  ;;  %v2554_v16 = vadd.f32 1.0, %v4386_v29  ;;  %v3892_v55 = vmul.f32 -1.442695, %v2109_v21 }
 0x2ee   : > { %v1834_v48 = vpop.xlane.xlu0 %1833  ;;  %v4390_v32 = vpop.eup %4389  ;;  %4409 = vrcp.f32 %v2552_v35  ;;  %v2115_v25 = vadd.f32 %v5459_v9, %v1972_v30 }
 0x2ef   : > { %v6286_v63 = vpop.eup %4391  ;;  %4411 = vpow2.f32 %v3832_v0  ;;  %v2559_v46 = vadd.f32 1.0, %v4390_v32  ;;  %v2046_v44 = vadd.f32 %v5459_v9, %v1834_v48  ;;  %v3834_v0 = vmul.f32 -1.442695, %v2051_v26 }
 0x2f0   : > { %v4394_v23 = vpop.eup %4393  ;;  %4413 = vrcp.f32 %v2557_v54  ;;  %v3898_v30 = vmul.f32 -1.442695, %v2115_v25 }
 0x2f1   : > { %v4396_v8 = vpop.eup %4395  ;;  %4415 = vpow2.f32 %v3827_v14  ;;  %v1848_v51 = vpop.xlane.xlu1 %1847  ;;  %v2618_v37 = vadd.f32 1.0, %v4394_v23  ;;  %v3829_v7 = vmul.f32 -1.442695, %v2046_v44 }
 0x2f2   : > { %v1962_v56 = vpop.xlane.xlu0 %1961  ;;  %v6289_v24 = vpop.eup %4397  ;;  %4417 = vrcp.f32 %v2616_v45  ;;  %v2623_v52 = vadd.f32 1.0, %v4396_v8  ;;  %v2053_v33 = vadd.f32 %v5459_v9, %v1848_v51 }
 0x2f3   : > { %v6292_v18 = vpop.eup %4399  ;;  %4419 = vrcp.f32 %v2554_v16  ;;  %v2110_v20 = vadd.f32 %v5459_v9, %v1962_v56 }
 0x2f4   : > { %v6295_v62 = vpop.eup %4401  ;;  %4421 = vpow2.f32 %v3891_v31  ;;  %v3836_v51 = vmul.f32 -1.442695, %v2053_v33 }
 0x2f5   : > { %v6297_v59 = vpop.eup %4403  ;;  %4423 = vrcp.f32 %v2559_v46  ;;  %v3893_v42 = vmul.f32 -1.442695, %v2110_v20  ;;  %v1974_v49 = vpop.xlane.xlu1 %1973 }
 0x2f6   : > { %v1838_v17 = vpop.xlane.xlu0 %1837  ;;  %v6301_v50 = vpop.eup %4405  ;;  %4425 = vpow2.f32 %v3896_v22  ;;  %v2116_v44 = vadd.f32 %v5459_v9, %v1974_v49 }
 0x2f7   : > { %v2048_v58 = vadd.f32 %v5459_v9, %v1838_v17  ;;  %v4408_v53 = vpop.eup %4407  ;;  %4427 = vrcp.f32 %v2618_v37 }
 0x2f8   : > { %v6303_v41 = vpop.eup %4409  ;;  %4429 = vrcp.f32 %v2623_v52  ;;  %v2619_v13 = vadd.f32 1.0, %v4408_v53 }
 0x2f9   : > { %v3831_v28 = vmul.f32 -1.442695, %v2048_v58  ;;  %v4412_v2 = vpop.eup %4411  ;;  %4431 = vpow2.f32 %v3829_v7  ;;  %v1852_v31 = vpop.xlane.xlu1 %1851 }
 0x2fa   : > { %v1966_v35 = vpop.xlane.xlu0 %1965  ;;  %v6307_v54 = vpop.eup %4413  ;;  %4433 = vpow2.f32 %v3892_v55  ;;  %v2561_v45 = vadd.f32 1.0, %v4412_v2  ;;  %v2055_v20 = vadd.f32 %v5459_v9, %v1852_v31  ;;  %v3899_v55 = vmul.f32 -1.442695, %v2116_v44 }
 0x2fb   : > { %v2112_v29 = vadd.f32 %v5459_v9, %v1966_v35  ;;  %v4416_v48 = vpop.eup %4415  ;;  %4435 = vpow2.f32 %v3893_v42 }
 0x2fc   : > { %v6309_v32 = vpop.eup %4417  ;;  %4437 = vpow2.f32 %v3831_v28  ;;  %v2556_v46 = vadd.f32 1.0, %v4416_v48  ;;  %v3838_v28 = vmul.f32 -1.442695, %v2055_v20 }
 0x2fd   : > { %v3895_v14 = vmul.f32 -1.442695, %v2112_v29  ;;  %v6312_v23 = vpop.eup %4419  ;;  %4439 = vpow2.f32 %v3834_v0  ;;  %v1980_v35 = vpop.xlane.xlu1 %1979 }
 0x2fe   : > { %v1842_v16 = vpop.xlane.xlu0 %1841  ;;  %v4422_v8 = vpop.eup %4421  ;;  %4441 = vrcp.f32 %v2619_v13 }
 0x2ff   : > { %v2050_v56 = vadd.f32 %v5459_v9, %v1842_v16  ;;  %v6316_v22 = vpop.eup %4423  ;;  %4443 = vpow2.f32 %v3895_v14  ;;  %v2620_v26 = vadd.f32 1.0, %v4422_v8 }
 0x300   : > { %v4426_v37 = vpop.eup %4425  ;;  %4445 = vrcp.f32 %v2561_v45  ;;  %v2119_v45 = vadd.f32 %v5459_v9, %v1980_v35 }
 0x301   : > { %v3833_v21 = vmul.f32 -1.442695, %v2050_v56  ;;  %v6319_v17 = vpop.eup %4427  ;;  %4447 = vpow2.f32 %v3898_v30 }
 0x302   : > { %v1970_v52 = vpop.xlane.xlu0 %1969  ;;  %v6322_v58 = vpop.eup %4429  ;;  %4449 = vrcp.f32 %v2556_v46 }
 0x303   : > { %v2114_v7 = vadd.f32 %v5459_v9, %v1970_v52  ;;  %v4432_v53 = vpop.eup %4431  ;;  %4451 = vpow2.f32 %v3833_v21 }
 0x304   : > { %v4434_v49 = vpop.eup %4433  ;;  %4453 = vpow2.f32 %v3836_v51  ;;  %v2558_v13 = vadd.f32 1.0, %v4432_v53  ;;  %v3902_v51 = vmul.f32 -1.442695, %v2119_v45  ;;  %v3288_v53 = vrot.slane %v6303_v41, %v5474_v3 }
 0x305   : > { %v3897_v42 = vmul.f32 -1.442695, %v2114_v7  ;;  %v4436_v0 = vpop.eup %4435  ;;  %4455 = vrcp.f32 %v2620_v26  ;;  %v2621_v14 = vadd.f32 1.0, %v4434_v49 }
 0x306   : > { %v1846_v2 = vpop.xlane.xlu0 %1845  ;;  %v4438_v29 = vpop.eup %4437  ;;  %4457 = vpow2.f32 %v3899_v55  ;;  %v2622_v30 = vadd.f32 1.0, %v4436_v0  ;;  %v3292_v0 = vrot.slane %v6295_v62, %v5489_v47 }
 0x307   : > { %v2052_v25 = vadd.f32 %v5459_v9, %v1846_v2  ;;  %v4440_v48 = vpop.eup %4439  ;;  %4459 = vpow2.f32 %v3897_v42  ;;  %v2560_v8 = vadd.f32 1.0, %v4438_v29 }
 0x308   : > { %v6326_v16 = vpop.eup %4441  ;;  %4461 = vpow2.f32 %v3838_v28  ;;  %v3297_v28 = vrot.slane %v6312_v23, %v5493_v61  ;;  %v3293_v45 = vsel %vm3027_vm0, %v3292_v0, %v3288_v53 }
 0x309   : > { %v3835_v33 = vmul.f32 -1.442695, %v2052_v25  ;;  %v4444_v56 = vpop.eup %4443  ;;  %v2625_v25 = vadd.f32 1.0, %v4426_v37  ;;  %v2563_v37 = vadd.f32 1.0, %v4440_v48  ;;  %v3613_v48 = vrot.slane %v6319_v17, %v5493_v61 }
 0x30a   : > { %v1976_v31 = vpop.xlane.xlu0 %1975  ;;  %v6329_v44 = vpop.eup %4445  ;;  %v2624_v26 = vadd.f32 1.0, %v4444_v56  ;;  %v3618_v61 = vrot.slane %v6326_v16, %v5499_v4 }
 0x30b   : > { %4463 = vpow2.f32 %v3835_v33  ;;  %v2117_v46 = vadd.f32 %v5459_v9, %v1976_v31  ;;  %v4448_v21 = vpop.eup %4447 }
 0x30c   : > { %4465 = vrcp.f32 %v2558_v13  ;;  %v4450_v52 = vpop.eup %4449 }
 0x30d   : > { %4467 = vrcp.f32 %v2621_v14  ;;  %v3900_v20 = vmul.f32 -1.442695, %v2117_v46  ;;  %v4452_v55 = vpop.eup %4451  ;;  %v3307_v62 = vrot.slane %v4450_v52, %v5503_v36 }
 0x30e   : > { %4469 = vrcp.f32 %v2622_v30  ;;  %v1850_v7 = vpop.xlane.xlu0 %1849  ;;  %v4454_v49 = vpop.eup %4453  ;;  %v2562_v35 = vadd.f32 1.0, %v4452_v55  ;;  %v3298_v30 = vsel %vm3034_vm1, %v3297_v28, %v3293_v45  ;;  %v2627_v55 = vadd.f32 1.0, %v4448_v21 }
 0x30f   : > { %4471 = vrcp.f32 %v2560_v8  ;;  %v2054_v42 = vadd.f32 %v5459_v9, %v1850_v7  ;;  %v6336_v2 = vpop.eup %4455  ;;  %v3604_v7 = vrot.slane %v6309_v32, %v5474_v3  ;;  %v2615_v3 = vadd.f32 1.0, %v6289_v24 }
 0x310   : > { %4473 = vpow2.f32 %v3900_v20  ;;  %v4458_v13 = vpop.eup %4457  ;;  %v3312_v32 = vrot.slane %v6307_v54, %v5509_v6  ;;  %v3623_v0 = vrot.slane %v6336_v2, %v5503_v36  ;;  %v3322_v36 = vrot.slane %v6316_v22, %v5523_v19 }
 0x311   : > { %4475 = vpow2.f32 %v3902_v51  ;;  %v3837_v29 = vmul.f32 -1.442695, %v2054_v42  ;;  %v4460_v14 = vpop.eup %4459  ;;  %v3302_v51 = vrot.slane %v6301_v50, %v5499_v4  ;;  %v2565_v42 = vadd.f32 1.0, %v4454_v49 }
 0x312   : > { %4477 = vrcp.f32 %v2624_v26  ;;  %v1978_v41 = vpop.xlane.xlu0 %1977  ;;  %v4462_v23 = vpop.eup %4461  ;;  %v2626_v31 = vadd.f32 1.0, %v4460_v14 }
 0x313   : > { %4479 = vpow2.f32 %v3837_v29  ;;  %v2118_v33 = vadd.f32 %v5459_v9, %v1978_v41  ;;  %v3608_v9 = vrot.slane %v6297_v59, %v5489_v47  ;;  %v3303_v52 = vsel %vm3041_vm2, %v3302_v51, %v3298_v30 }
 0x314   : > { %4481 = vrcp.f32 %v2562_v35  ;;  %v3308_v28 = vsel %vm3048_vm3, %v3307_v62, %v3303_v52  ;;  %v2628_v47 = vadd.f32 1.0, %v4458_v13  ;;  %v2567_v17 = vadd.f32 1.0, %v4462_v23 }
 0x315   : > { %v4464_v56 = vpop.eup %4463  ;;  %4483 = vrcp.f32 %v2625_v25  ;;  %v3901_v8 = vmul.f32 -1.442695, %v2118_v33  ;;  %v3609_v49 = vsel %vm3027_vm0, %v3608_v9, %v3604_v7  ;;  %v3313_v41 = vsel %vm3055_vm4, %v3312_v32, %v3308_v28 }
 0x316   : > { %v4466_v46 = vpop.eup %4465  ;;  %4485 = vrcp.f32 %v2626_v31  ;;  %v2564_v20 = vadd.f32 1.0, %v4464_v56  ;;  %v3614_v13 = vsel %vm3034_vm1, %v3613_v48, %v3609_v49  ;;  %vm3684_vm0 = vcmask 1043459  }
 0x317   : > { %v4468_v26 = vpop.eup %4467  ;;  %4487 = vpow2.f32 %v3901_v8  ;;  %v3317_v35 = vrot.slane %v4466_v46, %v5515_v11  ;;  %v3619_v2 = vsel %vm3041_vm2, %v3618_v61, %v3614_v13  ;;  %vm3686_vm1 = vcmask 1044484  }
 0x318   : > { %v4470_v53 = vpop.eup %4469  ;;  %4489 = vrcp.f32 %v2564_v20  ;;  %v3628_v24 = vrot.slane %v4468_v26, %v5509_v6  ;;  %v3624_v23 = vsel %vm3048_vm3, %v3623_v0, %v3619_v2  ;;  %v3638_v20 = vrot.slane %v6322_v58, %v5523_v19 }
 0x319   : > { %v4472_v50 = vpop.eup %4471  ;;  %4491 = vrcp.f32 %v2563_v37  ;;  %v3318_v4 = vsel %vm3062_vm5, %v3317_v35, %v3313_v41  ;;  %v3633_v16 = vrot.slane %v4470_v53, %v5515_v11  ;;  %v3332_v26 = vrot.slane %v6329_v44, %v5534_v39 }
 0x31a   : > { %v4474_v59 = vpop.eup %4473  ;;  %4493 = vrcp.f32 %v2627_v55  ;;  %v3327_v14 = vrot.slane %v4472_v50, %v5531_v38  ;;  %v3629_v56 = vsel %vm3055_vm4, %v3628_v24, %v3624_v23  ;;  %v3323_v11 = vsel %vm3069_vm6, %v3322_v36, %v3318_v4 }
 0x31b   : > { %v4476_v21 = vpop.eup %4475  ;;  %v2629_v25 = vadd.f32 1.0, %v4474_v59  ;;  %4495 = vrcp.f32 %v2565_v42  ;;  %v3634_v37 = vsel %vm3062_vm5, %v3633_v16, %v3629_v56  ;;  %v3436_v35 = vrot.slane %v6283_v5, %v5824_v40 }
 0x31c   : > { %v4478_v29 = vpop.eup %4477  ;;  %4497 = vrcp.f32 %v2628_v47  ;;  %v2631_v30 = vadd.f32 1.0, %v4476_v21  ;;  %v3328_v22 = vsel %vm3076_vm7, %v3327_v14, %v3323_v11  ;;  %v3639_v55 = vsel %vm3069_vm6, %v3638_v20, %v3634_v37 }
 0x31d   : > { %v4480_v54 = vpop.eup %4479  ;;  %4499 = vrcp.f32 %v2567_v17  ;;  %v3643_v8 = vrot.slane %v4478_v29, %v5531_v38  ;;  %v3333_v53 = vsel %vm3083_vm8, %v3332_v26, %v3328_v22  ;;  %v3437_v5 = vsel %vm3118_vm13, %v3436_v35, %v5899_v12 }
 0x31e   : > { %v4482_v45 = vpop.eup %4481  ;;  %v2566_v33 = vadd.f32 1.0, %v4480_v54  ;;  %4501 = vrcp.f32 %v2629_v25  ;;  %v3594_v0 = vrot.slane %v6292_v18, %v5824_v40  ;;  %vm3688_vm2 = vcmask 1045509  }
 0x31f   : > { %v4484_v6 = vpop.eup %4483  ;;  %v3337_v46 = vrot.slane %v4482_v45, %v5542_v43  ;;  %v3644_v38 = vsel %vm3076_vm7, %v3643_v8, %v3639_v55  ;;  %vm3690_vm3 = vcmask 1046534   ;;  %vm3692_vm4 = vcmask 1047559  }
 0x320   : > { %v4486_v31 = vpop.eup %4485  ;;  %4503 = vrcp.f32 %v2566_v33  ;;  %v3648_v44 = vrot.slane %v4484_v6, %v5534_v39  ;;  %v3595_v16 = vsel %vm3118_vm13, %v3594_v0, %v6263_v1 }
 0x321   : > { %v4488_v62 = vpop.eup %4487  ;;  %4505 = vrcp.f32 %v2615_v3  ;;  %v3338_v52 = vsel %vm3090_vm9, %v3337_v46, %v3333_v53  ;;  %v3653_v42 = vrot.slane %v4486_v31, %v5542_v43  ;;  %v3441_v43 = vrot.slane %v6286_v63, %v5910_v15 }
 0x322   : > { %v4490_v51 = vpop.eup %4489  ;;  %v2630_v9 = vadd.f32 1.0, %v4488_v62  ;;  %4507 = vrcp.f32 %v2631_v30  ;;  %v3649_v59 = vsel %vm3083_vm8, %v3648_v44, %v3644_v38 }
 0x323   : > { %v4492_v7 = vpop.eup %4491  ;;  %v3347_v19 = vrot.slane %v4490_v51, %v5585_v60  ;;  %v3654_v61 = vsel %vm3090_vm9, %v3653_v42, %v3649_v59  ;;  %v3442_v54 = vsel %vm3125_vm14, %v3441_v43, %v3437_v5 }
 0x324   : > { %4509 = vrcp.f32 %v2630_v9  ;;  %v4494_v48 = vpop.eup %4493  ;;  %v3342_v50 = vrot.slane %v4492_v7, %v5571_v10 }
 0x325   : > { %v4496_v58 = vpop.eup %4495  ;;  %v3658_v21 = vrot.slane %v4494_v48, %v5571_v10 }
 0x326   : > { %v4498_v28 = vpop.eup %4497  ;;  %v3343_v3 = vsel %vm3097_vm10, %v3342_v50, %v3338_v52  ;;  %v3352_v49 = vrot.slane %v4496_v58, %v5820_v27 }
 0x327   : > { %v4500_v47 = vpop.eup %4499  ;;  %v3348_v17 = vsel %vm3104_vm11, %v3347_v19, %v3343_v3  ;;  %v3659_v13 = vsel %vm3097_vm10, %v3658_v21, %v3654_v61  ;;  %v3663_v12 = vrot.slane %v4498_v28, %v5585_v60 }
 0x328   : > { %v4502_v32 = vpop.eup %4501  ;;  %v3362_v63 = vrot.slane %v4500_v47, %v5910_v15  ;;  %v3353_v10 = vsel %vm3111_vm12, %v3352_v49, %v3348_v17 }
 0x329   : > { %v3668_v24 = vrot.slane %v4502_v32, %v5820_v27  ;;  %v3664_v45 = vsel %vm3104_vm11, %v3663_v12, %v3659_v13 }
 0x32a   : > { %v4504_v39 = vpop.eup %4503 }
 0x32b   : > { %v3357_v25 = vrot.slane %v4504_v39, %v5824_v40  ;;  %v4506_v29 = vpop.eup %4505  ;;  %v3669_v33 = vsel %vm3111_vm12, %v3668_v24, %v3664_v45 }
 0x32c   : > { %v4508_v41 = vpop.eup %4507  ;;  %v3599_v27 = vrot.slane %v4506_v29, %v5910_v15 }
 0x32d   : > { %v3358_v18 = vsel %vm3118_vm13, %v3357_v25, %v3353_v10  ;;  %v3678_v2 = vrot.slane %v4508_v41, %v5910_v15 }
 0x32e   : > { %v4510_v4 = vpop.eup %4509  ;;  %v3363_v14 = vsel %vm3125_vm14, %v3362_v63, %v3358_v18  ;;  %v3600_v1 = vsel %vm3125_vm14, %v3599_v27, %v3595_v16  ;;  %70 = sbr.rel (!%p68_p10) target bundleno = 56 (0x38), region = 70 }
 0x32f   : > { %v3685_v36 = vsel %vm3684_vm0, %v3363_v14, %v6278_v34  ;;  %v3673_v60 = vrot.slane %v4510_v4, %v5824_v40 }
 0x330   : > { %v3687_v6 = vsel %vm3686_vm1, %v3442_v54, %v3685_v36 }
 0x331   : > { %v3689_v23 = vsel %vm3688_vm2, %v6170_v57, %v3687_v6  ;;  %v3674_v30 = vsel %vm3118_vm13, %v3673_v60, %v3669_v33 }
 0x332   : > { %v3691_v31 = vsel %vm3690_vm3, %v3600_v1, %v3689_v23  ;;  %v3679_v56 = vsel %vm3125_vm14, %v3678_v2, %v3674_v30 }
 0x333   : > { %v3693_v11 = vsel %vm3692_vm4, %v3679_v56, %v3691_v31 }
 0x334   : > { %3697 = vst [vmem:[%s3696_s27] sm:$0xff] %v3693_v11 }
 0x335   :  { %4588 = shalt.err (!%p4585_p1)
}
 0x336   :  { %s4589_s0 = scalar_lea.hbm %s6453_s6, 512 }
 0x337   :  { %p4590_p2 = scmp.ne.s32.totalorder %s6453_s6, %s4589_s0  ;;  %p4593_p3 = scmp.lt.u32.totalorder %s4589_s0, %s6453_s6 }
 0x339   :  { %p4595_p4 = pnand %p4593_p3, %p4590_p2 }
 0x33b   :  { %4598 = shalt.err (!%p4595_p4)
}
 0x33c   :  { %3709 = dma.vmem_to_hbm [thread:$0]  %s3704_s29, 512, %s6453_s6, [#allocation4], %s4615_s9, %s4615_s9, %s4616_s10  }
 0x33d   :  { %4607 = dma.done.wait [#allocation4], 512  }
 0x33e   :  { %4608 = vsyncadd [#allocation4], 4294966784 }
 0x33f   :  { %3713 = vsyncpa [#allocation3], 1 }
 0x340   :  { %3714 = vsyncpa [#allocation6], 1 }
 0x341   :  { %3715 = vsyncpa [#allocation4], 1 }

</bundles_post_ra>
